<compile_context>
chip_gen: v7x
topology: tpu7x:2x2x1
jax: 0.10.0
libtpu: 0.0.40
codegen_flags: <defaults>
</compile_context>

<pallas_src>
import functools

import jax
import jax.numpy as jnp
from jax.experimental import pallas as pl
from jax.experimental.pallas import tpu as pltpu

_EPS = 1e-5
_VMEM_LIMIT = 32 * 1024 * 1024   # safe on all generations (v5e/v6e 128 MiB, v7x 64 MiB)


def _mosaic_params(n_parallel):
    return pltpu.CompilerParams(
        dimension_semantics=("parallel",) * n_parallel,
        vmem_limit_bytes=_VMEM_LIMIT)


# ----------------------------------------------------------------------------
# Pass 1 kernel: 3x3 conv (input pre-padded) for one or more weight sets that
# share the same input, emitting the raw (unnormalized) conv output plus
# per-channel partial sum / sum-of-squares for the tiled BatchNorm reduction.
# One grid step == one batch element.
# ----------------------------------------------------------------------------
def _conv3x3_partial_kernel(xpad_ref, *rest, stride, Ho, Wo, n_w):
    w_refs = rest[:n_w]
    out_refs = rest[n_w:]

    xp = xpad_ref[...]                        # (1, Hp, Wp, Cin), input dtype
    Cin = xp.shape[-1]

    # Extract the 9 shifted tap patches once (shared across all weight sets).
    # TODO(synk): fold the 9 taps into a single K=9*Cin matmul (lane-dim concat
    # of the tap patches) once unaligned lane concatenation is verified to
    # lower on all target Mosaic versions; per-tap dots keep K=Cin, which
    # under-utilizes the MXU contraction width for small Cin.
    # TODO(synk): for stride>1, present contiguous tiles (space-to-depth in the
    # wrapper) instead of strided slices.
    taps = []
    for kh in range(3):
        for kw in range(3):
            t = xp[:, kh:kh + (Ho - 1) * stride + 1:stride,
                      kw:kw + (Wo - 1) * stride + 1:stride, :]   # (1, Ho, Wo, Cin)
            taps.append(t.reshape(Ho * Wo, Cin))

    for wi in range(n_w):
        w_ref = w_refs[wi]                    # (3, 3, Cin, Cout_i)
        cout = w_ref.shape[-1]
        acc = jnp.zeros((Ho * Wo, cout), jnp.float32)
        for kh in range(3):
            for kw in range(3):
                acc = acc + jnp.dot(taps[kh * 3 + kw], w_ref[kh, kw],
                                    preferred_element_type=jnp.float32)
        y_ref, sum_ref, sq_ref = out_refs[3 * wi:3 * wi + 3]
        y_ref[...] = acc.reshape(1, Ho, Wo, cout).astype(y_ref.dtype)
        sum_ref[...] = jnp.sum(acc, axis=0, keepdims=True).reshape(1, 1, cout)
        sq_ref[...] = jnp.sum(acc * acc, axis=0, keepdims=True).reshape(1, 1, cout)


def conv3x3_partial(x_nhwc, weights, *, stride):
    """3x3 conv, padding=1, no bias, for weight sets sharing the same input.

    weights: list of (3, 3, Cin, Cout_i) HWIO arrays.
    Returns per weight set: (raw conv output f32 (N,Ho,Wo,Cout_i),
                             partial channel sums (N,1,Cout_i),
                             partial channel sum-of-squares (N,1,Cout_i)).
    """
    N, H, W, Cin = x_nhwc.shape
    Ho = (H + 2 - 3) // stride + 1
    Wo = (W + 2 - 3) // stride + 1
    Hp, Wp = H + 2, W + 2

    # TODO(synk): move the 1-px halo into the kernel (overlapping blocks or an
    # in-VMEM zero border) to drop this extra HBM round trip of the input.
    xpad = jnp.pad(x_nhwc, ((0, 0), (1, 1), (1, 1), (0, 0)))

    in_specs = [pl.BlockSpec((1, Hp, Wp, Cin), lambda n: (n, 0, 0, 0))]
    out_shape, out_specs = [], []
    flops = 0
    bytes_accessed = xpad.size * xpad.dtype.itemsize
    for w in weights:
        cout = w.shape[-1]
        in_specs.append(pl.BlockSpec((3, 3, Cin, cout), lambda n: (0, 0, 0, 0)))
        out_shape += [jax.ShapeDtypeStruct((N, Ho, Wo, cout), jnp.float32),
                      jax.ShapeDtypeStruct((N, 1, cout), jnp.float32),
                      jax.ShapeDtypeStruct((N, 1, cout), jnp.float32)]
        out_specs += [pl.BlockSpec((1, Ho, Wo, cout), lambda n: (n, 0, 0, 0)),
                      pl.BlockSpec((1, 1, cout), lambda n: (n, 0, 0)),
                      pl.BlockSpec((1, 1, cout), lambda n: (n, 0, 0))]
        flops += 2 * N * Ho * Wo * 9 * Cin * cout
        bytes_accessed += (w.size * w.dtype.itemsize
                           + N * Ho * Wo * cout * 4 + 2 * N * cout * 4)

    kernel = functools.partial(_conv3x3_partial_kernel, stride=stride,
                               Ho=Ho, Wo=Wo, n_w=len(weights))
    outs = pl.pallas_call(
        kernel,
        grid=(N,),
        in_specs=in_specs,
        out_shape=out_shape,
        out_specs=out_specs,
        compiler_params=_mosaic_params(1),
        cost_estimate=pl.CostEstimate(flops=flops, transcendentals=0,
                                      bytes_accessed=bytes_accessed),
    )(xpad, *weights)
    return [tuple(outs[3 * i:3 * i + 3]) for i in range(len(weights))]


# ----------------------------------------------------------------------------
# Pass 2 kernels: apply folded BN (scale/shift) [+ residual with its own folded
# BN] [+ ReLU].  One grid step == one batch element, all axes parallel.
# ----------------------------------------------------------------------------
def _bn_act_kernel(y_ref, scale_ref, shift_ref, o_ref, *, relu):
    y = y_ref[...].astype(jnp.float32)                    # (1, Ho, Wo, C)
    o = y * scale_ref[...] + shift_ref[...]               # (1,1,1,C) broadcast
    if relu:
        o = jnp.maximum(o, 0.0)
    o_ref[...] = o.astype(o_ref.dtype)


def _bn_add_relu_kernel(y_ref, sc_ref, scale_ref, shift_ref,
                        sc_scale_ref, sc_shift_ref, o_ref):
    y = y_ref[...].astype(jnp.float32)
    sc = sc_ref[...].astype(jnp.float32)
    o = (y * scale_ref[...] + shift_ref[...]
         + sc * sc_scale_ref[...] + sc_shift_ref[...])
    o_ref[...] = jnp.maximum(o, 0.0).astype(o_ref.dtype)


def bn_act(y_raw, scale, shift, *, relu, out_dtype):
    N, Ho, Wo, C = y_raw.shape
    big = pl.BlockSpec((1, Ho, Wo, C), lambda n: (n, 0, 0, 0))
    small = pl.BlockSpec((1, 1, 1, C), lambda n: (0, 0, 0, 0))
    kernel = functools.partial(_bn_act_kernel, relu=relu)
    return pl.pallas_call(
        kernel,
        grid=(N,),
        in_specs=[big, small, small],
        out_shape=jax.ShapeDtypeStruct((N, Ho, Wo, C), out_dtype),
        out_specs=big,
        compiler_params=_mosaic_params(1),
        cost_estimate=pl.CostEstimate(
            flops=3 * N * Ho * Wo * C, transcendentals=0,
            bytes_accessed=y_raw.size * y_raw.dtype.itemsize
                           + N * Ho * Wo * C * jnp.dtype(out_dtype).itemsize),
    )(y_raw, scale.reshape(1, 1, 1, C), shift.reshape(1, 1, 1, C))


def bn_add_relu(y_raw, sc, scale, shift, sc_scale, sc_shift, *, out_dtype):
    N, Ho, Wo, C = y_raw.shape
    big = pl.BlockSpec((1, Ho, Wo, C), lambda n: (n, 0, 0, 0))
    small = pl.BlockSpec((1, 1, 1, C), lambda n: (0, 0, 0, 0))
    return pl.pallas_call(
        _bn_add_relu_kernel,
        grid=(N,),
        in_specs=[big, big, small, small, small, small],
        out_shape=jax.ShapeDtypeStruct((N, Ho, Wo, C), out_dtype),
        out_specs=big,
        compiler_params=_mosaic_params(1),
        cost_estimate=pl.CostEstimate(
            flops=6 * N * Ho * Wo * C, transcendentals=0,
            bytes_accessed=y_raw.size * y_raw.dtype.itemsize
                           + sc.size * sc.dtype.itemsize
                           + N * Ho * Wo * C * jnp.dtype(out_dtype).itemsize),
    )(y_raw, sc,
      scale.reshape(1, 1, 1, C), shift.reshape(1, 1, 1, C),
      sc_scale.reshape(1, 1, 1, C), sc_shift.reshape(1, 1, 1, C))


# ----------------------------------------------------------------------------
# Wrapper glue.
# ----------------------------------------------------------------------------
def _bn_scale_shift(psum, psumsq, gamma, beta, count):
    """Fold global batch statistics into per-channel scale/shift (f32)."""
    s = jnp.sum(psum.astype(jnp.float32), axis=(0, 1))        # (C,)
    ss = jnp.sum(psumsq.astype(jnp.float32), axis=(0, 1))     # (C,)
    mean = s / count
    var = ss / count - mean * mean                            # biased, like torch BN
    inv = jax.lax.rsqrt(var + _EPS)
    scale = gamma.astype(jnp.float32) * inv
    shift = beta.astype(jnp.float32) - mean * scale
    return scale, shift


def _to_hwio(w_oihw):
    return jnp.transpose(w_oihw, (2, 3, 1, 0))                # (3, 3, Cin, Cout)


def init_resnet_block_params(key, in_channels, out_channels, stride):
    ks = jax.random.split(key, 9)
    p = {
        "w1": 0.2 * jax.random.normal(ks[0], (out_channels, in_channels, 3, 3), jnp.float32),
        "g1": 1.0 + 0.1 * jax.random.normal(ks[1], (out_channels,), jnp.float32),
        "b1": 0.1 * jax.random.normal(ks[2], (out_channels,), jnp.float32),
        "w2": 0.2 * jax.random.normal(ks[3], (out_channels, out_channels, 3, 3), jnp.float32),
        "g2": 1.0 + 0.1 * jax.random.normal(ks[4], (out_channels,), jnp.float32),
        "b2": 0.1 * jax.random.normal(ks[5], (out_channels,), jnp.float32),
    }
    if stride != 1 or out_channels != in_channels:
        p["ws"] = 0.2 * jax.random.normal(ks[6], (out_channels, in_channels, 3, 3), jnp.float32)
        p["gs"] = 1.0 + 0.1 * jax.random.normal(ks[7], (out_channels,), jnp.float32)
        p["bs"] = 0.1 * jax.random.normal(ks[8], (out_channels,), jnp.float32)
    return p


def resnet_block_forward(x_nchw, params, stride):
    x = jnp.transpose(x_nchw, (0, 2, 3, 1))                   # NCHW -> NHWC
    N, H, W, Cin = x.shape
    Cout = params["w1"].shape[0]
    has_sc = "ws" in params
    if not has_sc:
        # identity shortcut is only valid in this configuration
        assert stride == 1 and Cin == Cout

    # conv1 (+ shortcut conv, sharing a single padded-input read / tap build)
    if has_sc:
        (y1, s1, q1), (ysc, ssc, qsc) = conv3x3_partial(
            x, [_to_hwio(params["w1"]), _to_hwio(params["ws"])], stride=stride)
    else:
        ((y1, s1, q1),) = conv3x3_partial(x, [_to_hwio(params["w1"])], stride=stride)

    _, Ho, Wo, _ = y1.shape
    count = N * Ho * Wo

    # BN1 + ReLU (tiled apply pass)
    scale1, shift1 = _bn_scale_shift(s1, q1, params["g1"], params["b1"], count)
    h = bn_act(y1, scale1, shift1, relu=True, out_dtype=x.dtype)

    # conv2
    ((y2, s2, q2),) = conv3x3_partial(h, [_to_hwio(params["w2"])], stride=1)
    scale2, shift2 = _bn_scale_shift(s2, q2, params["g2"], params["b2"], count)

    # shortcut normalization folded into the final fused BN2 + add + ReLU pass
    if has_sc:
        sc_scale, sc_shift = _bn_scale_shift(ssc, qsc, params["gs"], params["bs"], count)
        sc_src = ysc
    else:
        sc_src = x
        sc_scale = jnp.ones((Cout,), jnp.float32)
        sc_shift = jnp.zeros((Cout,), jnp.float32)

    out = bn_add_relu(y2, sc_src, scale2, shift2, sc_scale, sc_shift,
                      out_dtype=x.dtype)
    return jnp.transpose(out, (0, 3, 1, 2))                   # NHWC -> NCHW


# ----------------------------------------------------------------------------
# Pure-JAX reference for correctness checking.
# ----------------------------------------------------------------------------
def _ref_conv_bn(x, w_oihw, gamma, beta, stride, relu, residual=None):
    y = jax.lax.conv_general_dilated(
        x, jnp.transpose(w_oihw, (2, 3, 1, 0)),
        window_strides=(stride, stride), padding=((1, 1), (1, 1)),
        dimension_numbers=("NHWC", "HWIO", "NHWC"))
    mean = jnp.mean(y, axis=(0, 1, 2), keepdims=True)
    var = jnp.mean((y - mean) ** 2, axis=(0, 1, 2), keepdims=True)
    y = (y - mean) * jax.lax.rsqrt(var + _EPS) * gamma + beta
    if residual is not None:
        y = y + residual
    if relu:
        y = jnp.maximum(y, 0.0)
    return y


def _ref_forward(x_nchw, params, stride):
    x = jnp.transpose(x_nchw, (0, 2, 3, 1))
    h = _ref_conv_bn(x, params["w1"], params["g1"], params["b1"], stride, True)
    if "ws" in params:
        sc = _ref_conv_bn(x, params["ws"], params["gs"], params["bs"], stride, False)
    else:
        sc = x
    out = _ref_conv_bn(h, params["w2"], params["g2"], params["b2"], 1, True,
                       residual=sc)
    return jnp.transpose(out, (0, 3, 1, 2))


if __name__ == "__main__":
    key = jax.random.PRNGKey(0)

    cases = [
        # projection shortcut (out_channels != in_channels)
        dict(batch=2, in_channels=4, out_channels=8, hw=16, stride=1),
        # identity shortcut (stride=1, in == out)
        dict(batch=2, in_channels=8, out_channels=8, hw=16, stride=1),
    ]
    for i, c in enumerate(cases):
        kx, kp, key = jax.random.split(key, 3)
        x = jax.random.normal(
            kx, (c["batch"], c["in_channels"], c["hw"], c["hw"]), jnp.float32)
        params = init_resnet_block_params(
            kp, c["in_channels"], c["out_channels"], c["stride"])

        fwd = jax.jit(functools.partial(resnet_block_forward, stride=c["stride"]))
        out = jax.block_until_ready(fwd(x, params))

        ref = _ref_forward(x, params, c["stride"])
        assert out.shape == ref.shape == (c["batch"], c["out_channels"], c["hw"], c["hw"])
        err = float(jnp.max(jnp.abs(out - ref)))
        assert jnp.allclose(out, ref, rtol=1e-3, atol=1e-3), (i, err)

    print("KERNEL_OK")
</pallas_src>

<mosaic_0001>
module attributes {stable_mosaic.version = 11 : i64} {
  func.func @_conv3x3_partial_kernel(%arg0: i32, %arg1: memref<1x18x18x4xf32, #tpu.memory_space<vmem>>, %arg2: memref<3x3x4x8xf32, #tpu.memory_space<vmem>>, %arg3: memref<3x3x4x8xf32, #tpu.memory_space<vmem>>, %arg4: memref<1x16x16x8xf32, #tpu.memory_space<vmem>>, %arg5: memref<1x1x8xf32, #tpu.memory_space<vmem>>, %arg6: memref<1x1x8xf32, #tpu.memory_space<vmem>>, %arg7: memref<1x16x16x8xf32, #tpu.memory_space<vmem>>, %arg8: memref<1x1x8xf32, #tpu.memory_space<vmem>>, %arg9: memref<1x1x8xf32, #tpu.memory_space<vmem>>) attributes {dimension_semantics = [#tpu.dimension_semantics<parallel>], iteration_bounds = array<i64: 2>, scalar_prefetch = 0 : i64, scratch_operands = 0 : i64, tpu.core_type = #tpu.core_type<tc>, window_params = [{transform_indices = @transform_0, window_bounds = array<i64: 1, 18, 18, 4>}, {pipeline_mode = #tpu.pipeline_mode<synchronous>, transform_indices = @transform_1, window_bounds = array<i64: 3, 3, 4, 8>}, {pipeline_mode = #tpu.pipeline_mode<synchronous>, transform_indices = @transform_2, window_bounds = array<i64: 3, 3, 4, 8>}, {transform_indices = @transform_3, window_bounds = array<i64: 1, 16, 16, 8>}, {transform_indices = @transform_4, window_bounds = array<i64: 1, 1, 8>}, {transform_indices = @transform_5, window_bounds = array<i64: 1, 1, 8>}, {transform_indices = @transform_6, window_bounds = array<i64: 1, 16, 16, 8>}, {transform_indices = @transform_7, window_bounds = array<i64: 1, 1, 8>}, {transform_indices = @transform_8, window_bounds = array<i64: 1, 1, 8>}]} {
    %c0 = arith.constant 0 : index
    %c0_0 = arith.constant 0 : index
    %c0_1 = arith.constant 0 : index
    %c0_2 = arith.constant 0 : index
    %0 = vector.load %arg1[%c0, %c0_0, %c0_1, %c0_2] : memref<1x18x18x4xf32, #tpu.memory_space<vmem>>, vector<1x18x18x4xf32>
    %1 = vector.extract_strided_slice %0 {offsets = [0, 0, 0, 0], sizes = [1, 16, 16, 4], strides = [1, 1, 1, 1]} : vector<1x18x18x4xf32> to vector<1x16x16x4xf32>
    %2 = vector.shape_cast %1 : vector<1x16x16x4xf32> to vector<256x4xf32>
    %3 = vector.extract_strided_slice %0 {offsets = [0, 0, 1, 0], sizes = [1, 16, 16, 4], strides = [1, 1, 1, 1]} : vector<1x18x18x4xf32> to vector<1x16x16x4xf32>
    %4 = vector.shape_cast %3 : vector<1x16x16x4xf32> to vector<256x4xf32>
    %5 = vector.extract_strided_slice %0 {offsets = [0, 0, 2, 0], sizes = [1, 16, 16, 4], strides = [1, 1, 1, 1]} : vector<1x18x18x4xf32> to vector<1x16x16x4xf32>
    %6 = vector.shape_cast %5 : vector<1x16x16x4xf32> to vector<256x4xf32>
    %7 = vector.extract_strided_slice %0 {offsets = [0, 1, 0, 0], sizes = [1, 16, 16, 4], strides = [1, 1, 1, 1]} : vector<1x18x18x4xf32> to vector<1x16x16x4xf32>
    %8 = vector.shape_cast %7 : vector<1x16x16x4xf32> to vector<256x4xf32>
    %9 = vector.extract_strided_slice %0 {offsets = [0, 1, 1, 0], sizes = [1, 16, 16, 4], strides = [1, 1, 1, 1]} : vector<1x18x18x4xf32> to vector<1x16x16x4xf32>
    %10 = vector.shape_cast %9 : vector<1x16x16x4xf32> to vector<256x4xf32>
    %11 = vector.extract_strided_slice %0 {offsets = [0, 1, 2, 0], sizes = [1, 16, 16, 4], strides = [1, 1, 1, 1]} : vector<1x18x18x4xf32> to vector<1x16x16x4xf32>
    %12 = vector.shape_cast %11 : vector<1x16x16x4xf32> to vector<256x4xf32>
    %13 = vector.extract_strided_slice %0 {offsets = [0, 2, 0, 0], sizes = [1, 16, 16, 4], strides = [1, 1, 1, 1]} : vector<1x18x18x4xf32> to vector<1x16x16x4xf32>
    %14 = vector.shape_cast %13 : vector<1x16x16x4xf32> to vector<256x4xf32>
    %15 = vector.extract_strided_slice %0 {offsets = [0, 2, 1, 0], sizes = [1, 16, 16, 4], strides = [1, 1, 1, 1]} : vector<1x18x18x4xf32> to vector<1x16x16x4xf32>
    %16 = vector.shape_cast %15 : vector<1x16x16x4xf32> to vector<256x4xf32>
    %17 = vector.extract_strided_slice %0 {offsets = [0, 2, 2, 0], sizes = [1, 16, 16, 4], strides = [1, 1, 1, 1]} : vector<1x18x18x4xf32> to vector<1x16x16x4xf32>
    %18 = vector.shape_cast %17 : vector<1x16x16x4xf32> to vector<256x4xf32>
    %cst = arith.constant 0.000000e+00 : f32
    %19 = vector.broadcast %cst : f32 to vector<256x8xf32>
    %c0_3 = arith.constant 0 : index
    %c0_4 = arith.constant 0 : index
    %c0_5 = arith.constant 0 : index
    %c0_6 = arith.constant 0 : index
    %20 = vector.load %arg2[%c0_3, %c0_4, %c0_5, %c0_6] : memref<3x3x4x8xf32, #tpu.memory_space<vmem>>, vector<1x1x4x8xf32>
    %21 = vector.shape_cast %20 : vector<1x1x4x8xf32> to vector<4x8xf32>
    %cst_7 = arith.constant dense<0.000000e+00> : vector<256x8xf32>
    %22 = tpu.matmul %2, %21, %cst_7 {dimension_numbers = #tpu.dot_dimension_numbers<[1], [0], [0], [1], [0, 0, 1, 1], [], []>} : vector<256x4xf32>, vector<4x8xf32>, vector<256x8xf32> -> vector<256x8xf32>
    %23 = arith.addf %19, %22 : vector<256x8xf32>
    %c0_8 = arith.constant 0 : index
    %c1 = arith.constant 1 : index
    %c0_9 = arith.constant 0 : index
    %c0_10 = arith.constant 0 : index
    %24 = vector.load %arg2[%c0_8, %c1, %c0_9, %c0_10] : memref<3x3x4x8xf32, #tpu.memory_space<vmem>>, vector<1x1x4x8xf32>
    %25 = vector.shape_cast %24 : vector<1x1x4x8xf32> to vector<4x8xf32>
    %cst_11 = arith.constant dense<0.000000e+00> : vector<256x8xf32>
    %26 = tpu.matmul %4, %25, %cst_11 {dimension_numbers = #tpu.dot_dimension_numbers<[1], [0], [0], [1], [0, 0, 1, 1], [], []>} : vector<256x4xf32>, vector<4x8xf32>, vector<256x8xf32> -> vector<256x8xf32>
    %27 = arith.addf %23, %26 : vector<256x8xf32>
    %c0_12 = arith.constant 0 : index
    %c2 = arith.constant 2 : index
    %c0_13 = arith.constant 0 : index
    %c0_14 = arith.constant 0 : index
    %28 = vector.load %arg2[%c0_12, %c2, %c0_13, %c0_14] : memref<3x3x4x8xf32, #tpu.memory_space<vmem>>, vector<1x1x4x8xf32>
    %29 = vector.shape_cast %28 : vector<1x1x4x8xf32> to vector<4x8xf32>
    %cst_15 = arith.constant dense<0.000000e+00> : vector<256x8xf32>
    %30 = tpu.matmul %6, %29, %cst_15 {dimension_numbers = #tpu.dot_dimension_numbers<[1], [0], [0], [1], [0, 0, 1, 1], [], []>} : vector<256x4xf32>, vector<4x8xf32>, vector<256x8xf32> -> vector<256x8xf32>
    %31 = arith.addf %27, %30 : vector<256x8xf32>
    %c1_16 = arith.constant 1 : index
    %c0_17 = arith.constant 0 : index
    %c0_18 = arith.constant 0 : index
    %c0_19 = arith.constant 0 : index
    %32 = vector.load %arg2[%c1_16, %c0_17, %c0_18, %c0_19] : memref<3x3x4x8xf32, #tpu.memory_space<vmem>>, vector<1x1x4x8xf32>
    %33 = vector.shape_cast %32 : vector<1x1x4x8xf32> to vector<4x8xf32>
    %cst_20 = arith.constant dense<0.000000e+00> : vector<256x8xf32>
    %34 = tpu.matmul %8, %33, %cst_20 {dimension_numbers = #tpu.dot_dimension_numbers<[1], [0], [0], [1], [0, 0, 1, 1], [], []>} : vector<256x4xf32>, vector<4x8xf32>, vector<256x8xf32> -> vector<256x8xf32>
    %35 = arith.addf %31, %34 : vector<256x8xf32>
    %c1_21 = arith.constant 1 : index
    %c1_22 = arith.constant 1 : index
    %c0_23 = arith.constant 0 : index
    %c0_24 = arith.constant 0 : index
    %36 = vector.load %arg2[%c1_21, %c1_22, %c0_23, %c0_24] : memref<3x3x4x8xf32, #tpu.memory_space<vmem>>, vector<1x1x4x8xf32>
    %37 = vector.shape_cast %36 : vector<1x1x4x8xf32> to vector<4x8xf32>
    %cst_25 = arith.constant dense<0.000000e+00> : vector<256x8xf32>
    %38 = tpu.matmul %10, %37, %cst_25 {dimension_numbers = #tpu.dot_dimension_numbers<[1], [0], [0], [1], [0, 0, 1, 1], [], []>} : vector<256x4xf32>, vector<4x8xf32>, vector<256x8xf32> -> vector<256x8xf32>
    %39 = arith.addf %35, %38 : vector<256x8xf32>
    %c1_26 = arith.constant 1 : index
    %c2_27 = arith.constant 2 : index
    %c0_28 = arith.constant 0 : index
    %c0_29 = arith.constant 0 : index
    %40 = vector.load %arg2[%c1_26, %c2_27, %c0_28, %c0_29] : memref<3x3x4x8xf32, #tpu.memory_space<vmem>>, vector<1x1x4x8xf32>
    %41 = vector.shape_cast %40 : vector<1x1x4x8xf32> to vector<4x8xf32>
    %cst_30 = arith.constant dense<0.000000e+00> : vector<256x8xf32>
    %42 = tpu.matmul %12, %41, %cst_30 {dimension_numbers = #tpu.dot_dimension_numbers<[1], [0], [0], [1], [0, 0, 1, 1], [], []>} : vector<256x4xf32>, vector<4x8xf32>, vector<256x8xf32> -> vector<256x8xf32>
    %43 = arith.addf %39, %42 : vector<256x8xf32>
    %c2_31 = arith.constant 2 : index
    %c0_32 = arith.constant 0 : index
    %c0_33 = arith.constant 0 : index
    %c0_34 = arith.constant 0 : index
    %44 = vector.load %arg2[%c2_31, %c0_32, %c0_33, %c0_34] : memref<3x3x4x8xf32, #tpu.memory_space<vmem>>, vector<1x1x4x8xf32>
    %45 = vector.shape_cast %44 : vector<1x1x4x8xf32> to vector<4x8xf32>
    %cst_35 = arith.constant dense<0.000000e+00> : vector<256x8xf32>
    %46 = tpu.matmul %14, %45, %cst_35 {dimension_numbers = #tpu.dot_dimension_numbers<[1], [0], [0], [1], [0, 0, 1, 1], [], []>} : vector<256x4xf32>, vector<4x8xf32>, vector<256x8xf32> -> vector<256x8xf32>
    %47 = arith.addf %43, %46 : vector<256x8xf32>
    %c2_36 = arith.constant 2 : index
    %c1_37 = arith.constant 1 : index
    %c0_38 = arith.constant 0 : index
    %c0_39 = arith.constant 0 : index
    %48 = vector.load %arg2[%c2_36, %c1_37, %c0_38, %c0_39] : memref<3x3x4x8xf32, #tpu.memory_space<vmem>>, vector<1x1x4x8xf32>
    %49 = vector.shape_cast %48 : vector<1x1x4x8xf32> to vector<4x8xf32>
    %cst_40 = arith.constant dense<0.000000e+00> : vector<256x8xf32>
    %50 = tpu.matmul %16, %49, %cst_40 {dimension_numbers = #tpu.dot_dimension_numbers<[1], [0], [0], [1], [0, 0, 1, 1], [], []>} : vector<256x4xf32>, vector<4x8xf32>, vector<256x8xf32> -> vector<256x8xf32>
    %51 = arith.addf %47, %50 : vector<256x8xf32>
    %c2_41 = arith.constant 2 : index
    %c2_42 = arith.constant 2 : index
    %c0_43 = arith.constant 0 : index
    %c0_44 = arith.constant 0 : index
    %52 = vector.load %arg2[%c2_41, %c2_42, %c0_43, %c0_44] : memref<3x3x4x8xf32, #tpu.memory_space<vmem>>, vector<1x1x4x8xf32>
    %53 = vector.shape_cast %52 : vector<1x1x4x8xf32> to vector<4x8xf32>
    %cst_45 = arith.constant dense<0.000000e+00> : vector<256x8xf32>
    %54 = tpu.matmul %18, %53, %cst_45 {dimension_numbers = #tpu.dot_dimension_numbers<[1], [0], [0], [1], [0, 0, 1, 1], [], []>} : vector<256x4xf32>, vector<4x8xf32>, vector<256x8xf32> -> vector<256x8xf32>
    %55 = arith.addf %51, %54 : vector<256x8xf32>
    %56 = vector.shape_cast %55 : vector<256x8xf32> to vector<1x16x16x8xf32>
    %c0_46 = arith.constant 0 : index
    %c0_47 = arith.constant 0 : index
    %c0_48 = arith.constant 0 : index
    %c0_49 = arith.constant 0 : index
    %57 = vector.load %arg4[%c0_46, %c0_47, %c0_48, %c0_49] : memref<1x16x16x8xf32, #tpu.memory_space<vmem>>, vector<1x16x16x8xf32>
    tpu.vector_store %arg4[%c0_46, %c0_47, %c0_48, %c0_49], %56 {strides = array<i32>} : memref<1x16x16x8xf32, #tpu.memory_space<vmem>>, vector<1x16x16x8xf32>,
    %cst_50 = arith.constant dense<0.000000e+00> : vector<8xf32>
    %58 = vector.multi_reduction <add>, %55, %cst_50 [0] : vector<256x8xf32> to vector<8xf32>
    %59 = vector.shape_cast %58 : vector<8xf32> to vector<1x8xf32>
    %60 = vector.shape_cast %59 : vector<1x8xf32> to vector<1x1x8xf32>
    %c0_51 = arith.constant 0 : index
    %c0_52 = arith.constant 0 : index
    %c0_53 = arith.constant 0 : index
    %61 = vector.load %arg5[%c0_51, %c0_52, %c0_53] : memref<1x1x8xf32, #tpu.memory_space<vmem>>, vector<1x1x8xf32>
    tpu.vector_store %arg5[%c0_51, %c0_52, %c0_53], %60 {strides = array<i32>} : memref<1x1x8xf32, #tpu.memory_space<vmem>>, vector<1x1x8xf32>,
    %62 = arith.mulf %55, %55 : vector<256x8xf32>
    %cst_54 = arith.constant dense<0.000000e+00> : vector<8xf32>
    %63 = vector.multi_reduction <add>, %62, %cst_54 [0] : vector<256x8xf32> to vector<8xf32>
    %64 = vector.shape_cast %63 : vector<8xf32> to vector<1x8xf32>
    %65 = vector.shape_cast %64 : vector<1x8xf32> to vector<1x1x8xf32>
    %c0_55 = arith.constant 0 : index
    %c0_56 = arith.constant 0 : index
    %c0_57 = arith.constant 0 : index
    %66 = vector.load %arg6[%c0_55, %c0_56, %c0_57] : memref<1x1x8xf32, #tpu.memory_space<vmem>>, vector<1x1x8xf32>
    tpu.vector_store %arg6[%c0_55, %c0_56, %c0_57], %65 {strides = array<i32>} : memref<1x1x8xf32, #tpu.memory_space<vmem>>, vector<1x1x8xf32>,
    %cst_58 = arith.constant 0.000000e+00 : f32
    %67 = vector.broadcast %cst_58 : f32 to vector<256x8xf32>
    %c0_59 = arith.constant 0 : index
    %c0_60 = arith.constant 0 : index
    %c0_61 = arith.constant 0 : index
    %c0_62 = arith.constant 0 : index
    %68 = vector.load %arg3[%c0_59, %c0_60, %c0_61, %c0_62] : memref<3x3x4x8xf32, #tpu.memory_space<vmem>>, vector<1x1x4x8xf32>
    %69 = vector.shape_cast %68 : vector<1x1x4x8xf32> to vector<4x8xf32>
    %cst_63 = arith.constant dense<0.000000e+00> : vector<256x8xf32>
    %70 = tpu.matmul %2, %69, %cst_63 {dimension_numbers = #tpu.dot_dimension_numbers<[1], [0], [0], [1], [0, 0, 1, 1], [], []>} : vector<256x4xf32>, vector<4x8xf32>, vector<256x8xf32> -> vector<256x8xf32>
    %71 = arith.addf %67, %70 : vector<256x8xf32>
    %c0_64 = arith.constant 0 : index
    %c1_65 = arith.constant 1 : index
    %c0_66 = arith.constant 0 : index
    %c0_67 = arith.constant 0 : index
    %72 = vector.load %arg3[%c0_64, %c1_65, %c0_66, %c0_67] : memref<3x3x4x8xf32, #tpu.memory_space<vmem>>, vector<1x1x4x8xf32>
    %73 = vector.shape_cast %72 : vector<1x1x4x8xf32> to vector<4x8xf32>
    %cst_68 = arith.constant dense<0.000000e+00> : vector<256x8xf32>
    %74 = tpu.matmul %4, %73, %cst_68 {dimension_numbers = #tpu.dot_dimension_numbers<[1], [0], [0], [1], [0, 0, 1, 1], [], []>} : vector<256x4xf32>, vector<4x8xf32>, vector<256x8xf32> -> vector<256x8xf32>
    %75 = arith.addf %71, %74 : vector<256x8xf32>
    %c0_69 = arith.constant 0 : index
    %c2_70 = arith.constant 2 : index
    %c0_71 = arith.constant 0 : index
    %c0_72 = arith.constant 0 : index
    %76 = vector.load %arg3[%c0_69, %c2_70, %c0_71, %c0_72] : memref<3x3x4x8xf32, #tpu.memory_space<vmem>>, vector<1x1x4x8xf32>
    %77 = vector.shape_cast %76 : vector<1x1x4x8xf32> to vector<4x8xf32>
    %cst_73 = arith.constant dense<0.000000e+00> : vector<256x8xf32>
    %78 = tpu.matmul %6, %77, %cst_73 {dimension_numbers = #tpu.dot_dimension_numbers<[1], [0], [0], [1], [0, 0, 1, 1], [], []>} : vector<256x4xf32>, vector<4x8xf32>, vector<256x8xf32> -> vector<256x8xf32>
    %79 = arith.addf %75, %78 : vector<256x8xf32>
    %c1_74 = arith.constant 1 : index
    %c0_75 = arith.constant 0 : index
    %c0_76 = arith.constant 0 : index
    %c0_77 = arith.constant 0 : index
    %80 = vector.load %arg3[%c1_74, %c0_75, %c0_76, %c0_77] : memref<3x3x4x8xf32, #tpu.memory_space<vmem>>, vector<1x1x4x8xf32>
    %81 = vector.shape_cast %80 : vector<1x1x4x8xf32> to vector<4x8xf32>
    %cst_78 = arith.constant dense<0.000000e+00> : vector<256x8xf32>
    %82 = tpu.matmul %8, %81, %cst_78 {dimension_numbers = #tpu.dot_dimension_numbers<[1], [0], [0], [1], [0, 0, 1, 1], [], []>} : vector<256x4xf32>, vector<4x8xf32>, vector<256x8xf32> -> vector<256x8xf32>
    %83 = arith.addf %79, %82 : vector<256x8xf32>
    %c1_79 = arith.constant 1 : index
    %c1_80 = arith.constant 1 : index
    %c0_81 = arith.constant 0 : index
    %c0_82 = arith.constant 0 : index
    %84 = vector.load %arg3[%c1_79, %c1_80, %c0_81, %c0_82] : memref<3x3x4x8xf32, #tpu.memory_space<vmem>>, vector<1x1x4x8xf32>
    %85 = vector.shape_cast %84 : vector<1x1x4x8xf32> to vector<4x8xf32>
    %cst_83 = arith.constant dense<0.000000e+00> : vector<256x8xf32>
    %86 = tpu.matmul %10, %85, %cst_83 {dimension_numbers = #tpu.dot_dimension_numbers<[1], [0], [0], [1], [0, 0, 1, 1], [], []>} : vector<256x4xf32>, vector<4x8xf32>, vector<256x8xf32> -> vector<256x8xf32>
    %87 = arith.addf %83, %86 : vector<256x8xf32>
    %c1_84 = arith.constant 1 : index
    %c2_85 = arith.constant 2 : index
    %c0_86 = arith.constant 0 : index
    %c0_87 = arith.constant 0 : index
    %88 = vector.load %arg3[%c1_84, %c2_85, %c0_86, %c0_87] : memref<3x3x4x8xf32, #tpu.memory_space<vmem>>, vector<1x1x4x8xf32>
    %89 = vector.shape_cast %88 : vector<1x1x4x8xf32> to vector<4x8xf32>
    %cst_88 = arith.constant dense<0.000000e+00> : vector<256x8xf32>
    %90 = tpu.matmul %12, %89, %cst_88 {dimension_numbers = #tpu.dot_dimension_numbers<[1], [0], [0], [1], [0, 0, 1, 1], [], []>} : vector<256x4xf32>, vector<4x8xf32>, vector<256x8xf32> -> vector<256x8xf32>
    %91 = arith.addf %87, %90 : vector<256x8xf32>
    %c2_89 = arith.constant 2 : index
    %c0_90 = arith.constant 0 : index
    %c0_91 = arith.constant 0 : index
    %c0_92 = arith.constant 0 : index
    %92 = vector.load %arg3[%c2_89, %c0_90, %c0_91, %c0_92] : memref<3x3x4x8xf32, #tpu.memory_space<vmem>>, vector<1x1x4x8xf32>
    %93 = vector.shape_cast %92 : vector<1x1x4x8xf32> to vector<4x8xf32>
    %cst_93 = arith.constant dense<0.000000e+00> : vector<256x8xf32>
    %94 = tpu.matmul %14, %93, %cst_93 {dimension_numbers = #tpu.dot_dimension_numbers<[1], [0], [0], [1], [0, 0, 1, 1], [], []>} : vector<256x4xf32>, vector<4x8xf32>, vector<256x8xf32> -> vector<256x8xf32>
    %95 = arith.addf %91, %94 : vector<256x8xf32>
    %c2_94 = arith.constant 2 : index
    %c1_95 = arith.constant 1 : index
    %c0_96 = arith.constant 0 : index
    %c0_97 = arith.constant 0 : index
    %96 = vector.load %arg3[%c2_94, %c1_95, %c0_96, %c0_97] : memref<3x3x4x8xf32, #tpu.memory_space<vmem>>, vector<1x1x4x8xf32>
    %97 = vector.shape_cast %96 : vector<1x1x4x8xf32> to vector<4x8xf32>
    %cst_98 = arith.constant dense<0.000000e+00> : vector<256x8xf32>
    %98 = tpu.matmul %16, %97, %cst_98 {dimension_numbers = #tpu.dot_dimension_numbers<[1], [0], [0], [1], [0, 0, 1, 1], [], []>} : vector<256x4xf32>, vector<4x8xf32>, vector<256x8xf32> -> vector<256x8xf32>
    %99 = arith.addf %95, %98 : vector<256x8xf32>
    %c2_99 = arith.constant 2 : index
    %c2_100 = arith.constant 2 : index
    %c0_101 = arith.constant 0 : index
    %c0_102 = arith.constant 0 : index
    %100 = vector.load %arg3[%c2_99, %c2_100, %c0_101, %c0_102] : memref<3x3x4x8xf32, #tpu.memory_space<vmem>>, vector<1x1x4x8xf32>
    %101 = vector.shape_cast %100 : vector<1x1x4x8xf32> to vector<4x8xf32>
    %cst_103 = arith.constant dense<0.000000e+00> : vector<256x8xf32>
    %102 = tpu.matmul %18, %101, %cst_103 {dimension_numbers = #tpu.dot_dimension_numbers<[1], [0], [0], [1], [0, 0, 1, 1], [], []>} : vector<256x4xf32>, vector<4x8xf32>, vector<256x8xf32> -> vector<256x8xf32>
    %103 = arith.addf %99, %102 : vector<256x8xf32>
    %104 = vector.shape_cast %103 : vector<256x8xf32> to vector<1x16x16x8xf32>
    %c0_104 = arith.constant 0 : index
    %c0_105 = arith.constant 0 : index
    %c0_106 = arith.constant 0 : index
    %c0_107 = arith.constant 0 : index
    %105 = vector.load %arg7[%c0_104, %c0_105, %c0_106, %c0_107] : memref<1x16x16x8xf32, #tpu.memory_space<vmem>>, vector<1x16x16x8xf32>
    tpu.vector_store %arg7[%c0_104, %c0_105, %c0_106, %c0_107], %104 {strides = array<i32>} : memref<1x16x16x8xf32, #tpu.memory_space<vmem>>, vector<1x16x16x8xf32>,
    %cst_108 = arith.constant dense<0.000000e+00> : vector<8xf32>
    %106 = vector.multi_reduction <add>, %103, %cst_108 [0] : vector<256x8xf32> to vector<8xf32>
    %107 = vector.shape_cast %106 : vector<8xf32> to vector<1x8xf32>
    %108 = vector.shape_cast %107 : vector<1x8xf32> to vector<1x1x8xf32>
    %c0_109 = arith.constant 0 : index
    %c0_110 = arith.constant 0 : index
    %c0_111 = arith.constant 0 : index
    %109 = vector.load %arg8[%c0_109, %c0_110, %c0_111] : memref<1x1x8xf32, #tpu.memory_space<vmem>>, vector<1x1x8xf32>
    tpu.vector_store %arg8[%c0_109, %c0_110, %c0_111], %108 {strides = array<i32>} : memref<1x1x8xf32, #tpu.memory_space<vmem>>, vector<1x1x8xf32>,
    %110 = arith.mulf %103, %103 : vector<256x8xf32>
    %cst_112 = arith.constant dense<0.000000e+00> : vector<8xf32>
    %111 = vector.multi_reduction <add>, %110, %cst_112 [0] : vector<256x8xf32> to vector<8xf32>
    %112 = vector.shape_cast %111 : vector<8xf32> to vector<1x8xf32>
    %113 = vector.shape_cast %112 : vector<1x8xf32> to vector<1x1x8xf32>
    %c0_113 = arith.constant 0 : index
    %c0_114 = arith.constant 0 : index
    %c0_115 = arith.constant 0 : index
    %114 = vector.load %arg9[%c0_113, %c0_114, %c0_115] : memref<1x1x8xf32, #tpu.memory_space<vmem>>, vector<1x1x8xf32>
    tpu.vector_store %arg9[%c0_113, %c0_114, %c0_115], %113 {strides = array<i32>} : memref<1x1x8xf32, #tpu.memory_space<vmem>>, vector<1x1x8xf32>,
    return
  }
  func.func @transform_0(%arg0: i32) -> (i32, i32, i32, i32) {
    %c0_i32 = arith.constant 0 : i32
    %c0_i32_0 = arith.constant 0 : i32
    %c0_i32_1 = arith.constant 0 : i32
    %c0_i32_2 = arith.constant 0 : i32
    return %arg0, %c0_i32, %c0_i32_0, %c0_i32_1 : i32, i32, i32, i32
  }
  func.func @transform_1(%arg0: i32) -> (i32, i32, i32, i32) {
    %c0_i32 = arith.constant 0 : i32
    %c0_i32_0 = arith.constant 0 : i32
    %c0_i32_1 = arith.constant 0 : i32
    %c0_i32_2 = arith.constant 0 : i32
    %c0_i32_3 = arith.constant 0 : i32
    return %c0_i32, %c0_i32_0, %c0_i32_1, %c0_i32_2 : i32, i32, i32, i32
  }
  func.func @transform_2(%arg0: i32) -> (i32, i32, i32, i32) {
    %c0_i32 = arith.constant 0 : i32
    %c0_i32_0 = arith.constant 0 : i32
    %c0_i32_1 = arith.constant 0 : i32
    %c0_i32_2 = arith.constant 0 : i32
    %c0_i32_3 = arith.constant 0 : i32
    return %c0_i32, %c0_i32_0, %c0_i32_1, %c0_i32_2 : i32, i32, i32, i32
  }
  func.func @transform_3(%arg0: i32) -> (i32, i32, i32, i32) {
    %c0_i32 = arith.constant 0 : i32
    %c0_i32_0 = arith.constant 0 : i32
    %c0_i32_1 = arith.constant 0 : i32
    %c0_i32_2 = arith.constant 0 : i32
    return %arg0, %c0_i32, %c0_i32_0, %c0_i32_1 : i32, i32, i32, i32
  }
  func.func @transform_4(%arg0: i32) -> (i32, i32, i32) {
    %c0_i32 = arith.constant 0 : i32
    %c0_i32_0 = arith.constant 0 : i32
    %c0_i32_1 = arith.constant 0 : i32
    return %arg0, %c0_i32, %c0_i32_0 : i32, i32, i32
  }
  func.func @transform_5(%arg0: i32) -> (i32, i32, i32) {
    %c0_i32 = arith.constant 0 : i32
    %c0_i32_0 = arith.constant 0 : i32
    %c0_i32_1 = arith.constant 0 : i32
    return %arg0, %c0_i32, %c0_i32_0 : i32, i32, i32
  }
  func.func @transform_6(%arg0: i32) -> (i32, i32, i32, i32) {
    %c0_i32 = arith.constant 0 : i32
    %c0_i32_0 = arith.constant 0 : i32
    %c0_i32_1 = arith.constant 0 : i32
    %c0_i32_2 = arith.constant 0 : i32
    return %arg0, %c0_i32, %c0_i32_0, %c0_i32_1 : i32, i32, i32, i32
  }
  func.func @transform_7(%arg0: i32) -> (i32, i32, i32) {
    %c0_i32 = arith.constant 0 : i32
    %c0_i32_0 = arith.constant 0 : i32
    %c0_i32_1 = arith.constant 0 : i32
    return %arg0, %c0_i32, %c0_i32_0 : i32, i32, i32
  }
  func.func @transform_8(%arg0: i32) -> (i32, i32, i32) {
    %c0_i32 = arith.constant 0 : i32
    %c0_i32_0 = arith.constant 0 : i32
    %c0_i32_1 = arith.constant 0 : i32
    return %arg0, %c0_i32, %c0_i32_0 : i32, i32, i32
  }
}

module attributes {stable_mosaic.version = 11 : i64} {
  func.func @_bn_act_kernel(%arg0: i32, %arg1: memref<1x16x16x8xf32, #tpu.memory_space<vmem>>, %arg2: memref<1x1x1x8xf32, #tpu.memory_space<vmem>>, %arg3: memref<1x1x1x8xf32, #tpu.memory_space<vmem>>, %arg4: memref<1x16x16x8xf32, #tpu.memory_space<vmem>>) attributes {dimension_semantics = [#tpu.dimension_semantics<parallel>], iteration_bounds = array<i64: 2>, scalar_prefetch = 0 : i64, scratch_operands = 0 : i64, tpu.core_type = #tpu.core_type<tc>, window_params = [{transform_indices = @transform_0, window_bounds = array<i64: 1, 16, 16, 8>}, {pipeline_mode = #tpu.pipeline_mode<synchronous>, transform_indices = @transform_1, window_bounds = array<i64: 1, 1, 1, 8>}, {pipeline_mode = #tpu.pipeline_mode<synchronous>, transform_indices = @transform_2, window_bounds = array<i64: 1, 1, 1, 8>}, {transform_indices = @transform_3, window_bounds = array<i64: 1, 16, 16, 8>}]} {
    %c0 = arith.constant 0 : index
    %c0_0 = arith.constant 0 : index
    %c0_1 = arith.constant 0 : index
    %c0_2 = arith.constant 0 : index
    %0 = vector.load %arg1[%c0, %c0_0, %c0_1, %c0_2] : memref<1x16x16x8xf32, #tpu.memory_space<vmem>>, vector<1x16x16x8xf32>
    %c0_3 = arith.constant 0 : index
    %c0_4 = arith.constant 0 : index
    %c0_5 = arith.constant 0 : index
    %c0_6 = arith.constant 0 : index
    %1 = vector.load %arg2[%c0_3, %c0_4, %c0_5, %c0_6] : memref<1x1x1x8xf32, #tpu.memory_space<vmem>>, vector<1x1x1x8xf32>
    %2 = vector.broadcast %1 : vector<1x1x1x8xf32> to vector<1x16x16x8xf32>
    %3 = arith.mulf %0, %2 : vector<1x16x16x8xf32>
    %c0_7 = arith.constant 0 : index
    %c0_8 = arith.constant 0 : index
    %c0_9 = arith.constant 0 : index
    %c0_10 = arith.constant 0 : index
    %4 = vector.load %arg3[%c0_7, %c0_8, %c0_9, %c0_10] : memref<1x1x1x8xf32, #tpu.memory_space<vmem>>, vector<1x1x1x8xf32>
    %5 = vector.broadcast %4 : vector<1x1x1x8xf32> to vector<1x16x16x8xf32>
    %6 = arith.addf %3, %5 : vector<1x16x16x8xf32>
    %cst = arith.constant 0.000000e+00 : f32
    %7 = vector.broadcast %cst : f32 to vector<1x16x16x8xf32>
    %8 = arith.maximumf %6, %7 : vector<1x16x16x8xf32>
    %c0_11 = arith.constant 0 : index
    %c0_12 = arith.constant 0 : index
    %c0_13 = arith.constant 0 : index
    %c0_14 = arith.constant 0 : index
    %9 = vector.load %arg4[%c0_11, %c0_12, %c0_13, %c0_14] : memref<1x16x16x8xf32, #tpu.memory_space<vmem>>, vector<1x16x16x8xf32>
    tpu.vector_store %arg4[%c0_11, %c0_12, %c0_13, %c0_14], %8 {strides = array<i32>} : memref<1x16x16x8xf32, #tpu.memory_space<vmem>>, vector<1x16x16x8xf32>,
    return
  }
  func.func @transform_0(%arg0: i32) -> (i32, i32, i32, i32) {
    %c0_i32 = arith.constant 0 : i32
    %c0_i32_0 = arith.constant 0 : i32
    %c0_i32_1 = arith.constant 0 : i32
    %c0_i32_2 = arith.constant 0 : i32
    return %arg0, %c0_i32, %c0_i32_0, %c0_i32_1 : i32, i32, i32, i32
  }
  func.func @transform_1(%arg0: i32) -> (i32, i32, i32, i32) {
    %c0_i32 = arith.constant 0 : i32
    %c0_i32_0 = arith.constant 0 : i32
    %c0_i32_1 = arith.constant 0 : i32
    %c0_i32_2 = arith.constant 0 : i32
    %c0_i32_3 = arith.constant 0 : i32
    return %c0_i32, %c0_i32_0, %c0_i32_1, %c0_i32_2 : i32, i32, i32, i32
  }
  func.func @transform_2(%arg0: i32) -> (i32, i32, i32, i32) {
    %c0_i32 = arith.constant 0 : i32
    %c0_i32_0 = arith.constant 0 : i32
    %c0_i32_1 = arith.constant 0 : i32
    %c0_i32_2 = arith.constant 0 : i32
    %c0_i32_3 = arith.constant 0 : i32
    return %c0_i32, %c0_i32_0, %c0_i32_1, %c0_i32_2 : i32, i32, i32, i32
  }
  func.func @transform_3(%arg0: i32) -> (i32, i32, i32, i32) {
    %c0_i32 = arith.constant 0 : i32
    %c0_i32_0 = arith.constant 0 : i32
    %c0_i32_1 = arith.constant 0 : i32
    %c0_i32_2 = arith.constant 0 : i32
    return %arg0, %c0_i32, %c0_i32_0, %c0_i32_1 : i32, i32, i32, i32
  }
}

module attributes {stable_mosaic.version = 11 : i64} {
  func.func @_conv3x3_partial_kernel(%arg0: i32, %arg1: memref<1x18x18x8xf32, #tpu.memory_space<vmem>>, %arg2: memref<3x3x8x8xf32, #tpu.memory_space<vmem>>, %arg3: memref<1x16x16x8xf32, #tpu.memory_space<vmem>>, %arg4: memref<1x1x8xf32, #tpu.memory_space<vmem>>, %arg5: memref<1x1x8xf32, #tpu.memory_space<vmem>>) attributes {dimension_semantics = [#tpu.dimension_semantics<parallel>], iteration_bounds = array<i64: 2>, scalar_prefetch = 0 : i64, scratch_operands = 0 : i64, tpu.core_type = #tpu.core_type<tc>, window_params = [{transform_indices = @transform_0, window_bounds = array<i64: 1, 18, 18, 8>}, {pipeline_mode = #tpu.pipeline_mode<synchronous>, transform_indices = @transform_1, window_bounds = array<i64: 3, 3, 8, 8>}, {transform_indices = @transform_2, window_bounds = array<i64: 1, 16, 16, 8>}, {transform_indices = @transform_3, window_bounds = array<i64: 1, 1, 8>}, {transform_indices = @transform_4, window_bounds = array<i64: 1, 1, 8>}]} {
    %c0 = arith.constant 0 : index
    %c0_0 = arith.constant 0 : index
    %c0_1 = arith.constant 0 : index
    %c0_2 = arith.constant 0 : index
    %0 = vector.load %arg1[%c0, %c0_0, %c0_1, %c0_2] : memref<1x18x18x8xf32, #tpu.memory_space<vmem>>, vector<1x18x18x8xf32>
    %1 = vector.extract_strided_slice %0 {offsets = [0, 0, 0, 0], sizes = [1, 16, 16, 8], strides = [1, 1, 1, 1]} : vector<1x18x18x8xf32> to vector<1x16x16x8xf32>
    %2 = vector.shape_cast %1 : vector<1x16x16x8xf32> to vector<256x8xf32>
    %3 = vector.extract_strided_slice %0 {offsets = [0, 0, 1, 0], sizes = [1, 16, 16, 8], strides = [1, 1, 1, 1]} : vector<1x18x18x8xf32> to vector<1x16x16x8xf32>
    %4 = vector.shape_cast %3 : vector<1x16x16x8xf32> to vector<256x8xf32>
    %5 = vector.extract_strided_slice %0 {offsets = [0, 0, 2, 0], sizes = [1, 16, 16, 8], strides = [1, 1, 1, 1]} : vector<1x18x18x8xf32> to vector<1x16x16x8xf32>
    %6 = vector.shape_cast %5 : vector<1x16x16x8xf32> to vector<256x8xf32>
    %7 = vector.extract_strided_slice %0 {offsets = [0, 1, 0, 0], sizes = [1, 16, 16, 8], strides = [1, 1, 1, 1]} : vector<1x18x18x8xf32> to vector<1x16x16x8xf32>
    %8 = vector.shape_cast %7 : vector<1x16x16x8xf32> to vector<256x8xf32>
    %9 = vector.extract_strided_slice %0 {offsets = [0, 1, 1, 0], sizes = [1, 16, 16, 8], strides = [1, 1, 1, 1]} : vector<1x18x18x8xf32> to vector<1x16x16x8xf32>
    %10 = vector.shape_cast %9 : vector<1x16x16x8xf32> to vector<256x8xf32>
    %11 = vector.extract_strided_slice %0 {offsets = [0, 1, 2, 0], sizes = [1, 16, 16, 8], strides = [1, 1, 1, 1]} : vector<1x18x18x8xf32> to vector<1x16x16x8xf32>
    %12 = vector.shape_cast %11 : vector<1x16x16x8xf32> to vector<256x8xf32>
    %13 = vector.extract_strided_slice %0 {offsets = [0, 2, 0, 0], sizes = [1, 16, 16, 8], strides = [1, 1, 1, 1]} : vector<1x18x18x8xf32> to vector<1x16x16x8xf32>
    %14 = vector.shape_cast %13 : vector<1x16x16x8xf32> to vector<256x8xf32>
    %15 = vector.extract_strided_slice %0 {offsets = [0, 2, 1, 0], sizes = [1, 16, 16, 8], strides = [1, 1, 1, 1]} : vector<1x18x18x8xf32> to vector<1x16x16x8xf32>
    %16 = vector.shape_cast %15 : vector<1x16x16x8xf32> to vector<256x8xf32>
    %17 = vector.extract_strided_slice %0 {offsets = [0, 2, 2, 0], sizes = [1, 16, 16, 8], strides = [1, 1, 1, 1]} : vector<1x18x18x8xf32> to vector<1x16x16x8xf32>
    %18 = vector.shape_cast %17 : vector<1x16x16x8xf32> to vector<256x8xf32>
    %cst = arith.constant 0.000000e+00 : f32
    %19 = vector.broadcast %cst : f32 to vector<256x8xf32>
    %c0_3 = arith.constant 0 : index
    %c0_4 = arith.constant 0 : index
    %c0_5 = arith.constant 0 : index
    %c0_6 = arith.constant 0 : index
    %20 = vector.load %arg2[%c0_3, %c0_4, %c0_5, %c0_6] : memref<3x3x8x8xf32, #tpu.memory_space<vmem>>, vector<1x1x8x8xf32>
    %21 = vector.shape_cast %20 : vector<1x1x8x8xf32> to vector<8x8xf32>
    %cst_7 = arith.constant dense<0.000000e+00> : vector<256x8xf32>
    %22 = tpu.matmul %2, %21, %cst_7 {dimension_numbers = #tpu.dot_dimension_numbers<[1], [0], [0], [1], [0, 0, 1, 1], [], []>} : vector<256x8xf32>, vector<8x8xf32>, vector<256x8xf32> -> vector<256x8xf32>
    %23 = arith.addf %19, %22 : vector<256x8xf32>
    %c0_8 = arith.constant 0 : index
    %c1 = arith.constant 1 : index
    %c0_9 = arith.constant 0 : index
    %c0_10 = arith.constant 0 : index
    %24 = vector.load %arg2[%c0_8, %c1, %c0_9, %c0_10] : memref<3x3x8x8xf32, #tpu.memory_space<vmem>>, vector<1x1x8x8xf32>
    %25 = vector.shape_cast %24 : vector<1x1x8x8xf32> to vector<8x8xf32>
    %cst_11 = arith.constant dense<0.000000e+00> : vector<256x8xf32>
    %26 = tpu.matmul %4, %25, %cst_11 {dimension_numbers = #tpu.dot_dimension_numbers<[1], [0], [0], [1], [0, 0, 1, 1], [], []>} : vector<256x8xf32>, vector<8x8xf32>, vector<256x8xf32> -> vector<256x8xf32>
    %27 = arith.addf %23, %26 : vector<256x8xf32>
    %c0_12 = arith.constant 0 : index
    %c2 = arith.constant 2 : index
    %c0_13 = arith.constant 0 : index
    %c0_14 = arith.constant 0 : index
    %28 = vector.load %arg2[%c0_12, %c2, %c0_13, %c0_14] : memref<3x3x8x8xf32, #tpu.memory_space<vmem>>, vector<1x1x8x8xf32>
    %29 = vector.shape_cast %28 : vector<1x1x8x8xf32> to vector<8x8xf32>
    %cst_15 = arith.constant dense<0.000000e+00> : vector<256x8xf32>
    %30 = tpu.matmul %6, %29, %cst_15 {dimension_numbers = #tpu.dot_dimension_numbers<[1], [0], [0], [1], [0, 0, 1, 1], [], []>} : vector<256x8xf32>, vector<8x8xf32>, vector<256x8xf32> -> vector<256x8xf32>
    %31 = arith.addf %27, %30 : vector<256x8xf32>
    %c1_16 = arith.constant 1 : index
    %c0_17 = arith.constant 0 : index
    %c0_18 = arith.constant 0 : index
    %c0_19 = arith.constant 0 : index
    %32 = vector.load %arg2[%c1_16, %c0_17, %c0_18, %c0_19] : memref<3x3x8x8xf32, #tpu.memory_space<vmem>>, vector<1x1x8x8xf32>
    %33 = vector.shape_cast %32 : vector<1x1x8x8xf32> to vector<8x8xf32>
    %cst_20 = arith.constant dense<0.000000e+00> : vector<256x8xf32>
    %34 = tpu.matmul %8, %33, %cst_20 {dimension_numbers = #tpu.dot_dimension_numbers<[1], [0], [0], [1], [0, 0, 1, 1], [], []>} : vector<256x8xf32>, vector<8x8xf32>, vector<256x8xf32> -> vector<256x8xf32>
    %35 = arith.addf %31, %34 : vector<256x8xf32>
    %c1_21 = arith.constant 1 : index
    %c1_22 = arith.constant 1 : index
    %c0_23 = arith.constant 0 : index
    %c0_24 = arith.constant 0 : index
    %36 = vector.load %arg2[%c1_21, %c1_22, %c0_23, %c0_24] : memref<3x3x8x8xf32, #tpu.memory_space<vmem>>, vector<1x1x8x8xf32>
    %37 = vector.shape_cast %36 : vector<1x1x8x8xf32> to vector<8x8xf32>
    %cst_25 = arith.constant dense<0.000000e+00> : vector<256x8xf32>
    %38 = tpu.matmul %10, %37, %cst_25 {dimension_numbers = #tpu.dot_dimension_numbers<[1], [0], [0], [1], [0, 0, 1, 1], [], []>} : vector<256x8xf32>, vector<8x8xf32>, vector<256x8xf32> -> vector<256x8xf32>
    %39 = arith.addf %35, %38 : vector<256x8xf32>
    %c1_26 = arith.constant 1 : index
    %c2_27 = arith.constant 2 : index
    %c0_28 = arith.constant 0 : index
    %c0_29 = arith.constant 0 : index
    %40 = vector.load %arg2[%c1_26, %c2_27, %c0_28, %c0_29] : memref<3x3x8x8xf32, #tpu.memory_space<vmem>>, vector<1x1x8x8xf32>
    %41 = vector.shape_cast %40 : vector<1x1x8x8xf32> to vector<8x8xf32>
    %cst_30 = arith.constant dense<0.000000e+00> : vector<256x8xf32>
    %42 = tpu.matmul %12, %41, %cst_30 {dimension_numbers = #tpu.dot_dimension_numbers<[1], [0], [0], [1], [0, 0, 1, 1], [], []>} : vector<256x8xf32>, vector<8x8xf32>, vector<256x8xf32> -> vector<256x8xf32>
    %43 = arith.addf %39, %42 : vector<256x8xf32>
    %c2_31 = arith.constant 2 : index
    %c0_32 = arith.constant 0 : index
    %c0_33 = arith.constant 0 : index
    %c0_34 = arith.constant 0 : index
    %44 = vector.load %arg2[%c2_31, %c0_32, %c0_33, %c0_34] : memref<3x3x8x8xf32, #tpu.memory_space<vmem>>, vector<1x1x8x8xf32>
    %45 = vector.shape_cast %44 : vector<1x1x8x8xf32> to vector<8x8xf32>
    %cst_35 = arith.constant dense<0.000000e+00> : vector<256x8xf32>
    %46 = tpu.matmul %14, %45, %cst_35 {dimension_numbers = #tpu.dot_dimension_numbers<[1], [0], [0], [1], [0, 0, 1, 1], [], []>} : vector<256x8xf32>, vector<8x8xf32>, vector<256x8xf32> -> vector<256x8xf32>
    %47 = arith.addf %43, %46 : vector<256x8xf32>
    %c2_36 = arith.constant 2 : index
    %c1_37 = arith.constant 1 : index
    %c0_38 = arith.constant 0 : index
    %c0_39 = arith.constant 0 : index
    %48 = vector.load %arg2[%c2_36, %c1_37, %c0_38, %c0_39] : memref<3x3x8x8xf32, #tpu.memory_space<vmem>>, vector<1x1x8x8xf32>
    %49 = vector.shape_cast %48 : vector<1x1x8x8xf32> to vector<8x8xf32>
    %cst_40 = arith.constant dense<0.000000e+00> : vector<256x8xf32>
    %50 = tpu.matmul %16, %49, %cst_40 {dimension_numbers = #tpu.dot_dimension_numbers<[1], [0], [0], [1], [0, 0, 1, 1], [], []>} : vector<256x8xf32>, vector<8x8xf32>, vector<256x8xf32> -> vector<256x8xf32>
    %51 = arith.addf %47, %50 : vector<256x8xf32>
    %c2_41 = arith.constant 2 : index
    %c2_42 = arith.constant 2 : index
    %c0_43 = arith.constant 0 : index
    %c0_44 = arith.constant 0 : index
    %52 = vector.load %arg2[%c2_41, %c2_42, %c0_43, %c0_44] : memref<3x3x8x8xf32, #tpu.memory_space<vmem>>, vector<1x1x8x8xf32>
    %53 = vector.shape_cast %52 : vector<1x1x8x8xf32> to vector<8x8xf32>
    %cst_45 = arith.constant dense<0.000000e+00> : vector<256x8xf32>
    %54 = tpu.matmul %18, %53, %cst_45 {dimension_numbers = #tpu.dot_dimension_numbers<[1], [0], [0], [1], [0, 0, 1, 1], [], []>} : vector<256x8xf32>, vector<8x8xf32>, vector<256x8xf32> -> vector<256x8xf32>
    %55 = arith.addf %51, %54 : vector<256x8xf32>
    %56 = vector.shape_cast %55 : vector<256x8xf32> to vector<1x16x16x8xf32>
    %c0_46 = arith.constant 0 : index
    %c0_47 = arith.constant 0 : index
    %c0_48 = arith.constant 0 : index
    %c0_49 = arith.constant 0 : index
    %57 = vector.load %arg3[%c0_46, %c0_47, %c0_48, %c0_49] : memref<1x16x16x8xf32, #tpu.memory_space<vmem>>, vector<1x16x16x8xf32>
    tpu.vector_store %arg3[%c0_46, %c0_47, %c0_48, %c0_49], %56 {strides = array<i32>} : memref<1x16x16x8xf32, #tpu.memory_space<vmem>>, vector<1x16x16x8xf32>,
    %cst_50 = arith.constant dense<0.000000e+00> : vector<8xf32>
    %58 = vector.multi_reduction <add>, %55, %cst_50 [0] : vector<256x8xf32> to vector<8xf32>
    %59 = vector.shape_cast %58 : vector<8xf32> to vector<1x8xf32>
    %60 = vector.shape_cast %59 : vector<1x8xf32> to vector<1x1x8xf32>
    %c0_51 = arith.constant 0 : index
    %c0_52 = arith.constant 0 : index
    %c0_53 = arith.constant 0 : index
    %61 = vector.load %arg4[%c0_51, %c0_52, %c0_53] : memref<1x1x8xf32, #tpu.memory_space<vmem>>, vector<1x1x8xf32>
    tpu.vector_store %arg4[%c0_51, %c0_52, %c0_53], %60 {strides = array<i32>} : memref<1x1x8xf32, #tpu.memory_space<vmem>>, vector<1x1x8xf32>,
    %62 = arith.mulf %55, %55 : vector<256x8xf32>
    %cst_54 = arith.constant dense<0.000000e+00> : vector<8xf32>
    %63 = vector.multi_reduction <add>, %62, %cst_54 [0] : vector<256x8xf32> to vector<8xf32>
    %64 = vector.shape_cast %63 : vector<8xf32> to vector<1x8xf32>
    %65 = vector.shape_cast %64 : vector<1x8xf32> to vector<1x1x8xf32>
    %c0_55 = arith.constant 0 : index
    %c0_56 = arith.constant 0 : index
    %c0_57 = arith.constant 0 : index
    %66 = vector.load %arg5[%c0_55, %c0_56, %c0_57] : memref<1x1x8xf32, #tpu.memory_space<vmem>>, vector<1x1x8xf32>
    tpu.vector_store %arg5[%c0_55, %c0_56, %c0_57], %65 {strides = array<i32>} : memref<1x1x8xf32, #tpu.memory_space<vmem>>, vector<1x1x8xf32>,
    return
  }
  func.func @transform_0(%arg0: i32) -> (i32, i32, i32, i32) {
    %c0_i32 = arith.constant 0 : i32
    %c0_i32_0 = arith.constant 0 : i32
    %c0_i32_1 = arith.constant 0 : i32
    %c0_i32_2 = arith.constant 0 : i32
    return %arg0, %c0_i32, %c0_i32_0, %c0_i32_1 : i32, i32, i32, i32
  }
  func.func @transform_1(%arg0: i32) -> (i32, i32, i32, i32) {
    %c0_i32 = arith.constant 0 : i32
    %c0_i32_0 = arith.constant 0 : i32
    %c0_i32_1 = arith.constant 0 : i32
    %c0_i32_2 = arith.constant 0 : i32
    %c0_i32_3 = arith.constant 0 : i32
    return %c0_i32, %c0_i32_0, %c0_i32_1, %c0_i32_2 : i32, i32, i32, i32
  }
  func.func @transform_2(%arg0: i32) -> (i32, i32, i32, i32) {
    %c0_i32 = arith.constant 0 : i32
    %c0_i32_0 = arith.constant 0 : i32
    %c0_i32_1 = arith.constant 0 : i32
    %c0_i32_2 = arith.constant 0 : i32
    return %arg0, %c0_i32, %c0_i32_0, %c0_i32_1 : i32, i32, i32, i32
  }
  func.func @transform_3(%arg0: i32) -> (i32, i32, i32) {
    %c0_i32 = arith.constant 0 : i32
    %c0_i32_0 = arith.constant 0 : i32
    %c0_i32_1 = arith.constant 0 : i32
    return %arg0, %c0_i32, %c0_i32_0 : i32, i32, i32
  }
  func.func @transform_4(%arg0: i32) -> (i32, i32, i32) {
    %c0_i32 = arith.constant 0 : i32
    %c0_i32_0 = arith.constant 0 : i32
    %c0_i32_1 = arith.constant 0 : i32
    return %arg0, %c0_i32, %c0_i32_0 : i32, i32, i32
  }
}

module attributes {stable_mosaic.version = 11 : i64} {
  func.func @_bn_add_relu_kernel(%arg0: i32, %arg1: memref<1x16x16x8xf32, #tpu.memory_space<vmem>>, %arg2: memref<1x16x16x8xf32, #tpu.memory_space<vmem>>, %arg3: memref<1x1x1x8xf32, #tpu.memory_space<vmem>>, %arg4: memref<1x1x1x8xf32, #tpu.memory_space<vmem>>, %arg5: memref<1x1x1x8xf32, #tpu.memory_space<vmem>>, %arg6: memref<1x1x1x8xf32, #tpu.memory_space<vmem>>, %arg7: memref<1x16x16x8xf32, #tpu.memory_space<vmem>>) attributes {dimension_semantics = [#tpu.dimension_semantics<parallel>], iteration_bounds = array<i64: 2>, scalar_prefetch = 0 : i64, scratch_operands = 0 : i64, tpu.core_type = #tpu.core_type<tc>, window_params = [{transform_indices = @transform_0, window_bounds = array<i64: 1, 16, 16, 8>}, {transform_indices = @transform_1, window_bounds = array<i64: 1, 16, 16, 8>}, {pipeline_mode = #tpu.pipeline_mode<synchronous>, transform_indices = @transform_2, window_bounds = array<i64: 1, 1, 1, 8>}, {pipeline_mode = #tpu.pipeline_mode<synchronous>, transform_indices = @transform_3, window_bounds = array<i64: 1, 1, 1, 8>}, {pipeline_mode = #tpu.pipeline_mode<synchronous>, transform_indices = @transform_4, window_bounds = array<i64: 1, 1, 1, 8>}, {pipeline_mode = #tpu.pipeline_mode<synchronous>, transform_indices = @transform_5, window_bounds = array<i64: 1, 1, 1, 8>}, {transform_indices = @transform_6, window_bounds = array<i64: 1, 16, 16, 8>}]} {
    %c0 = arith.constant 0 : index
    %c0_0 = arith.constant 0 : index
    %c0_1 = arith.constant 0 : index
    %c0_2 = arith.constant 0 : index
    %0 = vector.load %arg1[%c0, %c0_0, %c0_1, %c0_2] : memref<1x16x16x8xf32, #tpu.memory_space<vmem>>, vector<1x16x16x8xf32>
    %c0_3 = arith.constant 0 : index
    %c0_4 = arith.constant 0 : index
    %c0_5 = arith.constant 0 : index
    %c0_6 = arith.constant 0 : index
    %1 = vector.load %arg2[%c0_3, %c0_4, %c0_5, %c0_6] : memref<1x16x16x8xf32, #tpu.memory_space<vmem>>, vector<1x16x16x8xf32>
    %c0_7 = arith.constant 0 : index
    %c0_8 = arith.constant 0 : index
    %c0_9 = arith.constant 0 : index
    %c0_10 = arith.constant 0 : index
    %2 = vector.load %arg3[%c0_7, %c0_8, %c0_9, %c0_10] : memref<1x1x1x8xf32, #tpu.memory_space<vmem>>, vector<1x1x1x8xf32>
    %3 = vector.broadcast %2 : vector<1x1x1x8xf32> to vector<1x16x16x8xf32>
    %4 = arith.mulf %0, %3 : vector<1x16x16x8xf32>
    %c0_11 = arith.constant 0 : index
    %c0_12 = arith.constant 0 : index
    %c0_13 = arith.constant 0 : index
    %c0_14 = arith.constant 0 : index
    %5 = vector.load %arg4[%c0_11, %c0_12, %c0_13, %c0_14] : memref<1x1x1x8xf32, #tpu.memory_space<vmem>>, vector<1x1x1x8xf32>
    %6 = vector.broadcast %5 : vector<1x1x1x8xf32> to vector<1x16x16x8xf32>
    %7 = arith.addf %4, %6 : vector<1x16x16x8xf32>
    %c0_15 = arith.constant 0 : index
    %c0_16 = arith.constant 0 : index
    %c0_17 = arith.constant 0 : index
    %c0_18 = arith.constant 0 : index
    %8 = vector.load %arg5[%c0_15, %c0_16, %c0_17, %c0_18] : memref<1x1x1x8xf32, #tpu.memory_space<vmem>>, vector<1x1x1x8xf32>
    %9 = vector.broadcast %8 : vector<1x1x1x8xf32> to vector<1x16x16x8xf32>
    %10 = arith.mulf %1, %9 : vector<1x16x16x8xf32>
    %11 = arith.addf %7, %10 : vector<1x16x16x8xf32>
    %c0_19 = arith.constant 0 : index
    %c0_20 = arith.constant 0 : index
    %c0_21 = arith.constant 0 : index
    %c0_22 = arith.constant 0 : index
    %12 = vector.load %arg6[%c0_19, %c0_20, %c0_21, %c0_22] : memref<1x1x1x8xf32, #tpu.memory_space<vmem>>, vector<1x1x1x8xf32>
    %13 = vector.broadcast %12 : vector<1x1x1x8xf32> to vector<1x16x16x8xf32>
    %14 = arith.addf %11, %13 : vector<1x16x16x8xf32>
    %cst = arith.constant 0.000000e+00 : f32
    %15 = vector.broadcast %cst : f32 to vector<1x16x16x8xf32>
    %16 = arith.maximumf %14, %15 : vector<1x16x16x8xf32>
    %c0_23 = arith.constant 0 : index
    %c0_24 = arith.constant 0 : index
    %c0_25 = arith.constant 0 : index
    %c0_26 = arith.constant 0 : index
    %17 = vector.load %arg7[%c0_23, %c0_24, %c0_25, %c0_26] : memref<1x16x16x8xf32, #tpu.memory_space<vmem>>, vector<1x16x16x8xf32>
    tpu.vector_store %arg7[%c0_23, %c0_24, %c0_25, %c0_26], %16 {strides = array<i32>} : memref<1x16x16x8xf32, #tpu.memory_space<vmem>>, vector<1x16x16x8xf32>,
    return
  }
  func.func @transform_0(%arg0: i32) -> (i32, i32, i32, i32) {
    %c0_i32 = arith.constant 0 : i32
    %c0_i32_0 = arith.constant 0 : i32
    %c0_i32_1 = arith.constant 0 : i32
    %c0_i32_2 = arith.constant 0 : i32
    return %arg0, %c0_i32, %c0_i32_0, %c0_i32_1 : i32, i32, i32, i32
  }
  func.func @transform_1(%arg0: i32) -> (i32, i32, i32, i32) {
    %c0_i32 = arith.constant 0 : i32
    %c0_i32_0 = arith.constant 0 : i32
    %c0_i32_1 = arith.constant 0 : i32
    %c0_i32_2 = arith.constant 0 : i32
    return %arg0, %c0_i32, %c0_i32_0, %c0_i32_1 : i32, i32, i32, i32
  }
  func.func @transform_2(%arg0: i32) -> (i32, i32, i32, i32) {
    %c0_i32 = arith.constant 0 : i32
    %c0_i32_0 = arith.constant 0 : i32
    %c0_i32_1 = arith.constant 0 : i32
    %c0_i32_2 = arith.constant 0 : i32
    %c0_i32_3 = arith.constant 0 : i32
    return %c0_i32, %c0_i32_0, %c0_i32_1, %c0_i32_2 : i32, i32, i32, i32
  }
  func.func @transform_3(%arg0: i32) -> (i32, i32, i32, i32) {
    %c0_i32 = arith.constant 0 : i32
    %c0_i32_0 = arith.constant 0 : i32
    %c0_i32_1 = arith.constant 0 : i32
    %c0_i32_2 = arith.constant 0 : i32
    %c0_i32_3 = arith.constant 0 : i32
    return %c0_i32, %c0_i32_0, %c0_i32_1, %c0_i32_2 : i32, i32, i32, i32
  }
  func.func @transform_4(%arg0: i32) -> (i32, i32, i32, i32) {
    %c0_i32 = arith.constant 0 : i32
    %c0_i32_0 = arith.constant 0 : i32
    %c0_i32_1 = arith.constant 0 : i32
    %c0_i32_2 = arith.constant 0 : i32
    %c0_i32_3 = arith.constant 0 : i32
    return %c0_i32, %c0_i32_0, %c0_i32_1, %c0_i32_2 : i32, i32, i32, i32
  }
  func.func @transform_5(%arg0: i32) -> (i32, i32, i32, i32) {
    %c0_i32 = arith.constant 0 : i32
    %c0_i32_0 = arith.constant 0 : i32
    %c0_i32_1 = arith.constant 0 : i32
    %c0_i32_2 = arith.constant 0 : i32
    %c0_i32_3 = arith.constant 0 : i32
    return %c0_i32, %c0_i32_0, %c0_i32_1, %c0_i32_2 : i32, i32, i32, i32
  }
  func.func @transform_6(%arg0: i32) -> (i32, i32, i32, i32) {
    %c0_i32 = arith.constant 0 : i32
    %c0_i32_0 = arith.constant 0 : i32
    %c0_i32_1 = arith.constant 0 : i32
    %c0_i32_2 = arith.constant 0 : i32
    return %arg0, %c0_i32, %c0_i32_0, %c0_i32_1 : i32, i32, i32, i32
  }
}

</mosaic_0001>

<bundles_post_ra>
// kernel: resnet_block_forward.5
= control target key start
LH: loop header
LB: loop body
LE: loop exit
PB: predicated region body
PF: predicated region fallthrough
CT: control target
= control target key end

     0   :  { %s452_s12 = smov 0   ;;  %s643_s0 = inlined_call_operand.vmem [shape: f32[2,16,16,8], index: 0, kind: input, shape index: {}]   ;;  %s644_s1 = inlined_call_operand.vmem [shape: f32[1,1,1,8], index: 1, kind: input, shape index: {}]   ;;  %s645_s2 = inlined_call_operand.vmem [shape: f32[1,1,1,8], index: 2, kind: input, shape index: {}]   ;;  %s646_s3 = inlined_call_operand.vmem [shape: f32[2,16,16,8], index: 3, kind: output, shape index: {}]  }
   0x1 LB: > { %s401_s13 = sadd.s32 4294967295, %s430_s12   ;;  %p405_p0 = scmp.ge.s32.totalorder %s430_s12, 1  ;;  %s430_s12 = sphi %s452_s12, %s13_s12  }
   0x2   : > { %p137_p1 = scmp.lt.s32.totalorder %s430_s12, 3 }
   0x4   : > { %p138_p2 = pnand %p405_p0, %p137_p1 }
   0x5   : > { %p161_p3 = scmp.lt.s32.totalorder (!%p138_p2), %s401_s13, 1  ;;  %v463_v0 = vld [vmem:[%s644_s1] ss:$0 sm:$0xff] (!%p138_p2)  ;;  %vm313_vm0 = vcmask (!%p138_p2), 64512  }
   0x6   : > { %141 = sbr.rel (%p138_p2) target bundleno = 46 (0x2e), region = 32  ;;  %v473_v1 = vld [vmem:[%s645_s2] ss:$0 sm:$0xff] (!%p138_p2) }
   0xd   : > { %s648_s13 = smov (!%p161_p3, %s401_s13), 1 }
   0xe   : > { %s414_s14 = sshll.u32 %s648_s13, 8 }
   0xf   : > { %s468_s19 = scalar_lea.vmem %s643_s0, %s414_s14  ;;  %s496_s24 = scalar_lea.vmem %s646_s3, %s414_s14 }
  0x10   : > { %v171_v2 = vld [vmem:[%s468_s19] sm:$0xff]  ;;  %v172_v3 = vld [vmem:[%s468_s19 + $0x8] sm:$0xff]  ;;  %v173_v4 = vld [vmem:[%s468_s19 + $0x10] sm:$0xff] }
  0x11   : > { %v210_v5 = vmul.f32 %v463_v0, %v171_v2  ;;  %v211_v6 = vmul.f32 %v463_v0, %v172_v3  ;;  %v212_v7 = vmul.f32 %v463_v0, %v173_v4  ;;  %v174_v8 = vld [vmem:[%s468_s19 + $0x18] sm:$0xff]  ;;  %v175_v9 = vld [vmem:[%s468_s19 + $0x20] sm:$0xff]  ;;  %v176_v10 = vld [vmem:[%s468_s19 + $0x28] sm:$0xff] }
  0x12   : > { %v213_v11 = vmul.f32 %v463_v0, %v174_v8  ;;  %v214_v12 = vmul.f32 %v463_v0, %v175_v9  ;;  %v215_v13 = vmul.f32 %v463_v0, %v176_v10  ;;  %v177_v14 = vld [vmem:[%s468_s19 + $0x30] sm:$0xff]  ;;  %v178_v15 = vld [vmem:[%s468_s19 + $0x38] sm:$0xff]  ;;  %v179_v24 = vld [vmem:[%s468_s19 + $0x40] sm:$0xff] }
  0x13   : > { %v249_v16 = vadd.f32 %v473_v1, %v210_v5  ;;  %v250_v17 = vadd.f32 %v473_v1, %v211_v6  ;;  %v251_v18 = vadd.f32 %v473_v1, %v212_v7  ;;  %v216_v19 = vmul.f32 %v463_v0, %v177_v14  ;;  %v180_v25 = vld [vmem:[%s468_s19 + $0x48] sm:$0xff]  ;;  %v181_v26 = vld [vmem:[%s468_s19 + $0x50] sm:$0xff]  ;;  %v182_v31 = vld [vmem:[%s468_s19 + $0x58] sm:$0xff] }
  0x14   : > { %v252_v20 = vadd.f32 %v473_v1, %v213_v11  ;;  %v253_v21 = vadd.f32 %v473_v1, %v214_v12  ;;  %v254_v22 = vadd.f32 %v473_v1, %v215_v13  ;;  %v217_v23 = vmul.f32 %v463_v0, %v178_v15  ;;  %v183_v32 = vld [vmem:[%s468_s19 + $0x60] sm:$0xff]  ;;  %v184_v33 = vld [vmem:[%s468_s19 + $0x68] sm:$0xff]  ;;  %v185_v38 = vld [vmem:[%s468_s19 + $0x70] sm:$0xff] }
  0x15   : > { %v281_v27 = vmax.f32 %v249_v16, 0.0  ;;  %v282_v28 = vmax.f32 %v250_v17, 0.0  ;;  %v283_v29 = vmax.f32 %v251_v18, 0.0  ;;  %v255_v30 = vadd.f32 %v473_v1, %v216_v19  ;;  %v186_v43 = vld [vmem:[%s468_s19 + $0x78] sm:$0xff]  ;;  %v187_v56 = vld [vmem:[%s468_s19 + $0x80] sm:$0xff]  ;;  %v188_v57 = vld [vmem:[%s468_s19 + $0x88] sm:$0xff] }
  0x16   : > { %v284_v34 = vmax.f32 %v252_v20, 0.0  ;;  %v285_v35 = vmax.f32 %v253_v21, 0.0  ;;  %v286_v36 = vmax.f32 %v254_v22, 0.0  ;;  %v256_v37 = vadd.f32 %v473_v1, %v217_v23  ;;  %v189_v58 = vld [vmem:[%s468_s19 + $0x90] sm:$0xff]  ;;  %v190_v63 = vld [vmem:[%s468_s19 + $0x98] sm:$0xff]  ;;  %v191_v2 = vld [vmem:[%s468_s19 + $0xa0] sm:$0xff] }
  0x17   : > { %314 = vst.msk [vmem:[%s496_s24] sm:$0xff] %vm313_vm0, %v281_v27  ;;  %315 = vst.msk [vmem:[%s496_s24 + $0x8] sm:$0xff] %vm313_vm0, %v282_v28  ;;  %v287_v39 = vmax.f32 %v255_v30, 0.0  ;;  %v218_v40 = vmul.f32 %v463_v0, %v179_v24  ;;  %v219_v41 = vmul.f32 %v463_v0, %v180_v25  ;;  %v220_v42 = vmul.f32 %v463_v0, %v181_v26  ;;  %v192_v3 = vld [vmem:[%s468_s19 + $0xa8] sm:$0xff]  ;;  %v193_v8 = vld [vmem:[%s468_s19 + $0xb0] sm:$0xff] }
  0x18   : > { %316 = vst.msk [vmem:[%s496_s24 + $0x10] sm:$0xff] %vm313_vm0, %v283_v29  ;;  %317 = vst.msk [vmem:[%s496_s24 + $0x18] sm:$0xff] %vm313_vm0, %v284_v34  ;;  %v288_v44 = vmax.f32 %v256_v37, 0.0  ;;  %v221_v45 = vmul.f32 %v463_v0, %v182_v31  ;;  %v222_v46 = vmul.f32 %v463_v0, %v183_v32  ;;  %v223_v47 = vmul.f32 %v463_v0, %v184_v33  ;;  %v194_v13 = vld [vmem:[%s468_s19 + $0xb8] sm:$0xff]  ;;  %v195_v26 = vld [vmem:[%s468_s19 + $0xc0] sm:$0xff] }
  0x19   : > { %318 = vst.msk [vmem:[%s496_s24 + $0x20] sm:$0xff] %vm313_vm0, %v285_v35  ;;  %319 = vst.msk [vmem:[%s496_s24 + $0x28] sm:$0xff] %vm313_vm0, %v286_v36  ;;  %v257_v48 = vadd.f32 %v473_v1, %v218_v40  ;;  %v258_v49 = vadd.f32 %v473_v1, %v219_v41  ;;  %v259_v50 = vadd.f32 %v473_v1, %v220_v42  ;;  %v196_v27 = vld [vmem:[%s468_s19 + $0xc8] sm:$0xff]  ;;  %v197_v28 = vld [vmem:[%s468_s19 + $0xd0] sm:$0xff] }
  0x1a   : > { %320 = vst.msk [vmem:[%s496_s24 + $0x30] sm:$0xff] %vm313_vm0, %v287_v39  ;;  %v224_v51 = vmul.f32 %v463_v0, %v185_v38  ;;  %321 = vst.msk [vmem:[%s496_s24 + $0x38] sm:$0xff] %vm313_vm0, %v288_v44  ;;  %v260_v52 = vadd.f32 %v473_v1, %v221_v45  ;;  %v261_v53 = vadd.f32 %v473_v1, %v222_v46  ;;  %v198_v33 = vld [vmem:[%s468_s19 + $0xd8] sm:$0xff]  ;;  %v199_v34 = vld [vmem:[%s468_s19 + $0xe0] sm:$0xff] }
  0x1b   : > { %v262_v54 = vadd.f32 %v473_v1, %v223_v47  ;;  %v225_v55 = vmul.f32 %v463_v0, %v186_v43  ;;  %v289_v59 = vmax.f32 %v257_v48, 0.0  ;;  %v290_v60 = vmax.f32 %v258_v49, 0.0  ;;  %v200_v35 = vld [vmem:[%s468_s19 + $0xe8] sm:$0xff]  ;;  %v201_v40 = vld [vmem:[%s468_s19 + $0xf0] sm:$0xff]  ;;  %v202_v45 = vld [vmem:[%s468_s19 + $0xf8] sm:$0xff] }
  0x1c   : > { %v291_v61 = vmax.f32 %v259_v50, 0.0  ;;  %v263_v62 = vadd.f32 %v473_v1, %v224_v51  ;;  %v292_v4 = vmax.f32 %v260_v52, 0.0  ;;  %v293_v5 = vmax.f32 %v261_v53, 0.0 }
  0x1d   : > { %v294_v6 = vmax.f32 %v262_v54, 0.0  ;;  %v264_v7 = vadd.f32 %v473_v1, %v225_v55  ;;  %322 = vst.msk [vmem:[%s496_s24 + $0x40] sm:$0xff] %vm313_vm0, %v289_v59  ;;  %323 = vst.msk [vmem:[%s496_s24 + $0x48] sm:$0xff] %vm313_vm0, %v290_v60  ;;  %v226_v10 = vmul.f32 %v463_v0, %v187_v56  ;;  %v227_v11 = vmul.f32 %v463_v0, %v188_v57 }
  0x1e   : > { %324 = vst.msk [vmem:[%s496_s24 + $0x50] sm:$0xff] %vm313_vm0, %v291_v61  ;;  %v295_v9 = vmax.f32 %v263_v62, 0.0  ;;  %v228_v12 = vmul.f32 %v463_v0, %v189_v58  ;;  %325 = vst.msk [vmem:[%s496_s24 + $0x58] sm:$0xff] %vm313_vm0, %v292_v4  ;;  %v229_v15 = vmul.f32 %v463_v0, %v190_v63  ;;  %v230_v16 = vmul.f32 %v463_v0, %v191_v2 }
  0x1f   : > { %326 = vst.msk [vmem:[%s496_s24 + $0x60] sm:$0xff] %vm313_vm0, %v293_v5  ;;  %327 = vst.msk [vmem:[%s496_s24 + $0x68] sm:$0xff] %vm313_vm0, %v294_v6  ;;  %v296_v14 = vmax.f32 %v264_v7, 0.0  ;;  %v231_v17 = vmul.f32 %v463_v0, %v192_v3  ;;  %v265_v18 = vadd.f32 %v473_v1, %v226_v10  ;;  %v266_v19 = vadd.f32 %v473_v1, %v227_v11 }
  0x20   : > { %328 = vst.msk [vmem:[%s496_s24 + $0x70] sm:$0xff] %vm313_vm0, %v295_v9  ;;  %v267_v20 = vadd.f32 %v473_v1, %v228_v12  ;;  %v232_v21 = vmul.f32 %v463_v0, %v193_v8  ;;  %v268_v22 = vadd.f32 %v473_v1, %v229_v15  ;;  %v269_v23 = vadd.f32 %v473_v1, %v230_v16 }
  0x21   : > { %329 = vst.msk [vmem:[%s496_s24 + $0x78] sm:$0xff] %vm313_vm0, %v296_v14  ;;  %v270_v24 = vadd.f32 %v473_v1, %v231_v17  ;;  %v233_v25 = vmul.f32 %v463_v0, %v194_v13  ;;  %v297_v29 = vmax.f32 %v265_v18, 0.0  ;;  %v298_v30 = vmax.f32 %v266_v19, 0.0 }
  0x22   : > { %v299_v31 = vmax.f32 %v267_v20, 0.0  ;;  %v271_v32 = vadd.f32 %v473_v1, %v232_v21  ;;  %v300_v36 = vmax.f32 %v268_v22, 0.0  ;;  %v301_v37 = vmax.f32 %v269_v23, 0.0 }
  0x23   : > { %v302_v38 = vmax.f32 %v270_v24, 0.0  ;;  %v272_v39 = vadd.f32 %v473_v1, %v233_v25  ;;  %330 = vst.msk [vmem:[%s496_s24 + $0x80] sm:$0xff] %vm313_vm0, %v297_v29  ;;  %331 = vst.msk [vmem:[%s496_s24 + $0x88] sm:$0xff] %vm313_vm0, %v298_v30  ;;  %v234_v42 = vmul.f32 %v463_v0, %v195_v26  ;;  %v235_v43 = vmul.f32 %v463_v0, %v196_v27 }
  0x24   : > { %332 = vst.msk [vmem:[%s496_s24 + $0x90] sm:$0xff] %vm313_vm0, %v299_v31  ;;  %v303_v41 = vmax.f32 %v271_v32, 0.0  ;;  %v236_v44 = vmul.f32 %v463_v0, %v197_v28  ;;  %333 = vst.msk [vmem:[%s496_s24 + $0x98] sm:$0xff] %vm313_vm0, %v300_v36  ;;  %v237_v47 = vmul.f32 %v463_v0, %v198_v33  ;;  %v238_v48 = vmul.f32 %v463_v0, %v199_v34 }
  0x25   : > { %334 = vst.msk [vmem:[%s496_s24 + $0xa0] sm:$0xff] %vm313_vm0, %v301_v37  ;;  %335 = vst.msk [vmem:[%s496_s24 + $0xa8] sm:$0xff] %vm313_vm0, %v302_v38  ;;  %v304_v46 = vmax.f32 %v272_v39, 0.0  ;;  %v239_v49 = vmul.f32 %v463_v0, %v200_v35  ;;  %v273_v50 = vadd.f32 %v473_v1, %v234_v42  ;;  %v274_v51 = vadd.f32 %v473_v1, %v235_v43 }
  0x26   : > { %336 = vst.msk [vmem:[%s496_s24 + $0xb0] sm:$0xff] %vm313_vm0, %v303_v41  ;;  %v275_v52 = vadd.f32 %v473_v1, %v236_v44  ;;  %v240_v53 = vmul.f32 %v463_v0, %v201_v40  ;;  %v276_v54 = vadd.f32 %v473_v1, %v237_v47  ;;  %v277_v55 = vadd.f32 %v473_v1, %v238_v48 }
  0x27   : > { %337 = vst.msk [vmem:[%s496_s24 + $0xb8] sm:$0xff] %vm313_vm0, %v304_v46  ;;  %v278_v56 = vadd.f32 %v473_v1, %v239_v49  ;;  %v241_v57 = vmul.f32 %v463_v0, %v202_v45  ;;  %v305_v58 = vmax.f32 %v273_v50, 0.0  ;;  %v306_v59 = vmax.f32 %v274_v51, 0.0 }
  0x28   : > { %v307_v60 = vmax.f32 %v275_v52, 0.0  ;;  %v279_v61 = vadd.f32 %v473_v1, %v240_v53  ;;  %v308_v62 = vmax.f32 %v276_v54, 0.0  ;;  %v309_v63 = vmax.f32 %v277_v55, 0.0 }
  0x29   : > { %v310_v2 = vmax.f32 %v278_v56, 0.0  ;;  %v280_v3 = vadd.f32 %v473_v1, %v241_v57  ;;  %338 = vst.msk [vmem:[%s496_s24 + $0xc0] sm:$0xff] %vm313_vm0, %v305_v58  ;;  %339 = vst.msk [vmem:[%s496_s24 + $0xc8] sm:$0xff] %vm313_vm0, %v306_v59 }
  0x2a   : > { %340 = vst.msk [vmem:[%s496_s24 + $0xd0] sm:$0xff] %vm313_vm0, %v307_v60  ;;  %v311_v4 = vmax.f32 %v279_v61, 0.0  ;;  %341 = vst.msk [vmem:[%s496_s24 + $0xd8] sm:$0xff] %vm313_vm0, %v308_v62 }
  0x2b   : > { %342 = vst.msk [vmem:[%s496_s24 + $0xe0] sm:$0xff] %vm313_vm0, %v309_v63  ;;  %343 = vst.msk [vmem:[%s496_s24 + $0xe8] sm:$0xff] %vm313_vm0, %v310_v2  ;;  %v312_v0 = vmax.f32 %v280_v3, 0.0 }
  0x2c   : > { %344 = vst.msk [vmem:[%s496_s24 + $0xf0] sm:$0xff] %vm313_vm0, %v311_v4 }
  0x2d   : > { %345 = vst.msk [vmem:[%s496_s24 + $0xf8] sm:$0xff] %vm313_vm0, %v312_v0 }
  0x2e PF: > { %s13_s12 = sadd.s32 1, %s430_s12  }
  0x2f   : > { %p10_p4 = scmp.ge.s32.totalorder %s13_s12, 4  }
  0x31   :  { %12 = sbr.rel (!%p10_p4) target bundleno = 1 (0x1), region = 62 }

// kernel: resnet_block_forward.7
= control target key start
LH: loop header
LB: loop body
LE: loop exit
PB: predicated region body
PF: predicated region fallthrough
CT: control target
= control target key end

     0   :  { %s727_s21 = smov 0   ;;  %s1034_s0 = inlined_call_operand.vmem [shape: f32[2,16,16,8], index: 0, kind: input, shape index: {}]   ;;  %s1035_s1 = inlined_call_operand.vmem [shape: f32[2,16,16,8], index: 1, kind: input, shape index: {}]   ;;  %s1036_s2 = inlined_call_operand.vmem [shape: f32[1,1,1,8], index: 2, kind: input, shape index: {}]   ;;  %s1037_s3 = inlined_call_operand.vmem [shape: f32[1,1,1,8], index: 3, kind: input, shape index: {}]   ;;  %s1038_s4 = inlined_call_operand.vmem [shape: f32[1,1,1,8], index: 4, kind: input, shape index: {}]   ;;  %s1039_s5 = inlined_call_operand.vmem [shape: f32[1,1,1,8], index: 5, kind: input, shape index: {}]   ;;  %s1040_s6 = inlined_call_operand.vmem [shape: f32[2,16,16,8], index: 6, kind: output, shape index: {}]  }
   0x1 LB: > { %s656_s22 = sadd.s32 4294967295, %s690_s21   ;;  %p660_p0 = scmp.ge.s32.totalorder %s690_s21, 1  ;;  %s690_s21 = sphi %s727_s21, %s16_s21  }
   0x2   : > { %p222_p1 = scmp.lt.s32.totalorder %s690_s21, 3 }
   0x4   : > { %p223_p2 = pnand %p660_p0, %p222_p1 }
   0x5   : > { %p257_p3 = scmp.lt.s32.totalorder (!%p223_p2), %s656_s22, 1  ;;  %v740_v0 = vld [vmem:[%s1036_s2] ss:$0 sm:$0xff] (!%p223_p2)  ;;  %vm556_vm0 = vcmask (!%p223_p2), 64512  }
   0x6   : > { %226 = sbr.rel (%p223_p2) target bundleno = 72 (0x48), region = 44  ;;  %v745_v1 = vld [vmem:[%s1038_s4] ss:$0 sm:$0xff] (!%p223_p2) }
   0x7   : > { %v762_v2 = vld [vmem:[%s1037_s3] ss:$0 sm:$0xff] (!%p223_p2) }
   0x8   : > { %v789_v25 = vld [vmem:[%s1039_s5] ss:$0 sm:$0xff] (!%p223_p2) }
   0xd   : > { %s1042_s22 = smov (!%p257_p3, %s656_s22), 1 }
   0xe   : > { %s735_s23 = sshll.u32 %s1042_s22, 8 }
   0xf   : > { %s751_s30 = scalar_lea.vmem %s1034_s0, %s735_s23  ;;  %s757_s9 = scalar_lea.vmem %s1035_s1, %s735_s23 }
  0x10   : > { %v272_v3 = vld [vmem:[%s751_s30] sm:$0xff]  ;;  %v273_v5 = vld [vmem:[%s751_s30 + $0x8] sm:$0xff]  ;;  %v274_v10 = vld [vmem:[%s751_s30 + $0x10] sm:$0xff]  ;;  %s810_s16 = scalar_lea.vmem %s1040_s6, %s735_s23 }
  0x11   : > { %v304_v4 = vld [vmem:[%s757_s9] sm:$0xff]  ;;  %v343_v6 = vmul.f32 %v740_v0, %v272_v3  ;;  %v305_v8 = vld [vmem:[%s757_s9 + $0x8] sm:$0xff]  ;;  %v344_v9 = vmul.f32 %v740_v0, %v273_v5  ;;  %v306_v11 = vld [vmem:[%s757_s9 + $0x10] sm:$0xff]  ;;  %v345_v13 = vmul.f32 %v740_v0, %v274_v10 }
  0x12   : > { %v421_v7 = vmul.f32 %v745_v1, %v304_v4  ;;  %v422_v12 = vmul.f32 %v745_v1, %v305_v8  ;;  %v423_v14 = vmul.f32 %v745_v1, %v306_v11  ;;  %v275_v15 = vld [vmem:[%s751_s30 + $0x18] sm:$0xff]  ;;  %v276_v17 = vld [vmem:[%s751_s30 + $0x20] sm:$0xff]  ;;  %v277_v23 = vld [vmem:[%s751_s30 + $0x28] sm:$0xff] }
  0x13   : > { %v307_v16 = vld [vmem:[%s757_s9 + $0x18] sm:$0xff]  ;;  %v382_v18 = vadd.f32 %v762_v2, %v343_v6  ;;  %v383_v19 = vadd.f32 %v762_v2, %v344_v9  ;;  %v346_v20 = vmul.f32 %v740_v0, %v275_v15  ;;  %v308_v22 = vld [vmem:[%s757_s9 + $0x20] sm:$0xff]  ;;  %v309_v24 = vld [vmem:[%s757_s9 + $0x28] sm:$0xff]  ;;  %v384_v26 = vadd.f32 %v762_v2, %v345_v13 }
  0x14   : > { %v424_v21 = vmul.f32 %v745_v1, %v307_v16  ;;  %v347_v27 = vmul.f32 %v740_v0, %v276_v17  ;;  %v425_v28 = vmul.f32 %v745_v1, %v308_v22  ;;  %v348_v29 = vmul.f32 %v740_v0, %v277_v23  ;;  %v278_v30 = vld [vmem:[%s751_s30 + $0x30] sm:$0xff]  ;;  %v279_v40 = vld [vmem:[%s751_s30 + $0x38] sm:$0xff]  ;;  %v280_v50 = vld [vmem:[%s751_s30 + $0x40] sm:$0xff] }
  0x15   : > { %v310_v31 = vld [vmem:[%s757_s9 + $0x30] sm:$0xff]  ;;  %v453_v32 = vadd.f32 %v421_v7, %v382_v18  ;;  %v454_v33 = vadd.f32 %v422_v12, %v383_v19  ;;  %v385_v34 = vadd.f32 %v762_v2, %v346_v20  ;;  %v426_v35 = vmul.f32 %v745_v1, %v309_v24  ;;  %v311_v49 = vld [vmem:[%s757_s9 + $0x38] sm:$0xff]  ;;  %v312_v55 = vld [vmem:[%s757_s9 + $0x40] sm:$0xff] }
  0x16   : > { %v455_v36 = vadd.f32 %v423_v14, %v384_v26  ;;  %v386_v37 = vadd.f32 %v762_v2, %v347_v27  ;;  %v387_v38 = vadd.f32 %v762_v2, %v348_v29  ;;  %v349_v39 = vmul.f32 %v740_v0, %v278_v30  ;;  %v281_v60 = vld [vmem:[%s751_s30 + $0x48] sm:$0xff]  ;;  %v282_v5 = vld [vmem:[%s751_s30 + $0x50] sm:$0xff]  ;;  %v283_v7 = vld [vmem:[%s751_s30 + $0x58] sm:$0xff] }
  0x17   : > { %v492_v41 = vadd.f32 %v789_v25, %v453_v32  ;;  %v493_v42 = vadd.f32 %v789_v25, %v454_v33  ;;  %v456_v43 = vadd.f32 %v424_v21, %v385_v34  ;;  %v427_v44 = vmul.f32 %v745_v1, %v310_v31  ;;  %v313_v61 = vld [vmem:[%s757_s9 + $0x48] sm:$0xff]  ;;  %v314_v6 = vld [vmem:[%s757_s9 + $0x50] sm:$0xff]  ;;  %v315_v12 = vld [vmem:[%s757_s9 + $0x58] sm:$0xff] }
  0x18   : > { %v494_v45 = vadd.f32 %v789_v25, %v455_v36  ;;  %v457_v46 = vadd.f32 %v425_v28, %v386_v37  ;;  %v458_v47 = vadd.f32 %v426_v35, %v387_v38  ;;  %v388_v48 = vadd.f32 %v762_v2, %v349_v39  ;;  %v284_v17 = vld [vmem:[%s751_s30 + $0x60] sm:$0xff]  ;;  %v285_v23 = vld [vmem:[%s751_s30 + $0x68] sm:$0xff]  ;;  %v286_v34 = vld [vmem:[%s751_s30 + $0x70] sm:$0xff] }
  0x19   : > { %v524_v51 = vmax.f32 %v492_v41, 0.0  ;;  %v525_v52 = vmax.f32 %v493_v42, 0.0  ;;  %v495_v53 = vadd.f32 %v789_v25, %v456_v43  ;;  %v350_v54 = vmul.f32 %v740_v0, %v279_v40  ;;  %v316_v18 = vld [vmem:[%s757_s9 + $0x60] sm:$0xff]  ;;  %v317_v29 = vld [vmem:[%s757_s9 + $0x68] sm:$0xff]  ;;  %v318_v39 = vld [vmem:[%s757_s9 + $0x70] sm:$0xff] }
  0x1a   : > { %v526_v56 = vmax.f32 %v494_v45, 0.0  ;;  %v496_v57 = vadd.f32 %v789_v25, %v457_v46  ;;  %v497_v58 = vadd.f32 %v789_v25, %v458_v47  ;;  %v459_v59 = vadd.f32 %v427_v44, %v388_v48  ;;  %v287_v44 = vld [vmem:[%s751_s30 + $0x78] sm:$0xff] }
  0x1b   : > { %557 = vst.msk [vmem:[%s810_s16] sm:$0xff] %vm556_vm0, %v524_v51  ;;  %558 = vst.msk [vmem:[%s810_s16 + $0x8] sm:$0xff] %vm556_vm0, %v525_v52  ;;  %v527_v62 = vmax.f32 %v495_v53, 0.0  ;;  %v389_v63 = vadd.f32 %v762_v2, %v350_v54  ;;  %v428_v3 = vmul.f32 %v745_v1, %v311_v49  ;;  %v351_v4 = vmul.f32 %v740_v0, %v280_v50  ;;  %v319_v49 = vld [vmem:[%s757_s9 + $0x78] sm:$0xff]  ;;  %v288_v54 = vld [vmem:[%s751_s30 + $0x80] sm:$0xff] }
  0x1c   : > { %559 = vst.msk [vmem:[%s810_s16 + $0x10] sm:$0xff] %vm556_vm0, %v526_v56  ;;  %v528_v8 = vmax.f32 %v496_v57, 0.0  ;;  %v529_v9 = vmax.f32 %v497_v58, 0.0  ;;  %v498_v10 = vadd.f32 %v789_v25, %v459_v59  ;;  %v429_v11 = vmul.f32 %v745_v1, %v312_v55  ;;  %v320_v59 = vld [vmem:[%s757_s9 + $0x80] sm:$0xff] }
  0x1d   : > { %560 = vst.msk [vmem:[%s810_s16 + $0x18] sm:$0xff] %vm556_vm0, %v527_v62  ;;  %v460_v13 = vadd.f32 %v428_v3, %v389_v63  ;;  %v390_v14 = vadd.f32 %v762_v2, %v351_v4  ;;  %v352_v15 = vmul.f32 %v740_v0, %v281_v60  ;;  %v430_v16 = vmul.f32 %v745_v1, %v313_v61  ;;  %v289_v60 = vld [vmem:[%s751_s30 + $0x88] sm:$0xff] }
  0x1e   : > { %561 = vst.msk [vmem:[%s810_s16 + $0x20] sm:$0xff] %vm556_vm0, %v528_v8  ;;  %562 = vst.msk [vmem:[%s810_s16 + $0x28] sm:$0xff] %vm556_vm0, %v529_v9  ;;  %v530_v19 = vmax.f32 %v498_v10, 0.0  ;;  %v353_v20 = vmul.f32 %v740_v0, %v282_v5  ;;  %v431_v21 = vmul.f32 %v745_v1, %v314_v6  ;;  %v354_v22 = vmul.f32 %v740_v0, %v283_v7  ;;  %v321_v61 = vld [vmem:[%s757_s9 + $0x88] sm:$0xff]  ;;  %v290_v9 = vld [vmem:[%s751_s30 + $0x90] sm:$0xff] }
  0x1f   : > { %v499_v24 = vadd.f32 %v789_v25, %v460_v13  ;;  %v461_v26 = vadd.f32 %v429_v11, %v390_v14  ;;  %v391_v27 = vadd.f32 %v762_v2, %v352_v15  ;;  %v432_v28 = vmul.f32 %v745_v1, %v315_v12  ;;  %v322_v10 = vld [vmem:[%s757_s9 + $0x90] sm:$0xff]  ;;  %v291_v11 = vld [vmem:[%s751_s30 + $0x98] sm:$0xff] }
  0x20   : > { %563 = vst.msk [vmem:[%s810_s16 + $0x30] sm:$0xff] %vm556_vm0, %v530_v19  ;;  %v392_v30 = vadd.f32 %v762_v2, %v353_v20  ;;  %v393_v31 = vadd.f32 %v762_v2, %v354_v22  ;;  %v355_v32 = vmul.f32 %v740_v0, %v284_v17  ;;  %v433_v33 = vmul.f32 %v745_v1, %v316_v18 }
  0x21   : > { %v531_v35 = vmax.f32 %v499_v24, 0.0  ;;  %v500_v36 = vadd.f32 %v789_v25, %v461_v26  ;;  %v462_v37 = vadd.f32 %v430_v16, %v391_v27  ;;  %v356_v38 = vmul.f32 %v740_v0, %v285_v23  ;;  %v323_v16 = vld [vmem:[%s757_s9 + $0x98] sm:$0xff]  ;;  %v324_v27 = vld [vmem:[%s757_s9 + $0xa0] sm:$0xff] }
  0x22   : > { %v463_v40 = vadd.f32 %v431_v21, %v392_v30  ;;  %v464_v41 = vadd.f32 %v432_v28, %v393_v31  ;;  %v394_v42 = vadd.f32 %v762_v2, %v355_v32  ;;  %v434_v43 = vmul.f32 %v745_v1, %v317_v29  ;;  %v292_v21 = vld [vmem:[%s751_s30 + $0xa0] sm:$0xff]  ;;  %v293_v28 = vld [vmem:[%s751_s30 + $0xa8] sm:$0xff] }
  0x23   : > { %564 = vst.msk [vmem:[%s810_s16 + $0x38] sm:$0xff] %vm556_vm0, %v531_v35  ;;  %v532_v45 = vmax.f32 %v500_v36, 0.0  ;;  %v501_v46 = vadd.f32 %v789_v25, %v462_v37  ;;  %v395_v47 = vadd.f32 %v762_v2, %v356_v38  ;;  %v357_v48 = vmul.f32 %v740_v0, %v286_v34  ;;  %v325_v37 = vld [vmem:[%s757_s9 + $0xa8] sm:$0xff]  ;;  %v294_v38 = vld [vmem:[%s751_s30 + $0xb0] sm:$0xff] }
  0x24   : > { %v502_v50 = vadd.f32 %v789_v25, %v463_v40  ;;  %v503_v51 = vadd.f32 %v789_v25, %v464_v41  ;;  %v465_v52 = vadd.f32 %v433_v33, %v394_v42  ;;  %v435_v53 = vmul.f32 %v745_v1, %v318_v39 }
  0x25   : > { %565 = vst.msk [vmem:[%s810_s16 + $0x40] sm:$0xff] %vm556_vm0, %v532_v45  ;;  %v533_v55 = vmax.f32 %v501_v46, 0.0  ;;  %v466_v56 = vadd.f32 %v434_v43, %v395_v47  ;;  %v396_v57 = vadd.f32 %v762_v2, %v357_v48  ;;  %v358_v58 = vmul.f32 %v740_v0, %v287_v44  ;;  %v326_v47 = vld [vmem:[%s757_s9 + $0xb0] sm:$0xff]  ;;  %v295_v48 = vld [vmem:[%s751_s30 + $0xb8] sm:$0xff] }
  0x26   : > { %v534_v62 = vmax.f32 %v502_v50, 0.0  ;;  %v535_v63 = vmax.f32 %v503_v51, 0.0  ;;  %v504_v3 = vadd.f32 %v789_v25, %v465_v52  ;;  %v436_v4 = vmul.f32 %v745_v1, %v319_v49 }
  0x27   : > { %566 = vst.msk [vmem:[%s810_s16 + $0x48] sm:$0xff] %vm556_vm0, %v533_v55  ;;  %v505_v5 = vadd.f32 %v789_v25, %v466_v56  ;;  %v467_v6 = vadd.f32 %v435_v53, %v396_v57  ;;  %v397_v7 = vadd.f32 %v762_v2, %v358_v58  ;;  %v359_v8 = vmul.f32 %v740_v0, %v288_v54  ;;  %v327_v53 = vld [vmem:[%s757_s9 + $0xb8] sm:$0xff]  ;;  %v296_v58 = vld [vmem:[%s751_s30 + $0xc0] sm:$0xff] }
  0x28   : > { %567 = vst.msk [vmem:[%s810_s16 + $0x50] sm:$0xff] %vm556_vm0, %v534_v62  ;;  %568 = vst.msk [vmem:[%s810_s16 + $0x58] sm:$0xff] %vm556_vm0, %v535_v63  ;;  %v536_v12 = vmax.f32 %v504_v3, 0.0  ;;  %v437_v13 = vmul.f32 %v745_v1, %v320_v59  ;;  %v360_v14 = vmul.f32 %v740_v0, %v289_v60  ;;  %v438_v15 = vmul.f32 %v745_v1, %v321_v61  ;;  %v328_v63 = vld [vmem:[%s757_s9 + $0xc0] sm:$0xff]  ;;  %v297_v3 = vld [vmem:[%s751_s30 + $0xc8] sm:$0xff] }
  0x29   : > { %v537_v17 = vmax.f32 %v505_v5, 0.0  ;;  %v506_v18 = vadd.f32 %v789_v25, %v467_v6  ;;  %v468_v19 = vadd.f32 %v436_v4, %v397_v7  ;;  %v398_v20 = vadd.f32 %v762_v2, %v359_v8  ;;  %v329_v4 = vld [vmem:[%s757_s9 + $0xc8] sm:$0xff] }
  0x2a   : > { %569 = vst.msk [vmem:[%s810_s16 + $0x60] sm:$0xff] %vm556_vm0, %v536_v12  ;;  %v399_v22 = vadd.f32 %v762_v2, %v360_v14  ;;  %v361_v23 = vmul.f32 %v740_v0, %v290_v9  ;;  %v439_v24 = vmul.f32 %v745_v1, %v322_v10  ;;  %v362_v26 = vmul.f32 %v740_v0, %v291_v11  ;;  %v330_v14 = vld [vmem:[%s757_s9 + $0xd0] sm:$0xff] }
  0x2b   : > { %570 = vst.msk [vmem:[%s810_s16 + $0x68] sm:$0xff] %vm556_vm0, %v537_v17  ;;  %v538_v29 = vmax.f32 %v506_v18, 0.0  ;;  %v507_v30 = vadd.f32 %v789_v25, %v468_v19  ;;  %v469_v31 = vadd.f32 %v437_v13, %v398_v20  ;;  %v440_v32 = vmul.f32 %v745_v1, %v323_v16  ;;  %v298_v13 = vld [vmem:[%s751_s30 + $0xd0] sm:$0xff]  ;;  %v331_v20 = vld [vmem:[%s757_s9 + $0xd8] sm:$0xff] }
  0x2c   : > { %v470_v33 = vadd.f32 %v438_v15, %v399_v22  ;;  %v400_v34 = vadd.f32 %v762_v2, %v361_v23  ;;  %v401_v35 = vadd.f32 %v762_v2, %v362_v26  ;;  %v363_v36 = vmul.f32 %v740_v0, %v292_v21  ;;  %v299_v15 = vld [vmem:[%s751_s30 + $0xd8] sm:$0xff]  ;;  %v300_v26 = vld [vmem:[%s751_s30 + $0xe0] sm:$0xff] }
  0x2d   : > { %571 = vst.msk [vmem:[%s810_s16 + $0x70] sm:$0xff] %vm556_vm0, %v538_v29  ;;  %v539_v39 = vmax.f32 %v507_v30, 0.0  ;;  %v508_v40 = vadd.f32 %v789_v25, %v469_v31  ;;  %v441_v41 = vmul.f32 %v745_v1, %v324_v27  ;;  %v364_v42 = vmul.f32 %v740_v0, %v293_v28  ;;  %v332_v31 = vld [vmem:[%s757_s9 + $0xe0] sm:$0xff] }
  0x2e   : > { %v509_v43 = vadd.f32 %v789_v25, %v470_v33  ;;  %v471_v44 = vadd.f32 %v439_v24, %v400_v34  ;;  %v472_v45 = vadd.f32 %v440_v32, %v401_v35  ;;  %v402_v46 = vadd.f32 %v762_v2, %v363_v36  ;;  %v301_v32 = vld [vmem:[%s751_s30 + $0xe8] sm:$0xff] }
  0x2f   : > { %572 = vst.msk [vmem:[%s810_s16 + $0x78] sm:$0xff] %vm556_vm0, %v539_v39  ;;  %v540_v49 = vmax.f32 %v508_v40, 0.0  ;;  %v403_v50 = vadd.f32 %v762_v2, %v364_v42  ;;  %v442_v51 = vmul.f32 %v745_v1, %v325_v37  ;;  %v365_v52 = vmul.f32 %v740_v0, %v294_v38  ;;  %v302_v42 = vld [vmem:[%s751_s30 + $0xf0] sm:$0xff] }
  0x30   : > { %v541_v54 = vmax.f32 %v509_v43, 0.0  ;;  %v510_v55 = vadd.f32 %v789_v25, %v471_v44  ;;  %v511_v56 = vadd.f32 %v789_v25, %v472_v45  ;;  %v473_v57 = vadd.f32 %v441_v41, %v402_v46  ;;  %v333_v41 = vld [vmem:[%s757_s9 + $0xe8] sm:$0xff] }
  0x31   : > { %573 = vst.msk [vmem:[%s810_s16 + $0x80] sm:$0xff] %vm556_vm0, %v540_v49  ;;  %v474_v59 = vadd.f32 %v442_v51, %v403_v50  ;;  %v404_v60 = vadd.f32 %v762_v2, %v365_v52  ;;  %v443_v61 = vmul.f32 %v745_v1, %v326_v47  ;;  %v366_v62 = vmul.f32 %v740_v0, %v295_v48  ;;  %v334_v51 = vld [vmem:[%s757_s9 + $0xf0] sm:$0xff]  ;;  %v303_v52 = vld [vmem:[%s751_s30 + $0xf8] sm:$0xff] }
  0x32   : > { %574 = vst.msk [vmem:[%s810_s16 + $0x88] sm:$0xff] %vm556_vm0, %v541_v54  ;;  %v542_v5 = vmax.f32 %v510_v55, 0.0  ;;  %v543_v6 = vmax.f32 %v511_v56, 0.0  ;;  %v512_v7 = vadd.f32 %v789_v25, %v473_v57  ;;  %v444_v8 = vmul.f32 %v745_v1, %v327_v53  ;;  %v335_v57 = vld [vmem:[%s757_s9 + $0xf8] sm:$0xff] }
  0x33   : > { %v513_v9 = vadd.f32 %v789_v25, %v474_v59  ;;  %v475_v10 = vadd.f32 %v443_v61, %v404_v60  ;;  %v405_v11 = vadd.f32 %v762_v2, %v366_v62  ;;  %v367_v12 = vmul.f32 %v740_v0, %v296_v58 }
  0x34   : > { %575 = vst.msk [vmem:[%s810_s16 + $0x90] sm:$0xff] %vm556_vm0, %v542_v5  ;;  %576 = vst.msk [vmem:[%s810_s16 + $0x98] sm:$0xff] %vm556_vm0, %v543_v6  ;;  %v544_v16 = vmax.f32 %v512_v7, 0.0  ;;  %v445_v17 = vmul.f32 %v745_v1, %v328_v63  ;;  %v368_v18 = vmul.f32 %v740_v0, %v297_v3  ;;  %v446_v19 = vmul.f32 %v745_v1, %v329_v4 }
  0x35   : > { %v545_v21 = vmax.f32 %v513_v9, 0.0  ;;  %v514_v22 = vadd.f32 %v789_v25, %v475_v10  ;;  %v476_v23 = vadd.f32 %v444_v8, %v405_v11  ;;  %v406_v24 = vadd.f32 %v762_v2, %v367_v12 }
  0x36   : > { %577 = vst.msk [vmem:[%s810_s16 + $0xa0] sm:$0xff] %vm556_vm0, %v544_v16  ;;  %v407_v27 = vadd.f32 %v762_v2, %v368_v18  ;;  %v369_v28 = vmul.f32 %v740_v0, %v298_v13  ;;  %v447_v29 = vmul.f32 %v745_v1, %v330_v14  ;;  %v370_v30 = vmul.f32 %v740_v0, %v299_v15 }
  0x37   : > { %578 = vst.msk [vmem:[%s810_s16 + $0xa8] sm:$0xff] %vm556_vm0, %v545_v21  ;;  %v546_v33 = vmax.f32 %v514_v22, 0.0  ;;  %v515_v34 = vadd.f32 %v789_v25, %v476_v23  ;;  %v477_v35 = vadd.f32 %v445_v17, %v406_v24  ;;  %v448_v36 = vmul.f32 %v745_v1, %v331_v20 }
  0x38   : > { %v478_v37 = vadd.f32 %v446_v19, %v407_v27  ;;  %v408_v38 = vadd.f32 %v762_v2, %v369_v28  ;;  %v409_v39 = vadd.f32 %v762_v2, %v370_v30  ;;  %v371_v40 = vmul.f32 %v740_v0, %v300_v26 }
  0x39   : > { %579 = vst.msk [vmem:[%s810_s16 + $0xb0] sm:$0xff] %vm556_vm0, %v546_v33  ;;  %v547_v43 = vmax.f32 %v515_v34, 0.0  ;;  %v516_v44 = vadd.f32 %v789_v25, %v477_v35  ;;  %v449_v45 = vmul.f32 %v745_v1, %v332_v31  ;;  %v372_v46 = vmul.f32 %v740_v0, %v301_v32 }
  0x3a   : > { %v517_v47 = vadd.f32 %v789_v25, %v478_v37  ;;  %v479_v48 = vadd.f32 %v447_v29, %v408_v38  ;;  %v480_v49 = vadd.f32 %v448_v36, %v409_v39  ;;  %v410_v50 = vadd.f32 %v762_v2, %v371_v40 }
  0x3b   : > { %580 = vst.msk [vmem:[%s810_s16 + $0xb8] sm:$0xff] %vm556_vm0, %v547_v43  ;;  %v548_v53 = vmax.f32 %v516_v44, 0.0  ;;  %v411_v54 = vadd.f32 %v762_v2, %v372_v46  ;;  %v450_v55 = vmul.f32 %v745_v1, %v333_v41  ;;  %v373_v56 = vmul.f32 %v740_v0, %v302_v42 }
  0x3c   : > { %v549_v58 = vmax.f32 %v517_v47, 0.0  ;;  %v518_v59 = vadd.f32 %v789_v25, %v479_v48  ;;  %v519_v60 = vadd.f32 %v789_v25, %v480_v49  ;;  %v481_v61 = vadd.f32 %v449_v45, %v410_v50 }
  0x3d   : > { %581 = vst.msk [vmem:[%s810_s16 + $0xc0] sm:$0xff] %vm556_vm0, %v548_v53  ;;  %v482_v62 = vadd.f32 %v450_v55, %v411_v54  ;;  %v412_v63 = vadd.f32 %v762_v2, %v373_v56  ;;  %v451_v3 = vmul.f32 %v745_v1, %v334_v51  ;;  %v374_v4 = vmul.f32 %v740_v0, %v303_v52 }
  0x3e   : > { %582 = vst.msk [vmem:[%s810_s16 + $0xc8] sm:$0xff] %vm556_vm0, %v549_v58  ;;  %v550_v5 = vmax.f32 %v518_v59, 0.0  ;;  %v551_v6 = vmax.f32 %v519_v60, 0.0  ;;  %v520_v7 = vadd.f32 %v789_v25, %v481_v61  ;;  %v452_v8 = vmul.f32 %v745_v1, %v335_v57 }
  0x3f   : > { %v521_v9 = vadd.f32 %v789_v25, %v482_v62  ;;  %v483_v10 = vadd.f32 %v451_v3, %v412_v63  ;;  %v413_v11 = vadd.f32 %v762_v2, %v374_v4 }
  0x40   : > { %583 = vst.msk [vmem:[%s810_s16 + $0xd0] sm:$0xff] %vm556_vm0, %v550_v5  ;;  %584 = vst.msk [vmem:[%s810_s16 + $0xd8] sm:$0xff] %vm556_vm0, %v551_v6  ;;  %v552_v0 = vmax.f32 %v520_v7, 0.0 }
  0x41   : > { %v553_v12 = vmax.f32 %v521_v9, 0.0  ;;  %v522_v13 = vadd.f32 %v789_v25, %v483_v10  ;;  %v484_v14 = vadd.f32 %v452_v8, %v413_v11 }
  0x42   : > { %585 = vst.msk [vmem:[%s810_s16 + $0xe0] sm:$0xff] %vm556_vm0, %v552_v0 }
  0x43   : > { %586 = vst.msk [vmem:[%s810_s16 + $0xe8] sm:$0xff] %vm556_vm0, %v553_v12  ;;  %v554_v1 = vmax.f32 %v522_v13, 0.0  ;;  %v523_v15 = vadd.f32 %v789_v25, %v484_v14 }
  0x45   : > { %587 = vst.msk [vmem:[%s810_s16 + $0xf0] sm:$0xff] %vm556_vm0, %v554_v1  ;;  %v555_v16 = vmax.f32 %v523_v15, 0.0 }
  0x47   : > { %588 = vst.msk [vmem:[%s810_s16 + $0xf8] sm:$0xff] %vm556_vm0, %v555_v16 }
  0x48 PF: > { %s16_s21 = sadd.s32 1, %s690_s21  }
  0x49   : > { %p13_p4 = scmp.ge.s32.totalorder %s16_s21, 4  }
  0x4b   :  { %15 = sbr.rel (!%p13_p4) target bundleno = 1 (0x1), region = 77 }

// kernel: resnet_block_forward.6
= control target key start
LH: loop header
LB: loop body
LE: loop exit
PB: predicated region body
PF: predicated region fallthrough
CT: control target
= control target key end

     0   :  { %s4652_s15 = smov 0   ;;  %s5920_s0 = inlined_call_operand.vmem [shape: f32[2,18,18,8], index: 0, kind: input, shape index: {}]   ;;  %s5921_s1 = inlined_call_operand.vmem [shape: f32[3,3,8,8], index: 1, kind: input, shape index: {}]   ;;  %s5922_s2 = inlined_call_operand.vmem [shape: f32[2,16,16,8], index: 2, kind: output, shape index: {0}]   ;;  %s5923_s3 = inlined_call_operand.vmem [shape: f32[2,1,8], index: 3, kind: output, shape index: {1}]   ;;  %s5924_s4 = inlined_call_operand.vmem [shape: f32[2,1,8], index: 4, kind: output, shape index: {2}]  }
   0x1 LB: > { %s3298_s16 = sadd.s32 4294967295, %s4625_s15   ;;  %p3302_p0 = scmp.ge.s32.totalorder %s4625_s15, 1  ;;  %s4625_s15 = sphi %s4652_s15, %s15_s15  }
   0x2   : > { %p167_p1 = scmp.lt.s32.totalorder %s4625_s15, 3 }
   0x4   : > { %p168_p2 = pnand %p3302_p0, %p167_p1 }
   0x6   : > { %171 = sbr.rel (%p168_p2) target bundleno = 544 (0x220), region = 28 }
   0xd   : > { %v3306_v0 = vld [vmem:[%s5921_s1 + $0x8] sm:$0xff]  ;;  %v4666_v1 = vld [vmem:[%s5921_s1 + $0x20] sm:$0xff]  ;;  %p199_p3 = scmp.lt.s32.totalorder %s3298_s16, 1  ;;  %vm317_vm0 = vcmask 1046528   ;;  %vm508_vm1 = vcmask 64512   ;;  %v4747_v33 = vld [vmem:[%s5921_s1 + $0x30] sm:$0xff] }
   0xe   : > { %v505_v2 = vld [vmem:[%s5921_s1] sm:$0xff]  ;;  %3902 = vmatprep.subr.mxu1 %v3306_v0  ;;  %4102 = vmatprep.subr.mxu0 %v4666_v1  ;;  %v3470_v3 = vld [vmem:[%s5921_s1 + $0x28] sm:$0xff]  ;;  %v4756_v35 = vld [vmem:[%s5921_s1 + $0x10] sm:$0xff]  ;;  %vm398_vm2 = vcmask 1045504   ;;  %vm3089_vm3 = vcmask 57344  }
   0xf   : > { %3903 = vmatpush3.msra.mxu1 %v3306_v0  ;;  %4103 = vmatpush3.msra.mxu0 %v4666_v1  ;;  %s6100_s16 = smov (!%p199_p3, %s3298_s16), 1 }
  0x10   : > { %3952 = vmatprep.subr.mxu1 %v505_v2  ;;  %4152 = vmatprep.subr.mxu0 %v3470_v3  ;;  %s4610_s25 = smul.u32 432, %s6100_s16  ;;  %s3604_s13 = sshll.u32 %s6100_s16, 8 }
  0x11   : > { %s5771_s18 = scalar_lea.vmem %s5922_s2, %s3604_s13  ;;  %s211_s21 = scalar_lea.vmem %s5923_s3, %s6100_s16 }
  0x12   : > { %s4682_s28 = scalar_lea.vmem %s5920_s0, %s4610_s25  ;;  %s214_s24 = scalar_lea.vmem %s5924_s4, %s6100_s16 }
  0x13   : > { %v4685_v4 = vld [vmem:[%s4682_s28] sm:$0xff]  ;;  %v4688_v5 = vld [vmem:[%s4682_s28 + $0x8] sm:$0xff]  ;;  %v4691_v6 = vld [vmem:[%s4682_s28 + $0x18] sm:$0xff] }
  0x14   : > { %5998 = vst [vmem:[#allocation2_spill] sm:$0xff] %v4691_v6  ;;  %v318_v7 = vrot.slane %v4685_v4, 1  ;;  %v319_v8 = vrot.slane %v4688_v5, 1  ;;  %v4696_v9 = vld [vmem:[%s4682_s28 + $0x20] sm:$0xff]  ;;  %v323_v10 = vrot.slane %v4691_v6, 1  ;;  %v4708_v15 = vld [vmem:[%s4682_s28 + $0x30] sm:$0xff] }
  0x15   : > { %5999 = vst [vmem:[#allocation3_spill] sm:$0xff] %v4696_v9  ;;  %v4700_v11 = vld [vmem:[%s4682_s28 + $0x10] sm:$0x3]  ;;  %v324_v12 = vrot.slane %v4696_v9, 1  ;;  %v4705_v14 = vld [vmem:[%s4682_s28 + $0x28] sm:$0x3] }
  0x16   : > { %v321_v13 = vrot.slane %v4700_v11, 1  ;;  %v320_v16 = vsel %vm317_vm0, %v318_v7, %v319_v8  ;;  %v326_v17 = vrot.slane %v4705_v14, 1  ;;  %v4713_v18 = vld [vmem:[%s4682_s28 + $0x38] sm:$0xff]  ;;  %v328_v19 = vrot.slane %v4708_v15, 1  ;;  %v4717_v20 = vld [vmem:[%s4682_s28 + $0x40] sm:$0x3] }
  0x17   : > { %3904 = vmatprep.mubr.msk.f32.mxu1 %vm508_vm1, %v320_v16  ;;  %v325_v21 = vsel %vm317_vm0, %v323_v10, %v324_v12  ;;  %v329_v23 = vrot.slane %v4713_v18, 1  ;;  %v331_v24 = vrot.slane %v4717_v20, 1  ;;  %v4725_v25 = vld [vmem:[%s4682_s28 + $0x48] sm:$0xff]  ;;  %v4728_v26 = vld [vmem:[%s4682_s28 + $0x50] sm:$0xff]  ;;  %v4731_v27 = vld [vmem:[%s4682_s28 + $0x58] sm:$0x3] }
  0x18   : > { %v322_v22 = vsel %vm317_vm0, %v319_v8, %v321_v13  ;;  %4104 = vmatprep.mubr.msk.f32.mxu0 %vm508_vm1, %v325_v21  ;;  %v327_v28 = vsel %vm317_vm0, %v324_v12, %v326_v17  ;;  %v333_v29 = vrot.slane %v4725_v25, 1  ;;  %v334_v30 = vrot.slane %v4728_v26, 1  ;;  %v4739_v31 = vld [vmem:[%s4682_s28 + $0x60] sm:$0xff]  ;;  %v4742_v32 = vld [vmem:[%s4682_s28 + $0x68] sm:$0xff]  ;;  %v4771_v41 = vld [vmem:[%s4682_s28 + $0x70] sm:$0x3] }
  0x19   : > { %3905 = vmatmul.mubr.msk.f32.vlgmr.msra.gmra.mrb[0].mxu1 %vm508_vm1, %v322_v22  ;;  %4105 = vmatmul.mubr.msk.f32.vlgmr.msra.gmra.mrb[0].mxu0 %vm508_vm1, %v327_v28  ;;  %v4751_v34 = vsel %vm317_vm0, %v328_v19, %v329_v23  ;;  %v4760_v36 = vsel %vm317_vm0, %v329_v23, %v331_v24  ;;  %v336_v37 = vrot.slane %v4731_v27, 1  ;;  %v338_v39 = vrot.slane %v4739_v31, 1  ;;  %v4776_v42 = vld [vmem:[%s4682_s28 + $0x78] sm:$0xff]  ;;  %v4779_v43 = vld [vmem:[%s4682_s28 + $0x80] sm:$0xff]  ;;  %v4798_v49 = vld [vmem:[%s4682_s28 + $0x88] sm:$0x3] }
  0x1a   : > { %3953 = vmatpush3.msra.mxu1 %v505_v2  ;;  %6000 = vst [vmem:[#allocation4_spill] sm:$0xff] %v4751_v34  ;;  %4153 = vmatpush3.msra.mxu0 %v3470_v3  ;;  %6001 = vst [vmem:[#allocation5_spill] sm:$0xff] %v4760_v36  ;;  %v4766_v38 = vsel %vm317_vm0, %v333_v29, %v334_v30  ;;  %v339_v40 = vrot.slane %v4742_v32, 1  ;;  %v341_v45 = vrot.slane %v4771_v41, 1  ;;  %v343_v47 = vrot.slane %v4776_v42, 1  ;;  %v4803_v50 = vld [vmem:[%s4682_s28 + $0x90] sm:$0xff] }
  0x1b   : > { %3907 = vmatprep.mubr.msk.f32.mxu1 %vm508_vm1, %v325_v21  ;;  %4107 = vmatprep.mubr.msk.f32.mxu0 %vm508_vm1, %v4751_v34  ;;  %6002 = vst [vmem:[#allocation6_spill] sm:$0xff] %v4766_v38  ;;  %v4789_v44 = vsel %vm317_vm0, %v334_v30, %v336_v37  ;;  %v344_v48 = vrot.slane %v4779_v43, 1  ;;  %v4806_v51 = vld [vmem:[%s4682_s28 + $0x98] sm:$0xff]  ;;  %v346_v53 = vrot.slane %v4798_v49, 1  ;;  %v348_v55 = vrot.slane %v4803_v50, 1  ;;  %v4829_v58 = vld [vmem:[%s4682_s28 + $0xa8] sm:$0xff] }
  0x1c   : > { %4202 = vmatprep.subr.mxu0 %v4747_v33  ;;  %4002 = vmatprep.subr.mxu1 %v4756_v35  ;;  %6003 = vst [vmem:[#allocation7_spill] sm:$0xff] %v4789_v44  ;;  %v4793_v46 = vsel %vm317_vm0, %v338_v39, %v339_v40  ;;  %v4815_v52 = vsel %vm317_vm0, %v339_v40, %v341_v45  ;;  %v349_v56 = vrot.slane %v4806_v51, 1  ;;  %v4824_v57 = vld [vmem:[%s4682_s28 + $0xa0] sm:$0x3]  ;;  %v4832_v59 = vld [vmem:[%s4682_s28 + $0xb0] sm:$0xff]  ;;  %v353_v63 = vrot.slane %v4829_v58, 1 }
  0x1d   : > { %3908 = vmatmul.mubr.msk.f32.gmra.mrb[2].mxu1 %vm508_vm1, %v327_v28  ;;  %4108 = vmatmul.mubr.msk.f32.gmra.mrb[2].mxu0 %vm508_vm1, %v4760_v36  ;;  %6004 = vst [vmem:[#allocation8_spill] sm:$0xff] %v4793_v46  ;;  %6005 = vst [vmem:[#allocation9_spill] sm:$0xff] %v4815_v52  ;;  %v4819_v54 = vsel %vm317_vm0, %v343_v47, %v344_v48  ;;  %v4841_v60 = vsel %vm317_vm0, %v344_v48, %v346_v53  ;;  %v351_v61 = vrot.slane %v4824_v57, 1  ;;  %v4850_v2 = vld [vmem:[%s4682_s28 + $0xb8] sm:$0x3]  ;;  %v4855_v3 = vld [vmem:[%s4682_s28 + $0xc0] sm:$0xff] }
  0x1e   : > { %3910 = vmatprep.mubr.msk.f32.mxu1 %vm508_vm1, %v4751_v34  ;;  %4110 = vmatprep.mubr.msk.f32.mxu0 %vm508_vm1, %v4766_v38  ;;  %6006 = vst [vmem:[#allocation10_spill] sm:$0xff] %v4819_v54  ;;  %6007 = vst [vmem:[#allocation11_spill] sm:$0xff] %v4841_v60  ;;  %v4845_v62 = vsel %vm317_vm0, %v348_v55, %v349_v56  ;;  %v354_v0 = vrot.slane %v4832_v59, 1  ;;  %v4858_v7 = vld [vmem:[%s4682_s28 + $0xc8] sm:$0xff]  ;;  %v356_v10 = vrot.slane %v4850_v2, 1  ;;  %v358_v13 = vrot.slane %v4855_v3, 1 }
  0x1f   : > { %6008 = vst [vmem:[#allocation12_spill] sm:$0xff] %v4845_v62  ;;  %v4867_v8 = vsel %vm317_vm0, %v349_v56, %v351_v61  ;;  %v359_v16 = vrot.slane %v4858_v7, 1  ;;  %v4876_v17 = vld [vmem:[%s4682_s28 + $0xd0] sm:$0x3]  ;;  %v404_v23 = vrot.slane %v4691_v6, 2  ;;  %v405_v24 = vrot.slane %v4696_v9, 2 }
  0x20   : > { %6009 = vst [vmem:[#allocation13_spill] sm:$0xff] %v4867_v8  ;;  %v4871_v12 = vsel %vm317_vm0, %v353_v63, %v354_v0  ;;  %v4887_v19 = vsel %vm317_vm0, %v354_v0, %v356_v10  ;;  %v361_v21 = vrot.slane %v4876_v17, 1  ;;  %v4896_v28 = vld [vmem:[%s4682_s28 + $0xd8] sm:$0xff]  ;;  %v4899_v29 = vld [vmem:[%s4682_s28 + $0xe0] sm:$0xff]  ;;  %v407_v30 = vrot.slane %v4705_v14, 2  ;;  %v4924_v53 = vld [vmem:[%s4682_s28 + $0xf0] sm:$0xff] }
  0x21   : > { %3911 = vmatmul.mubr.msk.f32.gmra.mrb[4].mxu1 %vm508_vm1, %v4760_v36  ;;  %4111 = vmatmul.mubr.msk.f32.gmra.mrb[4].mxu0 %vm508_vm1, %v4789_v44  ;;  %6010 = vst [vmem:[#allocation14_spill] sm:$0xff] %v4871_v12  ;;  %6011 = vst [vmem:[#allocation15_spill] sm:$0xff] %v4887_v19  ;;  %v4891_v22 = vsel %vm317_vm0, %v358_v13, %v359_v16  ;;  %v363_v39 = vrot.slane %v4896_v28, 1  ;;  %v364_v40 = vrot.slane %v4899_v29, 1  ;;  %v4916_v45 = vld [vmem:[%s4682_s28 + $0xe8] sm:$0x3] }
  0x22   : > { %3913 = vmatprep.mubr.msk.f32.mxu1 %vm508_vm1, %v4766_v38  ;;  %4113 = vmatprep.mubr.msk.f32.mxu0 %vm508_vm1, %v4793_v46  ;;  %6012 = vst [vmem:[#allocation16_spill] sm:$0xff] %v4891_v22  ;;  %v4911_v37 = vsel %vm317_vm0, %v359_v16, %v361_v21  ;;  %v4919_v47 = vsel %vm398_vm2, %v404_v23, %v405_v24  ;;  %v409_v48 = vrot.slane %v4708_v15, 2  ;;  %v410_v14 = vrot.slane %v4713_v18, 2  ;;  %v4927_v55 = vld [vmem:[%s4682_s28 + $0xf8] sm:$0xff]  ;;  %v4948_v16 = vld [vmem:[%s4682_s28 + $0x100] sm:$0x3] }
  0x23   : > { %6013 = vst [vmem:[#allocation17_spill] sm:$0xff] %v4911_v37  ;;  %v366_v56 = vrot.slane %v4916_v45, 1  ;;  %v412_v61 = vrot.slane %v4717_v20, 2  ;;  %v4940_v63 = vsel %vm398_vm2, %v405_v24, %v407_v30  ;;  %v4943_v0 = vsel %vm317_vm0, %v363_v39, %v364_v40  ;;  %v4959_v24 = vld [vmem:[%s4682_s28 + $0x110] sm:$0xff]  ;;  %v4966_v30 = vld [vmem:[%s5921_s1 + $0x38] sm:$0xff] }
  0x24   : > { %6014 = vst [vmem:[#allocation18_spill] sm:$0xff] %v4943_v0  ;;  %v368_v10 = vrot.slane %v4924_v53, 1  ;;  %v369_v13 = vrot.slane %v4927_v55, 1  ;;  %v4951_v21 = vsel %vm398_vm2, %v409_v48, %v410_v14  ;;  %v414_v20 = vrot.slane %v4725_v25, 2  ;;  %v5060_v36 = vld [vmem:[%s4682_s28 + $0x148] sm:$0x3] }
  0x25   : > { %3914 = vmatmul.mubr.msk.f32.gmra.mrb[6].mxu1 %vm508_vm1, %v4789_v44  ;;  %4114 = vmatmul.mubr.msk.f32.gmra.mrb[6].mxu0 %vm508_vm1, %v4815_v52  ;;  %v415_v23 = vrot.slane %v4728_v26, 2  ;;  %v4973_v39 = vsel %vm317_vm0, %v364_v40, %v366_v56  ;;  %v4976_v48 = vsel %vm398_vm2, %v410_v14, %v412_v61  ;;  %v374_v40 = vrot.slane %v4959_v24, 1  ;;  %v4989_v56 = vld [vmem:[%s4682_s28 + $0x118] sm:$0x3] }
  0x26   : > { %3916 = vmatprep.mubr.msk.f32.mxu1 %vm508_vm1, %v4793_v46  ;;  %4116 = vmatprep.mubr.msk.f32.mxu0 %vm508_vm1, %v4819_v54  ;;  %6015 = vst [vmem:[#allocation19_spill] sm:$0xff] %v4973_v39  ;;  %6016 = vst [vmem:[#allocation20_spill] sm:$0xff] %v4976_v48  ;;  %v419_v61 = vrot.slane %v4739_v31, 2  ;;  %v5033_v46 = vld [vmem:[%s4682_s28 + $0x138] sm:$0xff]  ;;  %v427_v44 = vrot.slane %v4798_v49, 2  ;;  %v432_v34 = vrot.slane %v4824_v57, 2 }
  0x27   : > { %v4992_v14 = vsel %vm398_vm2, %v414_v20, %v415_v23  ;;  %v376_v20 = vrot.slane %v4989_v56, 1  ;;  %v383_v38 = vrot.slane %v5033_v46, 1  ;;  %v434_v57 = vrot.slane %v4829_v58, 2 }
  0x28   : > { %6018 = vst [vmem:[#allocation22_spill] sm:$0xff] %v4992_v14 }
  0x29   : > { %3917 = vmatmul.mubr.msk.f32.gmra.mrb[8].mxu1 %vm508_vm1, %v4815_v52  ;;  %4117 = vmatmul.mubr.msk.f32.gmra.mrb[8].mxu0 %vm508_vm1, %v4841_v60  ;;  %v5025_v52 = vld [vmem:[%s4682_s28 + $0x130] sm:$0x3] }
  0x2a   : > { %3919 = vmatprep.mubr.msk.f32.mxu1 %vm508_vm1, %v4819_v54  ;;  %4119 = vmatprep.mubr.msk.f32.mxu0 %vm508_vm1, %v4845_v62 }
  0x2d   : > { %3920 = vmatmul.mubr.msk.f32.gmra.mrb[10].mxu1 %vm508_vm1, %v4841_v60  ;;  %4120 = vmatmul.mubr.msk.f32.gmra.mrb[10].mxu0 %vm508_vm1, %v4867_v8 }
  0x2e   : > { %3922 = vmatprep.mubr.msk.f32.mxu1 %vm508_vm1, %v4845_v62  ;;  %4122 = vmatprep.mubr.msk.f32.mxu0 %vm508_vm1, %v4871_v12  ;;  %v422_v62 = vrot.slane %v4771_v41, 2  ;;  %v424_v41 = vrot.slane %v4776_v42, 2 }
  0x31   : > { %3923 = vmatmul.mubr.msk.f32.gmra.mrb[12].mxu1 %vm508_vm1, %v4867_v8  ;;  %4123 = vmatmul.mubr.msk.f32.gmra.mrb[12].mxu0 %vm508_vm1, %v4887_v19  ;;  %v4997_v8 = vld [vmem:[%s4682_s28 + $0x120] sm:$0xff] }
  0x32   : > { %3925 = vmatprep.mubr.msk.f32.mxu1 %vm508_vm1, %v4871_v12  ;;  %4125 = vmatprep.mubr.msk.f32.mxu0 %vm508_vm1, %v4891_v22  ;;  %v417_v12 = vrot.slane %v4731_v27, 2  ;;  %v378_v54 = vrot.slane %v4997_v8, 1 }
  0x34   : > { %v5017_v60 = vsel %vm398_vm2, %v415_v23, %v417_v12  ;;  %v5036_v12 = vld [vmem:[%s4682_s28 + $0x140] sm:$0xff] }
  0x35   : > { %3926 = vmatmul.mubr.msk.f32.gmra.mrb[14].mxu1 %vm508_vm1, %v4887_v19  ;;  %4126 = vmatmul.mubr.msk.f32.gmra.mrb[14].mxu0 %vm508_vm1, %v4911_v37  ;;  %v4983_v19 = vsel %vm317_vm0, %v368_v10, %v369_v13  ;;  %v5000_v10 = vld [vmem:[%s4682_s28 + $0x128] sm:$0xff]  ;;  %6020 = vst [vmem:[#allocation24_spill] sm:$0xff] %v5017_v60 }
  0x36   : > { %3928 = vmatprep.mubr.msk.f32.mxu1 %vm508_vm1, %v4891_v22  ;;  %4154 = vmatprep.mubr.msk.f32.mxu0 %vm508_vm1, %v4919_v47  ;;  %v4956_v22 = vld [vmem:[%s4682_s28 + $0x108] sm:$0xff]  ;;  %6017 = vst [vmem:[#allocation21_spill] sm:$0xff] %v4983_v19 }
  0x39   : > { %3929 = vmatmul.mubr.msk.f32.gmra.mrb[16].mxu1 %vm508_vm1, %v4911_v37  ;;  %4155 = vmatmul.mubr.msk.f32.vlgmr.msra.gmra.mrb[0].mxu0 %vm508_vm1, %v4940_v63  ;;  %v371_v37 = vrot.slane %v4948_v16, 1 }
  0x3a   : > { %3931 = vmatprep.mubr.msk.f32.mxu1 %vm508_vm1, %v4943_v0  ;;  %4203 = vmatpush3.msra.mxu0 %v4747_v33  ;;  %v373_v0 = vrot.slane %v4956_v22, 1  ;;  %v420_v33 = vrot.slane %v4742_v32, 2 }
  0x3b   : > { %4157 = vmatprep.mubr.msk.f32.mxu0 %vm508_vm1, %v4951_v21  ;;  %4252 = vmatprep.subr.mxu0 %v4966_v30  ;;  %v5010_v27 = vsel %vm317_vm0, %v369_v13, %v371_v37  ;;  %v425_v13 = vrot.slane %v4779_v43, 2 }
  0x3c   : > { %6019 = vst [vmem:[#allocation23_spill] sm:$0xff] %v5010_v27  ;;  %v5028_v37 = vsel %vm398_vm2, %v419_v61, %v420_v33  ;;  %v5048_v23 = vsel %vm398_vm2, %v420_v33, %v422_v62  ;;  %v381_v61 = vrot.slane %v5025_v52, 1  ;;  %v429_v62 = vrot.slane %v4803_v50, 2 }
  0x3d   : > { %3932 = vmatmul.mubr.msk.f32.gmra.mrb[18].mxu1 %vm508_vm1, %v4973_v39  ;;  %4158 = vmatmul.mubr.msk.f32.gmra.mrb[2].mxu0 %vm508_vm1, %v4976_v48  ;;  %v5020_v39 = vsel %vm317_vm0, %v373_v0, %v374_v40  ;;  %6022 = vst [vmem:[#allocation26_spill] sm:$0xff] %v5028_v37  ;;  %v5045_v0 = vsel %vm317_vm0, %v374_v40, %v376_v20  ;;  %6024 = vst [vmem:[#allocation28_spill] sm:$0xff] %v5048_v23  ;;  %v430_v33 = vrot.slane %v4806_v51, 2  ;;  %v5068_v20 = vld [vmem:[%s4682_s28 + $0x150] sm:$0xff]  ;;  %v5130_v48 = vld [vmem:[%s4682_s28 + $0x178] sm:$0x3] }
  0x3e   : > { %3934 = vmatprep.mubr.msk.f32.mxu1 %vm508_vm1, %v4983_v19  ;;  %4160 = vmatprep.mubr.msk.f32.mxu0 %vm508_vm1, %v4992_v14  ;;  %6021 = vst [vmem:[#allocation25_spill] sm:$0xff] %v5020_v39  ;;  %v379_v19 = vrot.slane %v5000_v10, 1  ;;  %6023 = vst [vmem:[#allocation27_spill] sm:$0xff] %v5045_v0  ;;  %v5063_v40 = vsel %vm398_vm2, %v424_v41, %v425_v13  ;;  %v386_v41 = vrot.slane %v5060_v36, 1 }
  0x3f   : > { %6026 = vst [vmem:[#allocation30_spill] sm:$0xff] %v5063_v40 }
  0x40   : > { %v5080_v49 = vsel %vm317_vm0, %v379_v19, %v381_v61  ;;  %v435_v61 = vrot.slane %v4832_v59, 2 }
  0x41   : > { %3935 = vmatmul.mubr.msk.f32.gmra.mrb[20].mxu1 %vm508_vm1, %v5010_v27  ;;  %4161 = vmatmul.mubr.msk.f32.gmra.mrb[4].mxu0 %vm508_vm1, %v5017_v60  ;;  %v5054_v27 = vsel %vm317_vm0, %v378_v54, %v379_v19  ;;  %v5071_v54 = vld [vmem:[%s4682_s28 + $0x158] sm:$0xff]  ;;  %6027 = vst [vmem:[#allocation31_spill] sm:$0xff] %v5080_v49  ;;  %v5095_v60 = vld [vmem:[%s4682_s28 + $0x160] sm:$0x3]  ;;  %v5098_v19 = vsel %vm398_vm2, %v429_v62, %v430_v33 }
  0x42   : > { %3937 = vmatprep.mubr.msk.f32.mxu1 %vm508_vm1, %v5020_v39  ;;  %4163 = vmatprep.mubr.msk.f32.mxu0 %vm508_vm1, %v5028_v37  ;;  %6025 = vst [vmem:[#allocation29_spill] sm:$0xff] %v5054_v27  ;;  %v384_v39 = vrot.slane %v5036_v12, 1  ;;  %v5087_v37 = vsel %vm398_vm2, %v425_v13, %v427_v44  ;;  %v5106_v44 = vld [vmem:[%s4682_s28 + $0x170] sm:$0xff]  ;;  %v5118_v13 = vsel %vm398_vm2, %v430_v33, %v432_v34  ;;  %v391_v62 = vrot.slane %v5095_v60, 1 }
  0x43   : > { %6028 = vst [vmem:[#allocation32_spill] sm:$0xff] %v5087_v37  ;;  %6030 = vst [vmem:[#allocation34_spill] sm:$0xff] %v5106_v44  ;;  %v439_v34 = vrot.slane %v4855_v3, 2  ;;  %v440_v33 = vrot.slane %v4858_v7, 2 }
  0x44   : > { %6032 = vst [vmem:[#allocation36_spill] sm:$0xff] %v5118_v13 }
  0x45   : > { %3938 = vmatmul.mubr.msk.f32.gmra.mrb[22].mxu1 %vm508_vm1, %v5045_v0  ;;  %4164 = vmatmul.mubr.msk.f32.gmra.mrb[6].mxu0 %vm508_vm1, %v5048_v23  ;;  %v5090_v0 = vsel %vm317_vm0, %v383_v38, %v384_v39  ;;  %v388_v23 = vrot.slane %v5068_v20, 1  ;;  %v5115_v38 = vsel %vm317_vm0, %v384_v39, %v386_v41  ;;  %v5133_v39 = vsel %vm398_vm2, %v434_v57, %v435_v61 }
  0x46   : > { %3940 = vmatprep.mubr.msk.f32.mxu1 %vm508_vm1, %v5054_v27  ;;  %4166 = vmatprep.mubr.msk.f32.mxu0 %vm508_vm1, %v5063_v40  ;;  %6029 = vst [vmem:[#allocation33_spill] sm:$0xff] %v5090_v0  ;;  %v389_v27 = vrot.slane %v5071_v54, 1  ;;  %v5103_v40 = vld [vmem:[%s4682_s28 + $0x168] sm:$0xff]  ;;  %6031 = vst [vmem:[#allocation35_spill] sm:$0xff] %v5115_v38 }
  0x48   : > { %v5124_v14 = vsel %vm317_vm0, %v388_v23, %v389_v27  ;;  %v396_v23 = vrot.slane %v5130_v48, 1 }
  0x49   : > { %3941 = vmatmul.mubr.msk.f32.gmra.mrb[24].mxu1 %vm508_vm1, %v5080_v49  ;;  %4167 = vmatmul.mubr.msk.f32.gmra.mrb[8].mxu0 %vm508_vm1, %v5087_v37  ;;  %6033 = vst [vmem:[#allocation37_spill] sm:$0xff] %v5124_v14  ;;  %v437_v49 = vrot.slane %v4850_v2, 2  ;;  %v393_v37 = vrot.slane %v5103_v40, 1  ;;  %v5144_v2 = vsel %vm317_vm0, %v389_v27, %v391_v62  ;;  %v445_v27 = vrot.slane %v4899_v29, 2 }
  0x4a   : > { %3943 = vmatprep.mubr.msk.f32.mxu1 %vm508_vm1, %v5090_v0  ;;  %4169 = vmatprep.mubr.msk.f32.mxu0 %vm508_vm1, %v5098_v19  ;;  %v394_v0 = vrot.slane %v5106_v44, 1  ;;  %6034 = vst [vmem:[#allocation38_spill] sm:$0xff] %v5144_v2  ;;  %v449_v62 = vrot.slane %v4924_v53, 2 }
  0x4b   : > { %v5150_v41 = vsel %vm398_vm2, %v435_v61, %v437_v49  ;;  %v447_v49 = vrot.slane %v4916_v45, 2 }
  0x4c   : > { %v5153_v57 = vsel %vm317_vm0, %v393_v37, %v394_v0  ;;  %v5168_v37 = vsel %vm317_vm0, %v394_v0, %v396_v23  ;;  %v5203_v23 = vld [vmem:[%s5921_s1 + $0x18] sm:$0xff] }
  0x4d   : > { %3944 = vmatmul.mubr.msk.f32.gmra.mrb[26].mxu1 %vm508_vm1, %v5115_v38  ;;  %4170 = vmatmul.mubr.msk.f32.gmra.mrb[10].mxu0 %vm508_vm1, %v5118_v13  ;;  %6035 = vst [vmem:[#allocation39_spill] sm:$0xff] %v5153_v57  ;;  %v442_v38 = vrot.slane %v4876_v17, 2  ;;  %v5157_v13 = vsel %vm398_vm2, %v439_v34, %v440_v33  ;;  %6036 = vst [vmem:[#allocation40_spill] sm:$0xff] %v5168_v37  ;;  %v450_v34 = vrot.slane %v4927_v55, 2 }
  0x4e   : > { %3946 = vmatprep.mubr.msk.f32.mxu1 %vm508_vm1, %v5124_v14  ;;  %4172 = vmatprep.mubr.msk.f32.mxu0 %vm508_vm1, %v5133_v39  ;;  %v444_v14 = vrot.slane %v4896_v28, 2  ;;  %v5190_v45 = vsel %vm398_vm2, %v445_v27, %v447_v49 }
  0x4f   : > { %v5173_v17 = vsel %vm398_vm2, %v440_v33, %v442_v38  ;;  %v5194_v0 = vsel %vm398_vm2, %v449_v62, %v450_v34  ;;  %v454_v38 = vrot.slane %v4956_v22, 2  ;;  %v455_v33 = vrot.slane %v4959_v24, 2 }
  0x50   : > { %v5177_v61 = vsel %vm398_vm2, %v444_v14, %v445_v27  ;;  %v452_v14 = vrot.slane %v4948_v16, 2  ;;  %v457_v27 = vrot.slane %v4989_v56, 2  ;;  %v459_v62 = vrot.slane %v4997_v8, 2 }
  0x51   : > { %3947 = vmatmul.mubr.msk.f32.gmra.mrb[28].mxu1 %vm508_vm1, %v5144_v2  ;;  %4173 = vmatmul.mubr.msk.f32.gmra.mrb[12].mxu0 %vm508_vm1, %v5150_v41  ;;  %v5217_v49 = vsel %vm398_vm2, %v454_v38, %v455_v33  ;;  %v464_v38 = vrot.slane %v5033_v46, 2  ;;  %v475_v2 = vrot.slane %v5106_v44, 2 }
  0x52   : > { %3949 = vmatprep.mubr.msk.f32.mxu1 %vm508_vm1, %v5153_v57  ;;  %4175 = vmatprep.mubr.msk.f32.mxu0 %vm508_vm1, %v5157_v13  ;;  %v5213_v16 = vsel %vm398_vm2, %v450_v34, %v452_v14  ;;  %6037 = vst [vmem:[#allocation41_spill] sm:$0xff] %v5217_v49  ;;  %v5231_v56 = vsel %vm398_vm2, %v455_v33, %v457_v27  ;;  %v462_v34 = vrot.slane %v5025_v52, 2  ;;  %v467_v33 = vrot.slane %v5060_v36, 2 }
  0x53   : > { %v470_v57 = vrot.slane %v5071_v54, 2 }
  0x55   : > { %3950 = vmatmul.mubr.msk.f32.gmra.mrb[30].mxu1 %vm508_vm1, %v5168_v37  ;;  %4176 = vmatmul.mubr.msk.f32.gmra.mrb[14].mxu0 %vm508_vm1, %v5173_v17  ;;  %v465_v37 = vrot.slane %v5036_v12, 2 }
  0x56   : > { %3954 = vmatprep.mubr.msk.f32.mxu1 %vm508_vm1, %v4685_v4  ;;  %4178 = vmatprep.mubr.msk.f32.mxu0 %vm508_vm1, %v5177_v61 }
  0x57   : > { %v5252_v27 = vsel %vm398_vm2, %v464_v38, %v465_v37  ;;  %v5265_v36 = vsel %vm398_vm2, %v465_v37, %v467_v33  ;;  %v474_v38 = vrot.slane %v5103_v40, 2  ;;  %v477_v37 = vrot.slane %v5130_v48, 2 }
  0x58   : > { %6039 = vst [vmem:[#allocation43_spill] sm:$0xff] %v5252_v27  ;;  %6040 = vst [vmem:[#allocation44_spill] sm:$0xff] %v5265_v36 }
  0x59   : > { %3955 = vmatmul.mubr.msk.f32.vlgmr.msra.gmra.mrb[0].mxu1 %vm508_vm1, %v4688_v5  ;;  %4179 = vmatmul.mubr.msk.f32.gmra.mrb[16].mxu0 %vm508_vm1, %v5190_v45  ;;  %v5292_v33 = vsel %vm398_vm2, %v474_v38, %v475_v2  ;;  %v5308_v48 = vsel %vm398_vm2, %v475_v2, %v477_v37  ;;  %v400_v38 = vrot.slane %v4688_v5, 2  ;;  %v402_v37 = vrot.slane %v4700_v11, 2  ;;  %v6047_v5 = vld [vmem:[#allocation20_spill] sm:$0xff]  ;;  %v6048_v11 = vld [vmem:[#allocation22_spill] sm:$0xff] }
  0x5a   : > { %4003 = vmatpush3.msra.mxu1 %v4756_v35  ;;  %3957 = vmatprep.mubr.msk.f32.mxu1 %vm508_vm1, %v4691_v6  ;;  %v460_v35 = vrot.slane %v5000_v10, 2  ;;  %v5279_v6 = vld [vmem:[%s4682_s28 + $0x188] sm:$0xff]  ;;  %6043 = vst [vmem:[#allocation47_spill] sm:$0xff] %v5292_v33  ;;  %6044 = vst [vmem:[#allocation48_spill] sm:$0xff] %v5308_v48 }
  0x5b   : > { %4181 = vmatprep.mubr.msk.f32.mxu0 %vm508_vm1, %v5194_v0  ;;  %4052 = vmatprep.subr.mxu1 %v5203_v23 }
  0x5c   : > { %v5235_v14 = vsel %vm398_vm2, %v459_v62, %v460_v35  ;;  %v5248_v52 = vsel %vm398_vm2, %v460_v35, %v462_v34  ;;  %v469_v62 = vrot.slane %v5068_v20, 2  ;;  %v472_v35 = vrot.slane %v5095_v60, 2 }
  0x5d   : > { %3958 = vmatmul.mubr.msk.f32.gmra.mrb[2].mxu1 %vm508_vm1, %v4696_v9  ;;  %4182 = vmatmul.mubr.msk.f32.gmra.mrb[18].mxu0 %vm508_vm1, %v5213_v16  ;;  %6038 = vst [vmem:[#allocation42_spill] sm:$0xff] %v5248_v52  ;;  %v5276_v9 = vld [vmem:[%s4682_s28 + $0x180] sm:$0xff] }
  0x5e   : > { %3960 = vmatprep.mubr.msk.f32.mxu1 %vm508_vm1, %v4708_v15  ;;  %4184 = vmatprep.mubr.msk.f32.mxu0 %vm508_vm1, %v5217_v49  ;;  %v5269_v34 = vsel %vm398_vm2, %v469_v62, %v470_v57  ;;  %v5288_v60 = vsel %vm398_vm2, %v470_v57, %v472_v35  ;;  %v487_v62 = vrot.slane %v5276_v9, 2 }
  0x5f   : > { %6041 = vst [vmem:[#allocation45_spill] sm:$0xff] %v5269_v34  ;;  %6042 = vst [vmem:[#allocation46_spill] sm:$0xff] %v5288_v60 }
  0x61   : > { %3961 = vmatmul.mubr.msk.f32.gmra.mrb[4].mxu1 %vm508_vm1, %v4713_v18  ;;  %4185 = vmatmul.mubr.msk.f32.gmra.mrb[20].mxu0 %vm508_vm1, %v5231_v56 }
  0x62   : > { %3963 = vmatprep.mubr.msk.f32.mxu1 %vm508_vm1, %v4725_v25  ;;  %4187 = vmatprep.mubr.msk.f32.mxu0 %vm508_vm1, %v5235_v14 }
  0x65   : > { %3964 = vmatmul.mubr.msk.f32.gmra.mrb[6].mxu1 %vm508_vm1, %v4728_v26  ;;  %4188 = vmatmul.mubr.msk.f32.gmra.mrb[22].mxu0 %vm508_vm1, %v5248_v52  ;;  %v5297_v52 = vld [vmem:[%s4682_s28 + $0x190] sm:$0x3] }
  0x66   : > { %3966 = vmatprep.mubr.msk.f32.mxu1 %vm508_vm1, %v4739_v31  ;;  %4190 = vmatprep.mubr.msk.f32.mxu0 %vm508_vm1, %v5252_v27  ;;  %v488_v27 = vrot.slane %v5279_v6, 2  ;;  %v490_v57 = vrot.slane %v5297_v52, 2 }
  0x68   : > { %v5312_v35 = vsel %vm398_vm2, %v487_v62, %v488_v27  ;;  %v5323_v2 = vsel %vm398_vm2, %v488_v27, %v490_v57  ;;  %v5338_v27 = vld [vmem:[%s5921_s1 + $0x40] sm:$0xff] }
  0x69   : > { %3967 = vmatmul.mubr.msk.f32.gmra.mrb[8].mxu1 %vm508_vm1, %v4742_v32  ;;  %4191 = vmatmul.mubr.msk.f32.gmra.mrb[24].mxu0 %vm508_vm1, %v5265_v36  ;;  %6045 = vst [vmem:[#allocation49_spill] sm:$0xff] %v5312_v35  ;;  %6046 = vst [vmem:[#allocation50_spill] sm:$0xff] %v5323_v2  ;;  %v6052_v57 = vld [vmem:[#allocation30_spill] sm:$0xff] }
  0x6a   : > { %3969 = vmatprep.mubr.msk.f32.mxu1 %vm508_vm1, %v4776_v42  ;;  %4193 = vmatprep.mubr.msk.f32.mxu0 %vm508_vm1, %v5269_v34 }
  0x6d   : > { %3970 = vmatmul.mubr.msk.f32.gmra.mrb[10].mxu1 %vm508_vm1, %v4779_v43  ;;  %4194 = vmatmul.mubr.msk.f32.gmra.mrb[26].mxu0 %vm508_vm1, %v5288_v60 }
  0x6e   : > { %3972 = vmatprep.mubr.msk.f32.mxu1 %vm508_vm1, %v4803_v50  ;;  %4196 = vmatprep.mubr.msk.f32.mxu0 %vm508_vm1, %v5292_v33 }
  0x71   : > { %3973 = vmatmul.mubr.msk.f32.gmra.mrb[12].mxu1 %vm508_vm1, %v4806_v51  ;;  %4197 = vmatmul.mubr.msk.f32.gmra.mrb[28].mxu0 %vm508_vm1, %v5308_v48 }
  0x72   : > { %3975 = vmatprep.mubr.msk.f32.mxu1 %vm508_vm1, %v4829_v58  ;;  %4199 = vmatprep.mubr.msk.f32.mxu0 %vm508_vm1, %v5312_v35  ;;  %v6057_v35 = vld [vmem:[#allocation6_spill] sm:$0xff] }
  0x75   : > { %3976 = vmatmul.mubr.msk.f32.gmra.mrb[14].mxu1 %vm508_vm1, %v4832_v59  ;;  %4200 = vmatmul.mubr.msk.f32.gmra.mrb[30].mxu0 %vm508_vm1, %v5323_v2  ;;  %v6056_v2 = vld [vmem:[#allocation5_spill] sm:$0xff] }
  0x76   : > { %3978 = vmatprep.mubr.msk.f32.mxu1 %vm508_vm1, %v4855_v3  ;;  %4204 = vmatprep.mubr.msk.f32.mxu0 %vm508_vm1, %v4708_v15 }
  0x79   : > { %3979 = vmatmul.mubr.msk.f32.gmra.mrb[16].mxu1 %vm508_vm1, %v4858_v7  ;;  %4205 = vmatmul.mubr.msk.f32.vlgmr.msra.gmra.mrb[0].mxu0 %vm508_vm1, %v4713_v18 }
  0x7a   : > { %3981 = vmatprep.mubr.msk.f32.mxu1 %vm508_vm1, %v4896_v28  ;;  %4253 = vmatpush3.msra.mxu0 %v4966_v30  ;;  %v399_v30 = vrot.slane %v4685_v4, 2  ;;  %v403_v4 = vsel %vm398_vm2, %v400_v38, %v402_v37  ;;  %v6054_v37 = vld [vmem:[#allocation36_spill] sm:$0xff] }
  0x7b   : > { %4207 = vmatprep.mubr.msk.f32.mxu0 %vm508_vm1, %v4725_v25  ;;  %4302 = vmatprep.subr.mxu0 %v5338_v27 }
  0x7c   : > { %v401_v62 = vsel %vm398_vm2, %v399_v30, %v400_v38  ;;  %v6053_v30 = vld [vmem:[#allocation32_spill] sm:$0xff]  ;;  %v5458_v38 = vld [vmem:[%s4682_s28 + $0x198] sm:$0xff] }
  0x7d   : > { %3982 = vmatmul.mubr.msk.f32.gmra.mrb[18].mxu1 %vm508_vm1, %v4899_v29  ;;  %4208 = vmatmul.mubr.msk.f32.gmra.mrb[2].mxu0 %vm508_vm1, %v4728_v26 }
  0x7e   : > { %3984 = vmatprep.mubr.msk.f32.mxu1 %vm508_vm1, %v4924_v53  ;;  %4210 = vmatprep.mubr.msk.f32.mxu0 %vm508_vm1, %v4739_v31 }
  0x81   : > { %3985 = vmatmul.mubr.msk.f32.gmra.mrb[20].mxu1 %vm508_vm1, %v4927_v55  ;;  %4211 = vmatmul.mubr.msk.f32.gmra.mrb[4].mxu0 %vm508_vm1, %v4742_v32 }
  0x82   : > { %3987 = vmatprep.mubr.msk.f32.mxu1 %vm508_vm1, %v4956_v22  ;;  %4213 = vmatprep.mubr.msk.f32.mxu0 %vm508_vm1, %v4776_v42 }
  0x85   : > { %3988 = vmatmul.mubr.msk.f32.gmra.mrb[22].mxu1 %vm508_vm1, %v4959_v24  ;;  %4214 = vmatmul.mubr.msk.f32.gmra.mrb[6].mxu0 %vm508_vm1, %v4779_v43 }
  0x86   : > { %3990 = vmatprep.mubr.msk.f32.mxu1 %vm508_vm1, %v4997_v8  ;;  %4216 = vmatprep.mubr.msk.f32.mxu0 %vm508_vm1, %v4803_v50 }
  0x89   : > { %3991 = vmatmul.mubr.msk.f32.gmra.mrb[24].mxu1 %vm508_vm1, %v5000_v10  ;;  %4217 = vmatmul.mubr.msk.f32.gmra.mrb[8].mxu0 %vm508_vm1, %v4806_v51 }
  0x8a   : > { %3993 = vmatprep.mubr.msk.f32.mxu1 %vm508_vm1, %v5033_v46  ;;  %4219 = vmatprep.mubr.msk.f32.mxu0 %vm508_vm1, %v4829_v58 }
  0x8d   : > { %3994 = vmatmul.mubr.msk.f32.gmra.mrb[26].mxu1 %vm508_vm1, %v5036_v12  ;;  %4220 = vmatmul.mubr.msk.f32.gmra.mrb[10].mxu0 %vm508_vm1, %v4832_v59 }
  0x8e   : > { %3996 = vmatprep.mubr.msk.f32.mxu1 %vm508_vm1, %v5068_v20  ;;  %4222 = vmatprep.mubr.msk.f32.mxu0 %vm508_vm1, %v4855_v3 }
  0x91   : > { %3997 = vmatmul.mubr.msk.f32.gmra.mrb[28].mxu1 %vm508_vm1, %v5071_v54  ;;  %4223 = vmatmul.mubr.msk.f32.gmra.mrb[12].mxu0 %vm508_vm1, %v4858_v7 }
  0x92   : > { %3999 = vmatprep.mubr.msk.f32.mxu1 %vm508_vm1, %v5103_v40  ;;  %4225 = vmatprep.mubr.msk.f32.mxu0 %vm508_vm1, %v4896_v28 }
  0x95   : > { %4000 = vmatmul.mubr.msk.f32.gmra.mrb[30].mxu1 %vm508_vm1, %v5106_v44  ;;  %4226 = vmatmul.mubr.msk.f32.gmra.mrb[14].mxu0 %vm508_vm1, %v4899_v29 }
  0x96   : > { %4004 = vmatprep.mubr.msk.f32.mxu1 %vm508_vm1, %v401_v62  ;;  %4228 = vmatprep.mubr.msk.f32.mxu0 %vm508_vm1, %v4924_v53  ;;  %v5469_v62 = vld [vmem:[%s4682_s28 + $0x1a0] sm:$0xff] }
  0x99   : > { %4005 = vmatmul.mubr.msk.f32.vlgmr.msra.gmra.mrb[0].mxu1 %vm508_vm1, %v403_v4  ;;  %4229 = vmatmul.mubr.msk.f32.gmra.mrb[16].mxu0 %vm508_vm1, %v4927_v55  ;;  %v6055_v4 = vld [vmem:[#allocation4_spill] sm:$0xff] }
  0x9a   : > { %4053 = vmatpush3.msra.mxu1 %v5203_v23  ;;  %4007 = vmatprep.mubr.msk.f32.mxu1 %vm508_vm1, %v4919_v47  ;;  %v6049_v47 = vld [vmem:[#allocation24_spill] sm:$0xff] }
  0x9b   : > { %4231 = vmatprep.mubr.msk.f32.mxu0 %vm508_vm1, %v4956_v22  ;;  %4352 = vmatprep.subr.mxu1 %v4666_v1  ;;  %v6051_v23 = vld [vmem:[#allocation28_spill] sm:$0xff] }
  0x9d   : > { %4008 = vmatmul.mubr.msk.f32.gmra.mrb[2].mxu1 %vm508_vm1, %v4940_v63  ;;  %4232 = vmatmul.mubr.msk.f32.gmra.mrb[18].mxu0 %vm508_vm1, %v4959_v24  ;;  %v6050_v63 = vld [vmem:[#allocation26_spill] sm:$0xff] }
  0x9e   : > { %4010 = vmatprep.mubr.msk.f32.mxu1 %vm508_vm1, %v4951_v21  ;;  %4234 = vmatprep.mubr.msk.f32.mxu0 %vm508_vm1, %v4997_v8 }
  0xa1   : > { %4011 = vmatmul.mubr.msk.f32.gmra.mrb[4].mxu1 %vm508_vm1, %v6047_v5  ;;  %4235 = vmatmul.mubr.msk.f32.gmra.mrb[20].mxu0 %vm508_vm1, %v5000_v10 }
  0xa2   : > { %4013 = vmatprep.mubr.msk.f32.mxu1 %vm508_vm1, %v6048_v11  ;;  %4237 = vmatprep.mubr.msk.f32.mxu0 %vm508_vm1, %v5033_v46 }
  0xa5   : > { %4014 = vmatmul.mubr.msk.f32.gmra.mrb[6].mxu1 %vm508_vm1, %v6049_v47  ;;  %4238 = vmatmul.mubr.msk.f32.gmra.mrb[22].mxu0 %vm508_vm1, %v5036_v12 }
  0xa6   : > { %4016 = vmatprep.mubr.msk.f32.mxu1 %vm508_vm1, %v6050_v63  ;;  %4240 = vmatprep.mubr.msk.f32.mxu0 %vm508_vm1, %v5068_v20 }
  0xa9   : > { %4017 = vmatmul.mubr.msk.f32.gmra.mrb[8].mxu1 %vm508_vm1, %v6051_v23  ;;  %4241 = vmatmul.mubr.msk.f32.gmra.mrb[24].mxu0 %vm508_vm1, %v5071_v54 }
  0xaa   : > { %4019 = vmatprep.mubr.msk.f32.mxu1 %vm508_vm1, %v6052_v57  ;;  %4243 = vmatprep.mubr.msk.f32.mxu0 %vm508_vm1, %v5103_v40 }
  0xad   : > { %4020 = vmatmul.mubr.msk.f32.gmra.mrb[10].mxu1 %vm508_vm1, %v6053_v30  ;;  %4244 = vmatmul.mubr.msk.f32.gmra.mrb[26].mxu0 %vm508_vm1, %v5106_v44  ;;  %v6058_v44 = vld [vmem:[#allocation7_spill] sm:$0xff] }
  0xae   : > { %4022 = vmatprep.mubr.msk.f32.mxu1 %vm508_vm1, %v5098_v19  ;;  %4246 = vmatprep.mubr.msk.f32.mxu0 %vm508_vm1, %v5276_v9 }
  0xb1   : > { %4023 = vmatmul.mubr.msk.f32.gmra.mrb[12].mxu1 %vm508_vm1, %v6054_v37  ;;  %4247 = vmatmul.mubr.msk.f32.gmra.mrb[28].mxu0 %vm508_vm1, %v5279_v6 }
  0xb2   : > { %4025 = vmatprep.mubr.msk.f32.mxu1 %vm508_vm1, %v5133_v39  ;;  %4249 = vmatprep.mubr.msk.f32.mxu0 %vm508_vm1, %v5458_v38 }
  0xb5   : > { %4026 = vmatmul.mubr.msk.f32.gmra.mrb[14].mxu1 %vm508_vm1, %v5150_v41  ;;  %4250 = vmatmul.mubr.msk.f32.gmra.mrb[30].mxu0 %vm508_vm1, %v5469_v62 }
  0xb6   : > { %4028 = vmatprep.mubr.msk.f32.mxu1 %vm508_vm1, %v5157_v13  ;;  %4254 = vmatprep.mubr.msk.f32.mxu0 %vm508_vm1, %v6055_v4  ;;  %v6059_v4 = vld [vmem:[#allocation8_spill] sm:$0xff] }
  0xb9   : > { %4029 = vmatmul.mubr.msk.f32.gmra.mrb[16].mxu1 %vm508_vm1, %v5173_v17  ;;  %4255 = vmatmul.mubr.msk.f32.vlgmr.msra.gmra.mrb[0].mxu0 %vm508_vm1, %v6056_v2  ;;  %v6060_v2 = vld [vmem:[#allocation9_spill] sm:$0xff] }
  0xba   : > { %4031 = vmatprep.mubr.msk.f32.mxu1 %vm508_vm1, %v5177_v61  ;;  %4303 = vmatpush3.msra.mxu0 %v5338_v27  ;;  %v6063_v27 = vld [vmem:[#allocation12_spill] sm:$0xff] }
  0xbb   : > { %4257 = vmatprep.mubr.msk.f32.mxu0 %vm508_vm1, %v6057_v35  ;;  %v6061_v35 = vld [vmem:[#allocation10_spill] sm:$0xff] }
  0xbd   : > { %4032 = vmatmul.mubr.msk.f32.gmra.mrb[18].mxu1 %vm508_vm1, %v5190_v45  ;;  %4258 = vmatmul.mubr.msk.f32.gmra.mrb[2].mxu0 %vm508_vm1, %v6058_v44  ;;  %v6062_v44 = vld [vmem:[#allocation11_spill] sm:$0xff] }
  0xbe   : > { %4034 = vmatprep.mubr.msk.f32.mxu1 %vm508_vm1, %v5194_v0  ;;  %4260 = vmatprep.mubr.msk.f32.mxu0 %vm508_vm1, %v6059_v4  ;;  %v6064_v4 = vld [vmem:[#allocation42_spill] sm:$0xff] }
  0xc1   : > { %4035 = vmatmul.mubr.msk.f32.gmra.mrb[20].mxu1 %vm508_vm1, %v5213_v16  ;;  %4261 = vmatmul.mubr.msk.f32.gmra.mrb[4].mxu0 %vm508_vm1, %v6060_v2  ;;  %v6065_v2 = vld [vmem:[#allocation13_spill] sm:$0xff] }
  0xc2   : > { %4037 = vmatprep.mubr.msk.f32.mxu1 %vm508_vm1, %v5217_v49  ;;  %4263 = vmatprep.mubr.msk.f32.mxu0 %vm508_vm1, %v6061_v35  ;;  %v6066_v49 = vld [vmem:[#allocation43_spill] sm:$0xff]  ;;  %v6067_v35 = vld [vmem:[#allocation14_spill] sm:$0xff] }
  0xc5   : > { %4038 = vmatmul.mubr.msk.f32.gmra.mrb[22].mxu1 %vm508_vm1, %v5231_v56  ;;  %4264 = vmatmul.mubr.msk.f32.gmra.mrb[6].mxu0 %vm508_vm1, %v6062_v44  ;;  %v6068_v44 = vld [vmem:[#allocation15_spill] sm:$0xff] }
  0xc6   : > { %4040 = vmatprep.mubr.msk.f32.mxu1 %vm508_vm1, %v5235_v14  ;;  %4266 = vmatprep.mubr.msk.f32.mxu0 %vm508_vm1, %v6063_v27  ;;  %v6069_v27 = vld [vmem:[#allocation16_spill] sm:$0xff] }
  0xc9   : > { %4041 = vmatmul.mubr.msk.f32.gmra.mrb[24].mxu1 %vm508_vm1, %v6064_v4  ;;  %4267 = vmatmul.mubr.msk.f32.gmra.mrb[8].mxu0 %vm508_vm1, %v6065_v2  ;;  %v6070_v2 = vld [vmem:[#allocation17_spill] sm:$0xff] }
  0xca   : > { %4043 = vmatprep.mubr.msk.f32.mxu1 %vm508_vm1, %v6066_v49  ;;  %4269 = vmatprep.mubr.msk.f32.mxu0 %vm508_vm1, %v6067_v35  ;;  %v6071_v35 = vld [vmem:[#allocation18_spill] sm:$0xff] }
  0xcd   : > { %4044 = vmatmul.mubr.msk.f32.gmra.mrb[26].mxu1 %vm508_vm1, %v5265_v36  ;;  %4270 = vmatmul.mubr.msk.f32.gmra.mrb[10].mxu0 %vm508_vm1, %v6068_v44  ;;  %v6072_v44 = vld [vmem:[#allocation19_spill] sm:$0xff] }
  0xce   : > { %4046 = vmatprep.mubr.msk.f32.mxu1 %vm508_vm1, %v5269_v34  ;;  %4272 = vmatprep.mubr.msk.f32.mxu0 %vm508_vm1, %v6069_v27  ;;  %v6073_v34 = vld [vmem:[#allocation2_spill] sm:$0xff]  ;;  %v6074_v27 = vld [vmem:[#allocation21_spill] sm:$0xff]  ;;  %v5594_v36 = vld [vmem:[%s4682_s28 + $0x1a8] sm:$0x3] }
  0xd1   : > { %4047 = vmatmul.mubr.msk.f32.gmra.mrb[28].mxu1 %vm508_vm1, %v5288_v60  ;;  %4273 = vmatmul.mubr.msk.f32.gmra.mrb[12].mxu0 %vm508_vm1, %v6070_v2  ;;  %v6075_v60 = vld [vmem:[#allocation3_spill] sm:$0xff] }
  0xd2   : > { %4049 = vmatprep.mubr.msk.f32.mxu1 %vm508_vm1, %v5292_v33  ;;  %4275 = vmatprep.mubr.msk.f32.mxu0 %vm508_vm1, %v6071_v35  ;;  %v6076_v2 = vld [vmem:[#allocation23_spill] sm:$0xff]  ;;  %v6084_v33 = vld [vmem:[#allocation38_spill] sm:$0xff] }
  0xd5   : > { %4050 = vmatmul.mubr.msk.f32.gmra.mrb[30].mxu1 %vm508_vm1, %v5308_v48  ;;  %4276 = vmatmul.mubr.msk.f32.gmra.mrb[14].mxu0 %vm508_vm1, %v6072_v44  ;;  %v6077_v48 = vld [vmem:[#allocation25_spill] sm:$0xff] }
  0xd6   : > { %4054 = vmatprep.mubr.msk.f32.mxu1 %vm508_vm1, %v6073_v34  ;;  %4278 = vmatprep.mubr.msk.f32.mxu0 %vm508_vm1, %v6074_v27  ;;  %v6078_v34 = vld [vmem:[#allocation27_spill] sm:$0xff] }
  0xd9   : > { %4055 = vmatmul.mubr.msk.f32.vlgmr.msra.gmra.mrb[0].mxu1 %vm508_vm1, %v6075_v60  ;;  %4279 = vmatmul.mubr.msk.f32.gmra.mrb[16].mxu0 %vm508_vm1, %v6076_v2  ;;  %v6079_v60 = vld [vmem:[#allocation29_spill] sm:$0xff] }
  0xda   : > { %4353 = vmatpush3.msra.mxu1 %v4666_v1  ;;  %4057 = vmatprep.mubr.msk.f32.mxu1 %vm508_vm1, %v4708_v15  ;;  %v6080_v1 = vld [vmem:[#allocation31_spill] sm:$0xff]  ;;  %v6081_v15 = vld [vmem:[#allocation33_spill] sm:$0xff] }
  0xdb   : > { %4281 = vmatprep.mubr.msk.f32.mxu0 %vm508_vm1, %v6077_v48 }
  0xdd   : > { %4058 = vmatmul.mubr.msk.f32.gmra.mrb[2].mxu1 %vm508_vm1, %v4713_v18  ;;  %4282 = vmatmul.mubr.msk.f32.gmra.mrb[18].mxu0 %vm508_vm1, %v6078_v34  ;;  %v6082_v18 = vld [vmem:[#allocation35_spill] sm:$0xff] }
  0xde   : > { %4060 = vmatprep.mubr.msk.f32.mxu1 %vm508_vm1, %v4725_v25  ;;  %4284 = vmatprep.mubr.msk.f32.mxu0 %vm508_vm1, %v6079_v60  ;;  %v6083_v25 = vld [vmem:[#allocation37_spill] sm:$0xff] }
  0xe1   : > { %4061 = vmatmul.mubr.msk.f32.gmra.mrb[4].mxu1 %vm508_vm1, %v4728_v26  ;;  %4285 = vmatmul.mubr.msk.f32.gmra.mrb[20].mxu0 %vm508_vm1, %v6080_v1  ;;  %v482_v26 = vrot.slane %v5276_v9, 1 }
  0xe2   : > { %4063 = vmatprep.mubr.msk.f32.mxu1 %vm508_vm1, %v4739_v31  ;;  %4287 = vmatprep.mubr.msk.f32.mxu0 %vm508_vm1, %v6081_v15  ;;  %v483_v31 = vrot.slane %v5279_v6, 1 }
  0xe4   : > { %v5591_v15 = vsel %vm317_vm0, %v482_v26, %v483_v31 }
  0xe5   : > { %4064 = vmatmul.mubr.msk.f32.gmra.mrb[6].mxu1 %vm508_vm1, %v4742_v32  ;;  %4288 = vmatmul.mubr.msk.f32.gmra.mrb[22].mxu0 %vm508_vm1, %v6082_v18  ;;  %v6085_v32 = vld [vmem:[#allocation39_spill] sm:$0xff]  ;;  %v496_v18 = vrot.slane %v5469_v62, 1 }
  0xe6   : > { %4066 = vmatprep.mubr.msk.f32.mxu1 %vm508_vm1, %v4776_v42  ;;  %4290 = vmatprep.mubr.msk.f32.mxu0 %vm508_vm1, %v6083_v25  ;;  %v485_v42 = vrot.slane %v5297_v52, 1  ;;  %v495_v25 = vrot.slane %v5458_v38, 1  ;;  %v498_v52 = vrot.slane %v5594_v36, 1 }
  0xe8   : > { %v497_v26 = vsel %vm317_vm0, %v495_v25, %v496_v18 }
  0xe9   : > { %4067 = vmatmul.mubr.msk.f32.gmra.mrb[8].mxu1 %vm508_vm1, %v4779_v43  ;;  %4291 = vmatmul.mubr.msk.f32.gmra.mrb[24].mxu0 %vm508_vm1, %v6084_v33  ;;  %v6086_v43 = vld [vmem:[#allocation40_spill] sm:$0xff] }
  0xea   : > { %4069 = vmatprep.mubr.msk.f32.mxu1 %vm508_vm1, %v4803_v50  ;;  %4293 = vmatprep.mubr.msk.f32.mxu0 %vm508_vm1, %v6085_v32  ;;  %v5605_v50 = vsel %vm317_vm0, %v483_v31, %v485_v42 }
  0xed   : > { %4070 = vmatmul.mubr.msk.f32.gmra.mrb[10].mxu1 %vm508_vm1, %v4806_v51  ;;  %4294 = vmatmul.mubr.msk.f32.gmra.mrb[26].mxu0 %vm508_vm1, %v6086_v43  ;;  %v499_v51 = vsel %vm317_vm0, %v496_v18, %v498_v52 }
  0xee   : > { %4072 = vmatprep.mubr.msk.f32.mxu1 %vm508_vm1, %v4829_v58  ;;  %4296 = vmatprep.mubr.msk.f32.mxu0 %vm508_vm1, %v5591_v15  ;;  %v6090_v58 = vld [vmem:[#allocation33_spill] sm:$0xff] }
  0xf1   : > { %4073 = vmatmul.mubr.msk.f32.gmra.mrb[12].mxu1 %vm508_vm1, %v4832_v59  ;;  %4297 = vmatmul.mubr.msk.f32.gmra.mrb[28].mxu0 %vm508_vm1, %v5605_v50  ;;  %v6091_v59 = vld [vmem:[#allocation45_spill] sm:$0xff] }
  0xf2   : > { %4075 = vmatprep.mubr.msk.f32.mxu1 %vm508_vm1, %v4855_v3  ;;  %4299 = vmatprep.mubr.msk.f32.mxu0 %vm508_vm1, %v497_v26  ;;  %v6092_v3 = vld [vmem:[#allocation35_spill] sm:$0xff] }
  0xf5   : > { %4076 = vmatmul.mubr.msk.f32.gmra.mrb[14].mxu1 %vm508_vm1, %v4858_v7  ;;  %4300 = vmatmul.mubr.msk.f32.gmra.mrb[30].mxu0 %vm508_vm1, %v499_v51  ;;  %v6093_v7 = vld [vmem:[#allocation46_spill] sm:$0xff] }
  0xf6   : > { %4078 = vmatprep.mubr.msk.f32.mxu1 %vm508_vm1, %v4896_v28  ;;  %4304 = vmatprep.mubr.msk.f32.mxu0 %vm508_vm1, %v4951_v21  ;;  %v500_v28 = vrot.slane %v5458_v38, 2  ;;  %v503_v21 = vrot.slane %v5594_v36, 2 }
  0xf9   : > { %4079 = vmatmul.mubr.msk.f32.gmra.mrb[16].mxu1 %vm508_vm1, %v4899_v29  ;;  %4305 = vmatmul.mubr.msk.f32.vlgmr.msra.gmra.mrb[0].mxu0 %vm508_vm1, %v6047_v5  ;;  %v501_v29 = vrot.slane %v5469_v62, 2 }
  0xfa   : > { %4081 = vmatprep.mubr.msk.f32.mxu1 %vm508_vm1, %v4924_v53  ;;  %4307 = vmatprep.mubr.msk.f32.mxu0 %vm508_vm1, %v6048_v11  ;;  %v6096_v53 = vld [vmem:[#allocation48_spill] sm:$0xff] }
  0xfd   : > { %4082 = vmatmul.mubr.msk.f32.gmra.mrb[18].mxu1 %vm508_vm1, %v4927_v55  ;;  %4308 = vmatmul.mubr.msk.f32.gmra.mrb[2].mxu0 %vm508_vm1, %v6049_v47  ;;  %v6097_v55 = vld [vmem:[#allocation49_spill] sm:$0xff] }
  0xfe   : > { %4084 = vmatprep.mubr.msk.f32.mxu1 %vm508_vm1, %v4956_v22  ;;  %4310 = vmatprep.mubr.msk.f32.mxu0 %vm508_vm1, %v6050_v63  ;;  %v6095_v22 = vld [vmem:[#allocation47_spill] sm:$0xff] }
 0x101   : > { %4085 = vmatmul.mubr.msk.f32.gmra.mrb[20].mxu1 %vm508_vm1, %v4959_v24  ;;  %4311 = vmatmul.mubr.msk.f32.gmra.mrb[4].mxu0 %vm508_vm1, %v6051_v23  ;;  %v502_v24 = vsel %vm398_vm2, %v500_v28, %v501_v29 }
 0x102   : > { %4087 = vmatprep.mubr.msk.f32.mxu1 %vm508_vm1, %v4997_v8  ;;  %4313 = vmatprep.mubr.msk.f32.mxu0 %vm508_vm1, %v6052_v57  ;;  %v6094_v8 = vld [vmem:[#allocation37_spill] sm:$0xff] }
 0x105   : > { %4088 = vmatmul.mubr.msk.f32.gmra.mrb[22].mxu1 %vm508_vm1, %v5000_v10  ;;  %4314 = vmatmul.mubr.msk.f32.gmra.mrb[6].mxu0 %vm508_vm1, %v6053_v30  ;;  %v6098_v10 = vld [vmem:[#allocation50_spill] sm:$0xff] }
 0x106   : > { %4090 = vmatprep.mubr.msk.f32.mxu1 %vm508_vm1, %v5033_v46  ;;  %4316 = vmatprep.mubr.msk.f32.mxu0 %vm508_vm1, %v5098_v19  ;;  %v6087_v46 = vld [vmem:[#allocation34_spill] sm:$0xff] }
 0x109   : > { %4091 = vmatmul.mubr.msk.f32.gmra.mrb[24].mxu1 %vm508_vm1, %v5036_v12  ;;  %4317 = vmatmul.mubr.msk.f32.gmra.mrb[8].mxu0 %vm508_vm1, %v6054_v37  ;;  %v504_v12 = vsel %vm398_vm2, %v501_v29, %v503_v21 }
 0x10a   : > { %4093 = vmatprep.mubr.msk.f32.mxu1 %vm508_vm1, %v5068_v20  ;;  %4319 = vmatprep.mubr.msk.f32.mxu0 %vm508_vm1, %v5133_v39 }
 0x10d   : > { %4094 = vmatmul.mubr.msk.f32.gmra.mrb[26].mxu1 %vm508_vm1, %v5071_v54  ;;  %4320 = vmatmul.mubr.msk.f32.gmra.mrb[10].mxu0 %vm508_vm1, %v5150_v41 }
 0x10e   : > { %4096 = vmatprep.mubr.msk.f32.mxu1 %vm508_vm1, %v5103_v40  ;;  %4322 = vmatprep.mubr.msk.f32.mxu0 %vm508_vm1, %v5157_v13 }
 0x111   : > { %4097 = vmatmul.mubr.msk.f32.gmra.mrb[28].mxu1 %vm508_vm1, %v6087_v46  ;;  %4323 = vmatmul.mubr.msk.f32.gmra.mrb[12].mxu0 %vm508_vm1, %v5173_v17 }
 0x112   : > { %4099 = vmatprep.mubr.msk.f32.mxu1 %vm508_vm1, %v5276_v9  ;;  %4325 = vmatprep.mubr.msk.f32.mxu0 %vm508_vm1, %v5177_v61  ;;  %v6088_v9 = vld [vmem:[#allocation41_spill] sm:$0xff] }
 0x115   : > { %4100 = vmatmul.mubr.msk.f32.gmra.mrb[30].mxu1 %vm508_vm1, %v5279_v6  ;;  %4326 = vmatmul.mubr.msk.f32.gmra.mrb[14].mxu0 %vm508_vm1, %v5190_v45  ;;  %v6089_v6 = vld [vmem:[#allocation44_spill] sm:$0xff] }
 0x116   : > { %4128 = vmatprep.mubr.msk.f32.mxu1 %vm508_vm1, %v6071_v35  ;;  %4328 = vmatprep.mubr.msk.f32.mxu0 %vm508_vm1, %v5194_v0 }
 0x119   : > { %4129 = vmatmul.mubr.msk.f32.vlgmr.msra.gmra.mrb[16].mxu1 %vm508_vm1, %v6072_v44  ;;  %4329 = vmatmul.mubr.msk.f32.gmra.mrb[16].mxu0 %vm508_vm1, %v5213_v16 }
 0x11a   : > { %4131 = vmatprep.mubr.msk.f32.mxu1 %vm508_vm1, %v6074_v27  ;;  %4331 = vmatprep.mubr.msk.f32.mxu0 %vm508_vm1, %v6088_v9 }
 0x11d   : > { %4132 = vmatmul.mubr.msk.f32.gmra.mrb[18].mxu1 %vm508_vm1, %v6076_v2  ;;  %4332 = vmatmul.mubr.msk.f32.gmra.mrb[18].mxu0 %vm508_vm1, %v5231_v56 }
 0x11e   : > { %4134 = vmatprep.mubr.msk.f32.mxu1 %vm508_vm1, %v6077_v48  ;;  %4334 = vmatprep.mubr.msk.f32.mxu0 %vm508_vm1, %v5235_v14 }
 0x121   : > { %4135 = vmatmul.mubr.msk.f32.gmra.mrb[20].mxu1 %vm508_vm1, %v6078_v34  ;;  %4335 = vmatmul.mubr.msk.f32.gmra.mrb[20].mxu0 %vm508_vm1, %v6064_v4 }
 0x122   : > { %4137 = vmatprep.mubr.msk.f32.mxu1 %vm508_vm1, %v6079_v60  ;;  %4337 = vmatprep.mubr.msk.f32.mxu0 %vm508_vm1, %v6066_v49 }
 0x125   : > { %4138 = vmatmul.mubr.msk.f32.gmra.mrb[22].mxu1 %vm508_vm1, %v6080_v1  ;;  %4338 = vmatmul.mubr.msk.f32.gmra.mrb[22].mxu0 %vm508_vm1, %v6089_v6 }
 0x126   : > { %4140 = vmatprep.mubr.msk.f32.mxu1 %vm508_vm1, %v6090_v58  ;;  %4340 = vmatprep.mubr.msk.f32.mxu0 %vm508_vm1, %v6091_v59 }
 0x129   : > { %4141 = vmatmul.mubr.msk.f32.gmra.mrb[24].mxu1 %vm508_vm1, %v6092_v3  ;;  %4341 = vmatmul.mubr.msk.f32.gmra.mrb[24].mxu0 %vm508_vm1, %v6093_v7 }
 0x12a   : > { %4143 = vmatprep.mubr.msk.f32.mxu1 %vm508_vm1, %v6094_v8  ;;  %4343 = vmatprep.mubr.msk.f32.mxu0 %vm508_vm1, %v6095_v22 }
 0x12d   : > { %4144 = vmatmul.mubr.msk.f32.gmra.mrb[26].mxu1 %vm508_vm1, %v6084_v33  ;;  %4344 = vmatmul.mubr.msk.f32.gmra.mrb[26].mxu0 %vm508_vm1, %v6096_v53 }
 0x12e   : > { %4146 = vmatprep.mubr.msk.f32.mxu1 %vm508_vm1, %v6085_v32  ;;  %4346 = vmatprep.mubr.msk.f32.mxu0 %vm508_vm1, %v6097_v55 }
 0x131   : > { %4147 = vmatmul.mubr.msk.f32.gmra.mrb[28].mxu1 %vm508_vm1, %v6086_v43  ;;  %4347 = vmatmul.mubr.msk.f32.gmra.mrb[28].mxu0 %vm508_vm1, %v6098_v10 }
 0x132   : > { %4149 = vmatprep.mubr.msk.f32.mxu1 %vm508_vm1, %v5591_v15  ;;  %4349 = vmatprep.mubr.msk.f32.mxu0 %vm508_vm1, %v502_v24 }
 0x135   : > { %4150 = vmatmul.mubr.msk.f32.gmra.mrb[30].mxu1 %vm508_vm1, %v5605_v50  ;;  %4350 = vmatmul.mubr.msk.f32.gmra.mrb[30].mxu0 %vm508_vm1, %v504_v12 }
 0x1ac   : > { %v4056_v40 = vpop.f32.mrb[0].mxu1 }
 0x1ad   : > { %v1482_v20 = vpop.f32.mrb[1].mxu1 }
 0x1b0   : > { %v4059_v54 = vpop.f32.mrb[2].mxu1 }
 0x1b1   : > { %v1492_v19 = vpop.f32.mrb[3].mxu1 }
 0x1b4   : > { %v4062_v13 = vpop.f32.mrb[4].mxu1 }
 0x1b5   : > { %v1502_v39 = vpop.f32.mrb[5].mxu1 }
 0x1b8   : > { %v4065_v41 = vpop.f32.mrb[6].mxu1 }
 0x1b9   : > { %v1512_v17 = vpop.f32.mrb[7].mxu1 }
 0x1bc   : > { %v5751_v61 = vpop.f32.mrb[8].mxu1 }
 0x1bd   : > { %v5753_v45 = vpop.f32.mrb[9].mxu1 }
 0x1c0   : > { %v5755_v0 = vpop.f32.mrb[10].mxu1 }
 0x1c1   : > { %v5757_v16 = vpop.f32.mrb[11].mxu1 }
 0x1c4   : > { %v5759_v49 = vpop.f32.mrb[12].mxu1 }
 0x1c5   : > { %v5761_v56 = vpop.f32.mrb[13].mxu1 }
 0x1c8   : > { %v5763_v14 = vpop.f32.mrb[14].mxu1 }
 0x1c9   : > { %v5765_v36 = vpop.f32.mrb[15].mxu1 }
 0x1cc   : > { %v4306_v33 = vpop.f32.mrb[0].mxu0 }
 0x1cd   : > { %v4354_v48 = vadd.f32 %v4306_v33, %v4056_v40  ;;  %v2797_v5 = vpop.f32.mrb[1].mxu0 }
 0x1ce   : > { %v4355_v11 = vadd.f32 %v2797_v5, %v1482_v20 }
 0x1cf   : > { %2989 = vst.msk [vmem:[%s5771_s18 + $0x8] sm:$0xff] %vm508_vm1, %v4354_v48  ;;  %v3021_v47 = vsel %vm508_vm1, %v4354_v48, 0.0  ;;  %v3092_v63 = vmul.f32 %v4354_v48, %v4354_v48 }
 0x1d0   : > { %2988 = vst.msk [vmem:[%s5771_s18] sm:$0xff] %vm508_vm1, %v4355_v11  ;;  %v3020_v23 = vsel %vm508_vm1, %v4355_v11, 0.0  ;;  %v3091_v57 = vmul.f32 %v4355_v11, %v4355_v11  ;;  %v4309_v30 = vpop.f32.mrb[2].mxu0 }
 0x1d1   : > { %v3124_v38 = vsel %vm508_vm1, %v3092_v63, 0.0  ;;  %v3022_v37 = vadd.f32 %v3021_v47, %v3020_v23  ;;  %v4356_v62 = vadd.f32 %v4309_v30, %v4059_v54  ;;  %v2807_v4 = vpop.f32.mrb[3].mxu0 }
 0x1d2   : > { %v3123_v35 = vsel %vm508_vm1, %v3091_v57, 0.0  ;;  %v4357_v44 = vadd.f32 %v2807_v4, %v1492_v19 }
 0x1d3   : > { %v3125_v27 = vadd.f32 %v3124_v38, %v3123_v35  ;;  %2991 = vst.msk [vmem:[%s5771_s18 + $0x18] sm:$0xff] %vm508_vm1, %v4356_v62  ;;  %v3094_v2 = vmul.f32 %v4356_v62, %v4356_v62  ;;  %v3025_v31 = vsel %vm508_vm1, %v4356_v62, 0.0 }
 0x1d4   : > { %2990 = vst.msk [vmem:[%s5771_s18 + $0x10] sm:$0xff] %vm508_vm1, %v4357_v44  ;;  %v3023_v34 = vsel %vm508_vm1, %v4357_v44, 0.0  ;;  %v3093_v60 = vmul.f32 %v4357_v44, %v4357_v44  ;;  %v4312_v1 = vpop.f32.mrb[4].mxu0 }
 0x1d5   : > { %v3024_v15 = vadd.f32 %v3023_v34, %v3022_v37  ;;  %v4358_v18 = vadd.f32 %v4312_v1, %v4062_v13  ;;  %v2817_v25 = vpop.f32.mrb[5].mxu0  ;;  %v3128_v52 = vsel %vm508_vm1, %v3094_v2, 0.0 }
 0x1d6   : > { %v3126_v32 = vsel %vm508_vm1, %v3093_v60, 0.0  ;;  %v4359_v42 = vadd.f32 %v2817_v25, %v1502_v39 }
 0x1d7   : > { %v3127_v43 = vadd.f32 %v3126_v32, %v3125_v27  ;;  %2993 = vst.msk [vmem:[%s5771_s18 + $0x28] sm:$0xff] %vm508_vm1, %v4358_v18  ;;  %v3026_v50 = vadd.f32 %v3025_v31, %v3024_v15  ;;  %v3096_v26 = vmul.f32 %v4358_v18, %v4358_v18  ;;  %v3029_v7 = vsel %vm508_vm1, %v4358_v18, 0.0 }
 0x1d8   : > { %2992 = vst.msk [vmem:[%s5771_s18 + $0x20] sm:$0xff] %vm508_vm1, %v4359_v42  ;;  %v3027_v51 = vsel %vm508_vm1, %v4359_v42, 0.0  ;;  %v3095_v46 = vmul.f32 %v4359_v42, %v4359_v42  ;;  %v4315_v9 = vpop.f32.mrb[6].mxu0 }
 0x1d9   : > { %v3028_v6 = vadd.f32 %v3027_v51, %v3026_v50  ;;  %v3129_v58 = vadd.f32 %v3128_v52, %v3127_v43  ;;  %v4360_v59 = vadd.f32 %v4315_v9, %v4065_v41  ;;  %v2827_v3 = vpop.f32.mrb[7].mxu0  ;;  %v3132_v53 = vsel %vm508_vm1, %v3096_v26, 0.0 }
 0x1da   : > { %v3130_v8 = vsel %vm508_vm1, %v3095_v46, 0.0  ;;  %v4361_v22 = vadd.f32 %v2827_v3, %v1512_v17 }
 0x1db   : > { %v3131_v28 = vadd.f32 %v3130_v8, %v3129_v58  ;;  %2995 = vst.msk [vmem:[%s5771_s18 + $0x38] sm:$0xff] %vm508_vm1, %v4360_v59  ;;  %v3030_v29 = vadd.f32 %v3029_v7, %v3028_v6  ;;  %v3098_v55 = vmul.f32 %v4360_v59, %v4360_v59  ;;  %v3033_v19 = vsel %vm508_vm1, %v4360_v59, 0.0 }
 0x1dc   : > { %2994 = vst.msk [vmem:[%s5771_s18 + $0x30] sm:$0xff] %vm508_vm1, %v4361_v22  ;;  %v3031_v21 = vsel %vm508_vm1, %v4361_v22, 0.0  ;;  %v3097_v24 = vmul.f32 %v4361_v22, %v4361_v22  ;;  %v4318_v10 = vpop.f32.mrb[8].mxu0 }
 0x1dd   : > { %v3032_v12 = vadd.f32 %v3031_v21, %v3030_v29  ;;  %v3133_v40 = vadd.f32 %v3132_v53, %v3131_v28  ;;  %v4362_v20 = vadd.f32 %v4318_v10, %v5751_v61  ;;  %v2837_v54 = vpop.f32.mrb[9].mxu0  ;;  %v3136_v33 = vsel %vm508_vm1, %v3098_v55, 0.0 }
 0x1de   : > { %v3134_v13 = vsel %vm508_vm1, %v3097_v24, 0.0  ;;  %v4363_v39 = vadd.f32 %v2837_v54, %v5753_v45 }
 0x1df   : > { %v3135_v41 = vadd.f32 %v3134_v13, %v3133_v40  ;;  %2997 = vst.msk [vmem:[%s5771_s18 + $0x48] sm:$0xff] %vm508_vm1, %v4362_v20  ;;  %v3034_v17 = vadd.f32 %v3033_v19, %v3032_v12  ;;  %v3100_v48 = vmul.f32 %v4362_v20, %v4362_v20  ;;  %v3037_v57 = vsel %vm508_vm1, %v4362_v20, 0.0 }
 0x1e0   : > { %2996 = vst.msk [vmem:[%s5771_s18 + $0x40] sm:$0xff] %vm508_vm1, %v4363_v39  ;;  %v3035_v61 = vsel %vm508_vm1, %v4363_v39, 0.0  ;;  %v3099_v5 = vmul.f32 %v4363_v39, %v4363_v39  ;;  %v4321_v11 = vpop.f32.mrb[10].mxu0 }
 0x1e1   : > { %v3036_v47 = vadd.f32 %v3035_v61, %v3034_v17  ;;  %v3137_v63 = vadd.f32 %v3136_v33, %v3135_v41  ;;  %v4364_v23 = vadd.f32 %v4321_v11, %v5755_v0  ;;  %v2847_v45 = vpop.f32.mrb[11].mxu0  ;;  %v3140_v4 = vsel %vm508_vm1, %v3100_v48, 0.0 }
 0x1e2   : > { %v3138_v30 = vsel %vm508_vm1, %v3099_v5, 0.0  ;;  %v4365_v38 = vadd.f32 %v2847_v45, %v5757_v16 }
 0x1e3   : > { %v3139_v37 = vadd.f32 %v3138_v30, %v3137_v63  ;;  %2999 = vst.msk [vmem:[%s5771_s18 + $0x58] sm:$0xff] %vm508_vm1, %v4364_v23  ;;  %v3038_v62 = vadd.f32 %v3037_v57, %v3036_v47  ;;  %v3102_v35 = vmul.f32 %v4364_v23, %v4364_v23  ;;  %v3041_v1 = vsel %vm508_vm1, %v4364_v23, 0.0 }
 0x1e4   : > { %2998 = vst.msk [vmem:[%s5771_s18 + $0x50] sm:$0xff] %vm508_vm1, %v4365_v38  ;;  %v3039_v0 = vsel %vm508_vm1, %v4365_v38, 0.0  ;;  %v3101_v44 = vmul.f32 %v4365_v38, %v4365_v38  ;;  %v4324_v27 = vpop.f32.mrb[12].mxu0 }
 0x1e5   : > { %v3040_v2 = vadd.f32 %v3039_v0, %v3038_v62  ;;  %v3141_v34 = vadd.f32 %v3140_v4, %v3139_v37  ;;  %v4366_v60 = vadd.f32 %v4324_v27, %v5759_v49  ;;  %v2857_v16 = vpop.f32.mrb[13].mxu0  ;;  %v3144_v32 = vsel %vm508_vm1, %v3102_v35, 0.0 }
 0x1e6   : > { %v3142_v15 = vsel %vm508_vm1, %v3101_v44, 0.0  ;;  %v4367_v18 = vadd.f32 %v2857_v16, %v5761_v56 }
 0x1e7   : > { %v3143_v25 = vadd.f32 %v3142_v15, %v3141_v34  ;;  %3001 = vst.msk [vmem:[%s5771_s18 + $0x68] sm:$0xff] %vm508_vm1, %v4366_v60  ;;  %v3042_v31 = vadd.f32 %v3041_v1, %v3040_v2  ;;  %v3104_v42 = vmul.f32 %v4366_v60, %v4366_v60  ;;  %v3045_v46 = vsel %vm508_vm1, %v4366_v60, 0.0 }
 0x1e8   : > { %3000 = vst.msk [vmem:[%s5771_s18 + $0x60] sm:$0xff] %vm508_vm1, %v4367_v18  ;;  %v3043_v43 = vsel %vm508_vm1, %v4367_v18, 0.0  ;;  %v3103_v49 = vmul.f32 %v4367_v18, %v4367_v18  ;;  %v4327_v50 = vpop.f32.mrb[14].mxu0 }
 0x1e9   : > { %v3044_v52 = vadd.f32 %v3043_v43, %v3042_v31  ;;  %v3145_v26 = vadd.f32 %v3144_v32, %v3143_v25  ;;  %v4368_v51 = vadd.f32 %v4327_v50, %v5763_v14  ;;  %v2867_v56 = vpop.f32.mrb[15].mxu0  ;;  %v3148_v7 = vsel %vm508_vm1, %v3104_v42, 0.0 }
 0x1ea   : > { %v3146_v9 = vsel %vm508_vm1, %v3103_v49, 0.0  ;;  %v4369_v6 = vadd.f32 %v2867_v56, %v5765_v36 }
 0x1eb   : > { %v3147_v58 = vadd.f32 %v3146_v9, %v3145_v26  ;;  %3003 = vst.msk [vmem:[%s5771_s18 + $0x78] sm:$0xff] %vm508_vm1, %v4368_v51  ;;  %v3046_v59 = vadd.f32 %v3045_v46, %v3044_v52  ;;  %v3106_v8 = vmul.f32 %v4368_v51, %v4368_v51  ;;  %v3049_v24 = vsel %vm508_vm1, %v4368_v51, 0.0 }
 0x1ec   : > { %v4130_v3 = vpop.f32.mrb[16].mxu1  ;;  %3002 = vst.msk [vmem:[%s5771_s18 + $0x70] sm:$0xff] %vm508_vm1, %v4369_v6  ;;  %v3047_v14 = vsel %vm508_vm1, %v4369_v6, 0.0  ;;  %v3105_v22 = vmul.f32 %v4369_v6, %v4369_v6  ;;  %v4330_v28 = vpop.f32.mrb[16].mxu0 }
 0x1ed   : > { %v1825_v29 = vpop.f32.mrb[17].mxu1  ;;  %v3048_v53 = vadd.f32 %v3047_v14, %v3046_v59  ;;  %v3149_v55 = vadd.f32 %v3148_v7, %v3147_v58  ;;  %v4370_v36 = vadd.f32 %v4330_v28, %v4130_v3  ;;  %v2877_v21 = vpop.f32.mrb[17].mxu0  ;;  %v3152_v19 = vsel %vm508_vm1, %v3106_v8, 0.0 }
 0x1ee   : > { %v3150_v10 = vsel %vm508_vm1, %v3105_v22, 0.0  ;;  %v4371_v12 = vadd.f32 %v2877_v21, %v1825_v29 }
 0x1ef   : > { %v3151_v40 = vadd.f32 %v3150_v10, %v3149_v55  ;;  %3005 = vst.msk [vmem:[%s5771_s18 + $0x88] sm:$0xff] %vm508_vm1, %v4370_v36  ;;  %v3050_v20 = vadd.f32 %v3049_v24, %v3048_v53  ;;  %v3108_v13 = vmul.f32 %v4370_v36, %v4370_v36  ;;  %v3053_v47 = vsel %vm508_vm1, %v4370_v36, 0.0 }
 0x1f0   : > { %v4133_v54 = vpop.f32.mrb[18].mxu1  ;;  %3004 = vst.msk [vmem:[%s5771_s18 + $0x80] sm:$0xff] %vm508_vm1, %v4371_v12  ;;  %v3051_v39 = vsel %vm508_vm1, %v4371_v12, 0.0  ;;  %v3107_v41 = vmul.f32 %v4371_v12, %v4371_v12  ;;  %v4333_v17 = vpop.f32.mrb[18].mxu0 }
 0x1f1   : > { %v1835_v33 = vpop.f32.mrb[19].mxu1  ;;  %v3052_v48 = vadd.f32 %v3051_v39, %v3050_v20  ;;  %v3153_v61 = vadd.f32 %v3152_v19, %v3151_v40  ;;  %v4372_v5 = vadd.f32 %v4333_v17, %v4133_v54  ;;  %v2887_v11 = vpop.f32.mrb[19].mxu0  ;;  %v3156_v38 = vsel %vm508_vm1, %v3108_v13, 0.0 }
 0x1f2   : > { %v3154_v63 = vsel %vm508_vm1, %v3107_v41, 0.0  ;;  %v4373_v23 = vadd.f32 %v2887_v11, %v1835_v33 }
 0x1f3   : > { %v3155_v45 = vadd.f32 %v3154_v63, %v3153_v61  ;;  %3007 = vst.msk [vmem:[%s5771_s18 + $0x98] sm:$0xff] %vm508_vm1, %v4372_v5  ;;  %v3054_v57 = vadd.f32 %v3053_v47, %v3052_v48  ;;  %v3110_v37 = vmul.f32 %v4372_v5, %v4372_v5  ;;  %v3057_v60 = vsel %vm508_vm1, %v4372_v5, 0.0 }
 0x1f4   : > { %v4136_v30 = vpop.f32.mrb[20].mxu1  ;;  %3006 = vst.msk [vmem:[%s5771_s18 + $0x90] sm:$0xff] %vm508_vm1, %v4373_v23  ;;  %v3055_v62 = vsel %vm508_vm1, %v4373_v23, 0.0  ;;  %v3109_v4 = vmul.f32 %v4373_v23, %v4373_v23  ;;  %v4336_v35 = vpop.f32.mrb[20].mxu0 }
 0x1f5   : > { %v1845_v0 = vpop.f32.mrb[21].mxu1  ;;  %v3056_v44 = vadd.f32 %v3055_v62, %v3054_v57  ;;  %v3157_v27 = vadd.f32 %v3156_v38, %v3155_v45  ;;  %v4374_v2 = vadd.f32 %v4336_v35, %v4136_v30  ;;  %v2897_v34 = vpop.f32.mrb[21].mxu0  ;;  %v3160_v31 = vsel %vm508_vm1, %v3110_v37, 0.0 }
 0x1f6   : > { %v3158_v16 = vsel %vm508_vm1, %v3109_v4, 0.0  ;;  %v4375_v1 = vadd.f32 %v2897_v34, %v1845_v0 }
 0x1f7   : > { %v3159_v15 = vadd.f32 %v3158_v16, %v3157_v27  ;;  %3009 = vst.msk [vmem:[%s5771_s18 + $0xa8] sm:$0xff] %vm508_vm1, %v4374_v2  ;;  %v3058_v18 = vadd.f32 %v3057_v60, %v3056_v44  ;;  %v3112_v32 = vmul.f32 %v4374_v2, %v4374_v2  ;;  %v3061_v46 = vsel %vm508_vm1, %v4374_v2, 0.0 }
 0x1f8   : > { %v4139_v25 = vpop.f32.mrb[22].mxu1  ;;  %3008 = vst.msk [vmem:[%s5771_s18 + $0xa0] sm:$0xff] %vm508_vm1, %v4375_v1  ;;  %v3059_v42 = vsel %vm508_vm1, %v4375_v1, 0.0  ;;  %v3111_v43 = vmul.f32 %v4375_v1, %v4375_v1  ;;  %v4339_v49 = vpop.f32.mrb[22].mxu0 }
 0x1f9   : > { %v1855_v50 = vpop.f32.mrb[23].mxu1  ;;  %v3060_v52 = vadd.f32 %v3059_v42, %v3058_v18  ;;  %v3161_v26 = vadd.f32 %v3160_v31, %v3159_v15  ;;  %v4376_v51 = vadd.f32 %v4339_v49, %v4139_v25  ;;  %v2907_v56 = vpop.f32.mrb[23].mxu0  ;;  %v3164_v7 = vsel %vm508_vm1, %v3112_v32, 0.0 }
 0x1fa   : > { %v3162_v9 = vsel %vm508_vm1, %v3111_v43, 0.0  ;;  %v4377_v6 = vadd.f32 %v2907_v56, %v1855_v50 }
 0x1fb   : > { %v3163_v58 = vadd.f32 %v3162_v9, %v3161_v26  ;;  %3011 = vst.msk [vmem:[%s5771_s18 + $0xb8] sm:$0xff] %vm508_vm1, %v4376_v51  ;;  %v3062_v59 = vadd.f32 %v3061_v46, %v3060_v52  ;;  %v3114_v8 = vmul.f32 %v4376_v51, %v4376_v51  ;;  %v3065_v24 = vsel %vm508_vm1, %v4376_v51, 0.0 }
 0x1fc   : > { %v4142_v3 = vpop.f32.mrb[24].mxu1  ;;  %3010 = vst.msk [vmem:[%s5771_s18 + $0xb0] sm:$0xff] %vm508_vm1, %v4377_v6  ;;  %v3063_v14 = vsel %vm508_vm1, %v4377_v6, 0.0  ;;  %v3113_v22 = vmul.f32 %v4377_v6, %v4377_v6  ;;  %v4342_v28 = vpop.f32.mrb[24].mxu0 }
 0x1fd   : > { %v1865_v29 = vpop.f32.mrb[25].mxu1  ;;  %v3064_v53 = vadd.f32 %v3063_v14, %v3062_v59  ;;  %v3165_v55 = vadd.f32 %v3164_v7, %v3163_v58  ;;  %v4378_v36 = vadd.f32 %v4342_v28, %v4142_v3  ;;  %v2917_v21 = vpop.f32.mrb[25].mxu0  ;;  %v3168_v19 = vsel %vm508_vm1, %v3114_v8, 0.0 }
 0x1fe   : > { %v3166_v10 = vsel %vm508_vm1, %v3113_v22, 0.0  ;;  %v4379_v12 = vadd.f32 %v2917_v21, %v1865_v29 }
 0x1ff   : > { %v3167_v40 = vadd.f32 %v3166_v10, %v3165_v55  ;;  %3013 = vst.msk [vmem:[%s5771_s18 + $0xc8] sm:$0xff] %vm508_vm1, %v4378_v36  ;;  %v3066_v20 = vadd.f32 %v3065_v24, %v3064_v53  ;;  %v3116_v13 = vmul.f32 %v4378_v36, %v4378_v36  ;;  %v3069_v47 = vsel %vm508_vm1, %v4378_v36, 0.0 }
 0x200   : > { %v4145_v54 = vpop.f32.mrb[26].mxu1  ;;  %3012 = vst.msk [vmem:[%s5771_s18 + $0xc0] sm:$0xff] %vm508_vm1, %v4379_v12  ;;  %v3067_v39 = vsel %vm508_vm1, %v4379_v12, 0.0  ;;  %v3115_v41 = vmul.f32 %v4379_v12, %v4379_v12  ;;  %v4345_v17 = vpop.f32.mrb[26].mxu0 }
 0x201   : > { %v1875_v33 = vpop.f32.mrb[27].mxu1  ;;  %v3068_v48 = vadd.f32 %v3067_v39, %v3066_v20  ;;  %v3169_v61 = vadd.f32 %v3168_v19, %v3167_v40  ;;  %v4380_v5 = vadd.f32 %v4345_v17, %v4145_v54  ;;  %v2927_v11 = vpop.f32.mrb[27].mxu0  ;;  %v3172_v38 = vsel %vm508_vm1, %v3116_v13, 0.0 }
 0x202   : > { %v3170_v63 = vsel %vm508_vm1, %v3115_v41, 0.0  ;;  %v4381_v23 = vadd.f32 %v2927_v11, %v1875_v33 }
 0x203   : > { %v3171_v45 = vadd.f32 %v3170_v63, %v3169_v61  ;;  %3015 = vst.msk [vmem:[%s5771_s18 + $0xd8] sm:$0xff] %vm508_vm1, %v4380_v5  ;;  %v3070_v57 = vadd.f32 %v3069_v47, %v3068_v48  ;;  %v3118_v37 = vmul.f32 %v4380_v5, %v4380_v5  ;;  %v3073_v60 = vsel %vm508_vm1, %v4380_v5, 0.0 }
 0x204   : > { %v4148_v30 = vpop.f32.mrb[28].mxu1  ;;  %3014 = vst.msk [vmem:[%s5771_s18 + $0xd0] sm:$0xff] %vm508_vm1, %v4381_v23  ;;  %v3071_v62 = vsel %vm508_vm1, %v4381_v23, 0.0  ;;  %v3117_v4 = vmul.f32 %v4381_v23, %v4381_v23  ;;  %v4348_v35 = vpop.f32.mrb[28].mxu0 }
 0x205   : > { %v1885_v0 = vpop.f32.mrb[29].mxu1  ;;  %v3072_v44 = vadd.f32 %v3071_v62, %v3070_v57  ;;  %v3173_v27 = vadd.f32 %v3172_v38, %v3171_v45  ;;  %v4382_v2 = vadd.f32 %v4348_v35, %v4148_v30  ;;  %v2937_v34 = vpop.f32.mrb[29].mxu0  ;;  %v3176_v31 = vsel %vm508_vm1, %v3118_v37, 0.0 }
 0x206   : > { %v3174_v16 = vsel %vm508_vm1, %v3117_v4, 0.0  ;;  %v4383_v1 = vadd.f32 %v2937_v34, %v1885_v0 }
 0x207   : > { %v3175_v15 = vadd.f32 %v3174_v16, %v3173_v27  ;;  %3017 = vst.msk [vmem:[%s5771_s18 + $0xe8] sm:$0xff] %vm508_vm1, %v4382_v2  ;;  %v3074_v18 = vadd.f32 %v3073_v60, %v3072_v44  ;;  %v3120_v32 = vmul.f32 %v4382_v2, %v4382_v2  ;;  %v3077_v46 = vsel %vm508_vm1, %v4382_v2, 0.0 }
 0x208   : > { %v4151_v25 = vpop.f32.mrb[30].mxu1  ;;  %3016 = vst.msk [vmem:[%s5771_s18 + $0xe0] sm:$0xff] %vm508_vm1, %v4383_v1  ;;  %v3075_v42 = vsel %vm508_vm1, %v4383_v1, 0.0  ;;  %v3119_v43 = vmul.f32 %v4383_v1, %v4383_v1  ;;  %v4351_v49 = vpop.f32.mrb[30].mxu0 }
 0x209   : > { %v1895_v50 = vpop.f32.mrb[31].mxu1  ;;  %v3076_v52 = vadd.f32 %v3075_v42, %v3074_v18  ;;  %v3177_v26 = vadd.f32 %v3176_v31, %v3175_v15  ;;  %v4384_v51 = vadd.f32 %v4351_v49, %v4151_v25  ;;  %v2947_v56 = vpop.f32.mrb[31].mxu0  ;;  %v3180_v3 = vsel %vm508_vm1, %v3120_v32, 0.0 }
 0x20a   : > { %v3178_v9 = vsel %vm508_vm1, %v3119_v43, 0.0  ;;  %v4385_v6 = vadd.f32 %v2947_v56, %v1895_v50 }
 0x20b   : > { %v3179_v58 = vadd.f32 %v3178_v9, %v3177_v26  ;;  %3019 = vst.msk [vmem:[%s5771_s18 + $0xf8] sm:$0xff] %vm508_vm1, %v4384_v51  ;;  %v3078_v59 = vadd.f32 %v3077_v46, %v3076_v52  ;;  %v3122_v7 = vmul.f32 %v4384_v51, %v4384_v51  ;;  %v3081_v29 = vsel %vm508_vm1, %v4384_v51, 0.0 }
 0x20c   : > { %3018 = vst.msk [vmem:[%s5771_s18 + $0xf0] sm:$0xff] %vm508_vm1, %v4385_v6  ;;  %v3079_v8 = vsel %vm508_vm1, %v4385_v6, 0.0  ;;  %v3121_v14 = vmul.f32 %v4385_v6, %v4385_v6 }
 0x20d   : > { %v3080_v22 = vadd.f32 %v3079_v8, %v3078_v59  ;;  %v3181_v28 = vadd.f32 %v3180_v3, %v3179_v58  ;;  %v3184_v21 = vsel %vm508_vm1, %v3122_v7, 0.0 }
 0x20e   : > { %v3182_v53 = vsel %vm508_vm1, %v3121_v14, 0.0 }
 0x20f   : > { %v3082_v55 = vadd.f32 %v3081_v29, %v3080_v22  ;;  %v3183_v36 = vadd.f32 %v3182_v53, %v3181_v28 }
 0x211   : > { %v3083_v24 = vrot.slane %v3082_v55, 4  ;;  %v3185_v10 = vadd.f32 %v3184_v21, %v3183_v36 }
 0x213   : > { %v3084_v12 = vadd.f32 %v3083_v24, %v3082_v55  ;;  %v3186_v40 = vrot.slane %v3185_v10, 4 }
 0x215   : > { %v3085_v20 = vrot.slane %v3084_v12, 2  ;;  %v3187_v54 = vadd.f32 %v3186_v40, %v3185_v10 }
 0x217   : > { %v3086_v19 = vadd.f32 %v3085_v20, %v3084_v12  ;;  %v3188_v13 = vrot.slane %v3187_v54, 2 }
 0x219   : > { %v3087_v39 = vrot.slane %v3086_v19, 1  ;;  %v3189_v41 = vadd.f32 %v3188_v13, %v3187_v54 }
 0x21b   : > { %v3088_v17 = vadd.f32 %v3087_v39, %v3086_v19  ;;  %v3190_v33 = vrot.slane %v3189_v41, 1 }
 0x21d   : > { %3090 = vst.msk [vmem:[%s211_s21] sm:$0x1] %vm3089_vm3, %v3088_v17  ;;  %v3191_v48 = vadd.f32 %v3190_v33, %v3189_v41 }
 0x21f   : > { %3192 = vst.msk [vmem:[%s214_s24] sm:$0x1] %vm3089_vm3, %v3191_v48 }
 0x220 PF: > { %s15_s15 = sadd.s32 1, %s4625_s15  }
 0x221   : > { %p12_p4 = scmp.ge.s32.totalorder %s15_s15, 4  }
 0x223   :  { %14 = sbr.rel (!%p12_p4) target bundleno = 1 (0x1), region = 90 }

// kernel: resnet_block_forward.4
= control target key start
LH: loop header
LB: loop body
LE: loop exit
PB: predicated region body
PF: predicated region fallthrough
CT: control target
= control target key end

     0   :  { %s8763_s27 = smov 0   ;;  %s10945_s0 = inlined_call_operand.vmem [shape: f32[2,18,18,4], index: 0, kind: input, shape index: {}]   ;;  %s10946_s1 = inlined_call_operand.vmem [shape: f32[3,3,4,8], index: 1, kind: input, shape index: {}]   ;;  %s10947_s2 = inlined_call_operand.vmem [shape: f32[3,3,4,8], index: 2, kind: input, shape index: {}]   ;;  %s10948_s3 = inlined_call_operand.vmem [shape: f32[2,16,16,8], index: 3, kind: output, shape index: {0}]   ;;  %s10949_s4 = inlined_call_operand.vmem [shape: f32[2,1,8], index: 4, kind: output, shape index: {1}]   ;;  %s10950_s5 = inlined_call_operand.vmem [shape: f32[2,1,8], index: 5, kind: output, shape index: {2}]   ;;  %s10951_s6 = inlined_call_operand.vmem [shape: f32[2,16,16,8], index: 6, kind: output, shape index: {3}]   ;;  %s10952_s7 = inlined_call_operand.vmem [shape: f32[2,1,8], index: 7, kind: output, shape index: {4}]   ;;  %s10953_s8 = inlined_call_operand.vmem [shape: f32[2,1,8], index: 8, kind: output, shape index: {5}]  }
   0x1 LB: > { %s6043_s28 = sadd.s32 4294967295, %s8716_s27   ;;  %p6047_p0 = scmp.ge.s32.totalorder %s8716_s27, 1  ;;  %s8716_s27 = sphi %s8763_s27, %s19_s27  }
   0x2   : > { %p273_p1 = scmp.lt.s32.totalorder %s8716_s27, 3 }
   0x4   : > { %p274_p2 = pnand %p6047_p0, %p273_p1 }
   0x6   : > { %277 = sbr.rel (%p274_p2) target bundleno = 844 (0x34c), region = 32 }
   0xd   : > { %v6053_v0 = vld [vmem:[%s10946_s1 + $0x4] sm:$0xf]  ;;  %vm709_vm0 = vcmask 1043456   ;;  %p324_p3 = scmp.lt.s32.totalorder %s6043_s28, 1  ;;  %v641_v2 = vld [vmem:[%s10946_s1] sm:$0xf] }
   0xe   : > { %v6358_v1 = vld [vmem:[%s10947_s2 + $0x4] sm:$0xf]  ;;  %7261 = vmatprep.subr.msk.mxu0 %vm709_vm0, %v6053_v0  ;;  %v3358_v3 = vld [vmem:[%s10947_s2] sm:$0xf]  ;;  %vm453_vm1 = vcmask 1046528   ;;  %vm644_vm2 = vcmask 31744  }
   0xf   : > { %7711 = vmatprep.subr.msk.mxu1 %vm709_vm0, %v6358_v1  ;;  %7262 = vmatpush3.msk.msra.mxu0 %vm709_vm0, %v6053_v0  ;;  %s11111_s28 = smov (!%p324_p3, %s6043_s28), 1  ;;  %v8850_v26 = vld [vmem:[%s10946_s1 + $0x8] sm:$0xf]  ;;  %vm534_vm3 = vcmask 1045504   ;;  %vm3152_vm4 = vcmask 64512   ;;  %vm3254_vm5 = vcmask 57344  }
  0x10   : > { %7712 = vmatpush3.msk.msra.mxu1 %vm709_vm0, %v6358_v1  ;;  %7311 = vmatprep.subr.msk.mxu0 %vm709_vm0, %v641_v2  ;;  %s8673_s15 = smul.u32 432, %s11111_s28  ;;  %v8855_v27 = vld [vmem:[%s10947_s2 + $0x8] sm:$0xf]  ;;  %s336_s16 = scalar_lea.vmem %s10949_s4, %s11111_s28 }
  0x11   : > { %7761 = vmatprep.subr.msk.mxu1 %vm709_vm0, %v3358_v3  ;;  %s339_s20 = scalar_lea.vmem %s10950_s5, %s11111_s28  ;;  %s347_s23 = scalar_lea.vmem %s10952_s7, %s11111_s28 }
  0x12   : > { %s8795_s18 = scalar_lea.vmem %s10945_s0, %s8673_s15  ;;  %s350_s26 = scalar_lea.vmem %s10953_s8, %s11111_s28 }
  0x13   : > { %v8798_v4 = vld [vmem:[%s8795_s18] sm:$0xff]  ;;  %v8801_v5 = vld [vmem:[%s8795_s18 + $0x8] sm:$0xff]  ;;  %v8804_v6 = vld [vmem:[%s8795_s18 + $0x10] sm:$0x3] }
  0x14   : > { %v454_v7 = vrot.slane %v8798_v4, 1  ;;  %v455_v8 = vrot.slane %v8801_v5, 1  ;;  %v457_v9 = vrot.slane %v8804_v6, 1  ;;  %v8810_v10 = vld [vmem:[%s8795_s18 + $0x18] sm:$0xff]  ;;  %v8813_v11 = vld [vmem:[%s8795_s18 + $0x20] sm:$0xff]  ;;  %v8821_v15 = vld [vmem:[%s8795_s18 + $0x30] sm:$0xff] }
  0x15   : > { %v459_v12 = vrot.slane %v8810_v10, 1  ;;  %v460_v13 = vrot.slane %v8813_v11, 1  ;;  %v8818_v14 = vld [vmem:[%s8795_s18 + $0x28] sm:$0x3]  ;;  %v8824_v16 = vld [vmem:[%s8795_s18 + $0x38] sm:$0xff]  ;;  %v464_v20 = vrot.slane %v8821_v15, 1 }
  0x16   : > { %v456_v17 = vsel %vm453_vm1, %v454_v7, %v455_v8  ;;  %v458_v18 = vsel %vm453_vm1, %v455_v8, %v457_v9  ;;  %v462_v19 = vrot.slane %v8818_v14, 1  ;;  %v8831_v21 = vld [vmem:[%s8795_s18 + $0x40] sm:$0x3]  ;;  %v465_v23 = vrot.slane %v8824_v16, 1  ;;  %v8840_v24 = vld [vmem:[%s8795_s18 + $0x48] sm:$0xff]  ;;  %v8843_v25 = vld [vmem:[%s8795_s18 + $0x50] sm:$0xff] }
  0x17   : > { %7263 = vmatprep.mubr.msk.f32.mxu0 %vm644_vm2, %v456_v17  ;;  %7713 = vmatprep.mubr.msk.f32.mxu1 %vm644_vm2, %v456_v17  ;;  %v8836_v22 = vsel %vm453_vm1, %v459_v12, %v460_v13  ;;  %v467_v29 = vrot.slane %v8831_v21, 1  ;;  %v469_v31 = vrot.slane %v8840_v24, 1  ;;  %v470_v32 = vrot.slane %v8843_v25, 1  ;;  %v8873_v33 = vld [vmem:[%s8795_s18 + $0x58] sm:$0x3]  ;;  %v8876_v34 = vld [vmem:[%s8795_s18 + $0x60] sm:$0xff] }
  0x18   : > { %7264 = vmatmul.mubr.msk.f32.vlgmr.msra.gmra.mrb[0].mxu0 %vm644_vm2, %v458_v18  ;;  %7714 = vmatmul.mubr.msk.f32.vlgmr.msra.gmra.mrb[0].mxu1 %vm644_vm2, %v458_v18  ;;  %v8860_v28 = vsel %vm453_vm1, %v460_v13, %v462_v19  ;;  %v8868_v30 = vsel %vm453_vm1, %v464_v20, %v465_v23  ;;  %v8879_v35 = vld [vmem:[%s8795_s18 + $0x68] sm:$0xff]  ;;  %v472_v37 = vrot.slane %v8873_v33, 1  ;;  %v474_v39 = vrot.slane %v8876_v34, 1  ;;  %v8903_v41 = vld [vmem:[%s8795_s18 + $0x70] sm:$0x3]  ;;  %v8906_v42 = vld [vmem:[%s8795_s18 + $0x78] sm:$0xff] }
  0x19   : > { %7312 = vmatpush3.msk.msra.mxu0 %vm709_vm0, %v641_v2  ;;  %7762 = vmatpush3.msk.msra.mxu1 %vm709_vm0, %v3358_v3  ;;  %v8894_v36 = vsel %vm453_vm1, %v465_v23, %v467_v29  ;;  %v8898_v38 = vsel %vm453_vm1, %v469_v31, %v470_v32  ;;  %v475_v40 = vrot.slane %v8879_v35, 1  ;;  %v8909_v43 = vld [vmem:[%s8795_s18 + $0x80] sm:$0xff]  ;;  %v477_v45 = vrot.slane %v8903_v41, 1  ;;  %v8929_v49 = vld [vmem:[%s8795_s18 + $0x88] sm:$0x3]  ;;  %v8932_v50 = vld [vmem:[%s8795_s18 + $0x90] sm:$0xff] }
  0x1a   : > { %7266 = vmatprep.mubr.msk.f32.mxu0 %vm644_vm2, %v8836_v22  ;;  %7716 = vmatprep.mubr.msk.f32.mxu1 %vm644_vm2, %v8836_v22  ;;  %11032 = vst [vmem:[#allocation2_spill] sm:$0xff] %v8894_v36  ;;  %11033 = vst [vmem:[#allocation3_spill] sm:$0xff] %v8898_v38  ;;  %v8920_v44 = vsel %vm453_vm1, %v470_v32, %v472_v37  ;;  %v479_v47 = vrot.slane %v8906_v42, 1  ;;  %v480_v48 = vrot.slane %v8909_v43, 1  ;;  %v8935_v51 = vld [vmem:[%s8795_s18 + $0x98] sm:$0xff]  ;;  %v482_v53 = vrot.slane %v8929_v49, 1 }
  0x1b   : > { %7361 = vmatprep.subr.msk.mxu0 %vm709_vm0, %v8850_v26  ;;  %7811 = vmatprep.subr.msk.mxu1 %vm709_vm0, %v8855_v27  ;;  %11034 = vst [vmem:[#allocation4_spill] sm:$0xff] %v8920_v44  ;;  %v8924_v46 = vsel %vm453_vm1, %v474_v39, %v475_v40  ;;  %v8946_v52 = vsel %vm453_vm1, %v475_v40, %v477_v45  ;;  %v484_v55 = vrot.slane %v8932_v50, 1  ;;  %v485_v56 = vrot.slane %v8935_v51, 1  ;;  %v8955_v57 = vld [vmem:[%s8795_s18 + $0xa0] sm:$0x3]  ;;  %v8958_v58 = vld [vmem:[%s8795_s18 + $0xa8] sm:$0xff] }
  0x1c   : > { %7267 = vmatmul.mubr.msk.f32.gmra.mrb[2].mxu0 %vm644_vm2, %v8860_v28  ;;  %7717 = vmatmul.mubr.msk.f32.gmra.mrb[2].mxu1 %vm644_vm2, %v8860_v28  ;;  %11035 = vst [vmem:[#allocation5_spill] sm:$0xff] %v8924_v46  ;;  %11036 = vst [vmem:[#allocation6_spill] sm:$0xff] %v8946_v52  ;;  %v8950_v54 = vsel %vm453_vm1, %v479_v47, %v480_v48  ;;  %v8961_v59 = vld [vmem:[%s8795_s18 + $0xb0] sm:$0xff]  ;;  %v8972_v60 = vsel %vm453_vm1, %v480_v48, %v482_v53  ;;  %v487_v61 = vrot.slane %v8955_v57, 1  ;;  %v8981_v1 = vld [vmem:[%s8795_s18 + $0xb8] sm:$0x3] }
  0x1d   : > { %7269 = vmatprep.mubr.msk.f32.mxu0 %vm644_vm2, %v8868_v30  ;;  %7719 = vmatprep.mubr.msk.f32.mxu1 %vm644_vm2, %v8868_v30  ;;  %11037 = vst [vmem:[#allocation7_spill] sm:$0xff] %v8950_v54  ;;  %11038 = vst [vmem:[#allocation8_spill] sm:$0xff] %v8972_v60  ;;  %v8976_v62 = vsel %vm453_vm1, %v484_v55, %v485_v56  ;;  %v489_v63 = vrot.slane %v8958_v58, 1  ;;  %v490_v0 = vrot.slane %v8961_v59, 1  ;;  %v8984_v2 = vld [vmem:[%s8795_s18 + $0xc0] sm:$0xff]  ;;  %v8987_v3 = vld [vmem:[%s8795_s18 + $0xc8] sm:$0xff] }
  0x1e   : > { %11039 = vst [vmem:[#allocation9_spill] sm:$0xff] %v8976_v62  ;;  %v8998_v7 = vsel %vm453_vm1, %v485_v56, %v487_v61  ;;  %v492_v8 = vrot.slane %v8981_v1, 1  ;;  %v494_v12 = vrot.slane %v8984_v2, 1  ;;  %v495_v13 = vrot.slane %v8987_v3, 1  ;;  %v9007_v17 = vld [vmem:[%s8795_s18 + $0xd0] sm:$0x3] }
  0x1f   : > { %11040 = vst [vmem:[#allocation10_spill] sm:$0xff] %v8998_v7  ;;  %v9002_v9 = vsel %vm453_vm1, %v489_v63, %v490_v0  ;;  %v9010_v18 = vld [vmem:[%s8795_s18 + $0xd8] sm:$0xff]  ;;  %v9013_v19 = vld [vmem:[%s8795_s18 + $0xe0] sm:$0xff]  ;;  %v497_v23 = vrot.slane %v9007_v17, 1  ;;  %v9033_v37 = vld [vmem:[%s8795_s18 + $0xe8] sm:$0x3] }
  0x20   : > { %7270 = vmatmul.mubr.msk.f32.gmra.mrb[4].mxu0 %vm644_vm2, %v8894_v36  ;;  %7720 = vmatmul.mubr.msk.f32.gmra.mrb[4].mxu1 %vm644_vm2, %v8894_v36  ;;  %11041 = vst [vmem:[#allocation11_spill] sm:$0xff] %v9002_v9  ;;  %v9024_v20 = vsel %vm453_vm1, %v490_v0, %v492_v8  ;;  %v9028_v29 = vsel %vm453_vm1, %v494_v12, %v495_v13  ;;  %v499_v31 = vrot.slane %v9010_v18, 1  ;;  %v500_v32 = vrot.slane %v9013_v19, 1  ;;  %v9036_v39 = vld [vmem:[%s8795_s18 + $0xf0] sm:$0xff]  ;;  %v9039_v40 = vld [vmem:[%s8795_s18 + $0xf8] sm:$0xff]  ;;  %v9062_v61 = vld [vmem:[%s8795_s18 + $0x108] sm:$0xff] }
  0x21   : > { %7272 = vmatprep.mubr.msk.f32.mxu0 %vm644_vm2, %v8898_v38  ;;  %7722 = vmatprep.mubr.msk.f32.mxu1 %vm644_vm2, %v8898_v38  ;;  %11042 = vst [vmem:[#allocation12_spill] sm:$0xff] %v9024_v20  ;;  %11043 = vst [vmem:[#allocation13_spill] sm:$0xff] %v9028_v29  ;;  %v9050_v45 = vsel %vm453_vm1, %v495_v13, %v497_v23  ;;  %v502_v47 = vrot.slane %v9033_v37, 1  ;;  %v504_v53 = vrot.slane %v9036_v39, 1  ;;  %v505_v55 = vrot.slane %v9039_v40, 1  ;;  %v9065_v63 = vld [vmem:[%s8795_s18 + $0x110] sm:$0xff] }
  0x22   : > { %11044 = vst [vmem:[#allocation14_spill] sm:$0xff] %v9050_v45  ;;  %v9054_v48 = vsel %vm453_vm1, %v499_v31, %v500_v32  ;;  %v9059_v56 = vld [vmem:[%s8795_s18 + $0x100] sm:$0x3]  ;;  %v509_v13 = vrot.slane %v9062_v61, 1  ;;  %v510_v23 = vrot.slane %v9065_v63, 1 }
  0x23   : > { %11045 = vst [vmem:[#allocation15_spill] sm:$0xff] %v9054_v48  ;;  %v9076_v0 = vsel %vm453_vm1, %v500_v32, %v502_v47  ;;  %v507_v8 = vrot.slane %v9059_v56, 1  ;;  %v9080_v12 = vsel %vm453_vm1, %v504_v53, %v505_v55  ;;  %v9085_v31 = vld [vmem:[%s8795_s18 + $0x118] sm:$0x3] }
  0x24   : > { %7273 = vmatmul.mubr.msk.f32.gmra.mrb[6].mxu0 %vm644_vm2, %v8920_v44  ;;  %7723 = vmatmul.mubr.msk.f32.gmra.mrb[6].mxu1 %vm644_vm2, %v8920_v44  ;;  %11046 = vst [vmem:[#allocation16_spill] sm:$0xff] %v9076_v0  ;;  %11047 = vst [vmem:[#allocation17_spill] sm:$0xff] %v9080_v12  ;;  %v512_v47 = vrot.slane %v9085_v31, 1  ;;  %v9106_v53 = vsel %vm453_vm1, %v509_v13, %v510_v23  ;;  %v9169_v44 = vld [vmem:[%s8795_s18 + $0x170] sm:$0xff]  ;;  %v9189_v36 = vld [vmem:[%s8795_s18 + $0x178] sm:$0x3] }
  0x25   : > { %7275 = vmatprep.mubr.msk.f32.mxu0 %vm644_vm2, %v8924_v46  ;;  %7725 = vmatprep.mubr.msk.f32.mxu1 %vm644_vm2, %v8924_v46  ;;  %v9102_v32 = vsel %vm453_vm1, %v505_v55, %v507_v8  ;;  %11049 = vst [vmem:[#allocation19_spill] sm:$0xff] %v9106_v53  ;;  %v9166_v46 = vld [vmem:[%s8795_s18 + $0x168] sm:$0xff]  ;;  %v530_v38 = vrot.slane %v9169_v44, 1 }
  0x26   : > { %11048 = vst [vmem:[#allocation18_spill] sm:$0xff] %v9102_v32  ;;  %v9128_v55 = vsel %vm453_vm1, %v510_v23, %v512_v47 }
  0x27   : > { %11050 = vst [vmem:[#allocation20_spill] sm:$0xff] %v9128_v55 }
  0x28   : > { %7276 = vmatmul.mubr.msk.f32.gmra.mrb[8].mxu0 %vm644_vm2, %v8946_v52  ;;  %7726 = vmatmul.mubr.msk.f32.gmra.mrb[8].mxu1 %vm644_vm2, %v8946_v52 }
  0x29   : > { %7278 = vmatprep.mubr.msk.f32.mxu0 %vm644_vm2, %v8950_v54  ;;  %7728 = vmatprep.mubr.msk.f32.mxu1 %vm644_vm2, %v8950_v54 }
  0x2c   : > { %7279 = vmatmul.mubr.msk.f32.gmra.mrb[10].mxu0 %vm644_vm2, %v8972_v60  ;;  %7729 = vmatmul.mubr.msk.f32.gmra.mrb[10].mxu1 %vm644_vm2, %v8972_v60  ;;  %v9140_v60 = vld [vmem:[%s8795_s18 + $0x150] sm:$0xff] }
  0x2d   : > { %7281 = vmatprep.mubr.msk.f32.mxu0 %vm644_vm2, %v8976_v62  ;;  %7731 = vmatprep.mubr.msk.f32.mxu1 %vm644_vm2, %v8976_v62  ;;  %v9137_v62 = vld [vmem:[%s8795_s18 + $0x148] sm:$0x3]  ;;  %v524_v54 = vrot.slane %v9140_v60, 1 }
  0x2e   : > { %v522_v23 = vrot.slane %v9137_v62, 1 }
  0x30   : > { %7282 = vmatmul.mubr.msk.f32.gmra.mrb[12].mxu0 %vm644_vm2, %v8998_v7  ;;  %7732 = vmatmul.mubr.msk.f32.gmra.mrb[12].mxu1 %vm644_vm2, %v8998_v7 }
  0x31   : > { %7284 = vmatprep.mubr.msk.f32.mxu0 %vm644_vm2, %v9002_v9  ;;  %7734 = vmatprep.mubr.msk.f32.mxu1 %vm644_vm2, %v9002_v9  ;;  %v9114_v9 = vld [vmem:[%s8795_s18 + $0x138] sm:$0xff] }
  0x32   : > { %v519_v7 = vrot.slane %v9114_v9, 1 }
  0x34   : > { %7285 = vmatmul.mubr.msk.f32.gmra.mrb[14].mxu0 %vm644_vm2, %v9024_v20  ;;  %7735 = vmatmul.mubr.msk.f32.gmra.mrb[14].mxu1 %vm644_vm2, %v9024_v20  ;;  %v9111_v20 = vld [vmem:[%s8795_s18 + $0x130] sm:$0x3] }
  0x35   : > { %7287 = vmatprep.mubr.msk.f32.mxu0 %vm644_vm2, %v9028_v29  ;;  %7737 = vmatprep.mubr.msk.f32.mxu1 %vm644_vm2, %v9028_v29  ;;  %v517_v8 = vrot.slane %v9111_v20, 1 }
  0x38   : > { %7288 = vmatmul.mubr.msk.f32.gmra.mrb[16].mxu0 %vm644_vm2, %v9050_v45  ;;  %7738 = vmatmul.mubr.msk.f32.gmra.mrb[16].mxu1 %vm644_vm2, %v9050_v45  ;;  %v9088_v45 = vld [vmem:[%s8795_s18 + $0x120] sm:$0xff] }
  0x39   : > { %7290 = vmatprep.mubr.msk.f32.mxu0 %vm644_vm2, %v9054_v48  ;;  %7740 = vmatprep.mubr.msk.f32.mxu1 %vm644_vm2, %v9054_v48  ;;  %v9091_v48 = vld [vmem:[%s8795_s18 + $0x128] sm:$0xff]  ;;  %v514_v29 = vrot.slane %v9088_v45, 1 }
  0x3c   : > { %7291 = vmatmul.mubr.msk.f32.gmra.mrb[18].mxu0 %vm644_vm2, %v9076_v0  ;;  %7741 = vmatmul.mubr.msk.f32.gmra.mrb[18].mxu1 %vm644_vm2, %v9076_v0  ;;  %v515_v0 = vrot.slane %v9091_v48, 1 }
  0x3d   : > { %7293 = vmatprep.mubr.msk.f32.mxu0 %vm644_vm2, %v9080_v12  ;;  %7743 = vmatprep.mubr.msk.f32.mxu1 %vm644_vm2, %v9080_v12  ;;  %v9117_v12 = vld [vmem:[%s8795_s18 + $0x140] sm:$0xff] }
  0x3e   : > { %v9132_v13 = vsel %vm453_vm1, %v514_v29, %v515_v0  ;;  %v9154_v29 = vsel %vm453_vm1, %v515_v0, %v517_v8 }
  0x3f   : > { %11051 = vst [vmem:[#allocation21_spill] sm:$0xff] %v9132_v13 }
  0x40   : > { %7294 = vmatmul.mubr.msk.f32.gmra.mrb[20].mxu0 %vm644_vm2, %v9102_v32  ;;  %7744 = vmatmul.mubr.msk.f32.gmra.mrb[20].mxu1 %vm644_vm2, %v9102_v32  ;;  %v520_v32 = vrot.slane %v9117_v12, 1 }
  0x41   : > { %7296 = vmatprep.mubr.msk.f32.mxu0 %vm644_vm2, %v9106_v53  ;;  %7746 = vmatprep.mubr.msk.f32.mxu1 %vm644_vm2, %v9106_v53  ;;  %v9143_v53 = vld [vmem:[%s8795_s18 + $0x158] sm:$0xff] }
  0x42   : > { %v9158_v47 = vsel %vm453_vm1, %v519_v7, %v520_v32  ;;  %v525_v52 = vrot.slane %v9143_v53, 1  ;;  %v9180_v7 = vsel %vm453_vm1, %v520_v32, %v522_v23  ;;  %v532_v32 = vrot.slane %v9189_v36, 1 }
  0x44   : > { %7297 = vmatmul.mubr.msk.f32.gmra.mrb[22].mxu0 %vm644_vm2, %v9128_v55  ;;  %7747 = vmatmul.mubr.msk.f32.gmra.mrb[22].mxu1 %vm644_vm2, %v9128_v55  ;;  %v9163_v55 = vld [vmem:[%s8795_s18 + $0x160] sm:$0x3]  ;;  %v9184_v8 = vsel %vm453_vm1, %v524_v54, %v525_v52 }
  0x45   : > { %7299 = vmatprep.mubr.msk.f32.mxu0 %vm644_vm2, %v9132_v13  ;;  %7749 = vmatprep.mubr.msk.f32.mxu1 %vm644_vm2, %v9132_v13  ;;  %v527_v0 = vrot.slane %v9163_v55, 1  ;;  %11052 = vst [vmem:[#allocation22_spill] sm:$0xff] %v9184_v8  ;;  %v529_v13 = vrot.slane %v9166_v46, 1 }
  0x47   : > { %v9200_v54 = vsel %vm453_vm1, %v525_v52, %v527_v0  ;;  %v9204_v23 = vsel %vm453_vm1, %v529_v13, %v530_v38  ;;  %v9215_v52 = vsel %vm453_vm1, %v530_v38, %v532_v32  ;;  %v9232_v38 = vld [vmem:[%s10946_s1 + $0xc] sm:$0xf]  ;;  %v538_v0 = vrot.slane %v8804_v6, 2 }
  0x48   : > { %7300 = vmatmul.mubr.msk.f32.gmra.mrb[24].mxu0 %vm644_vm2, %v9154_v29  ;;  %7750 = vmatmul.mubr.msk.f32.gmra.mrb[24].mxu1 %vm644_vm2, %v9154_v29  ;;  %11053 = vst [vmem:[#allocation23_spill] sm:$0xff] %v9200_v54  ;;  %11054 = vst [vmem:[#allocation24_spill] sm:$0xff] %v9204_v23  ;;  %v9237_v13 = vld [vmem:[%s10947_s2 + $0xc] sm:$0xf] }
  0x49   : > { %7302 = vmatprep.mubr.msk.f32.mxu0 %vm644_vm2, %v9158_v47  ;;  %7752 = vmatprep.mubr.msk.f32.mxu1 %vm644_vm2, %v9158_v47  ;;  %11055 = vst [vmem:[#allocation25_spill] sm:$0xff] %v9215_v52 }
  0x4c   : > { %7303 = vmatmul.mubr.msk.f32.gmra.mrb[26].mxu0 %vm644_vm2, %v9180_v7  ;;  %7753 = vmatmul.mubr.msk.f32.gmra.mrb[26].mxu1 %vm644_vm2, %v9180_v7 }
  0x4d   : > { %7305 = vmatprep.mubr.msk.f32.mxu0 %vm644_vm2, %v9184_v8  ;;  %7755 = vmatprep.mubr.msk.f32.mxu1 %vm644_vm2, %v9184_v8  ;;  %v9387_v8 = vld [vmem:[%s10946_s1 + $0x10] sm:$0xf] }
  0x50   : > { %7306 = vmatmul.mubr.msk.f32.gmra.mrb[28].mxu0 %vm644_vm2, %v9200_v54  ;;  %7756 = vmatmul.mubr.msk.f32.gmra.mrb[28].mxu1 %vm644_vm2, %v9200_v54 }
  0x51   : > { %7308 = vmatprep.mubr.msk.f32.mxu0 %vm644_vm2, %v9204_v23  ;;  %7758 = vmatprep.mubr.msk.f32.mxu1 %vm644_vm2, %v9204_v23  ;;  %v546_v23 = vrot.slane %v8824_v16, 2 }
  0x54   : > { %7309 = vmatmul.mubr.msk.f32.gmra.mrb[30].mxu0 %vm644_vm2, %v9215_v52  ;;  %7759 = vmatmul.mubr.msk.f32.gmra.mrb[30].mxu1 %vm644_vm2, %v9215_v52  ;;  %v543_v52 = vrot.slane %v8818_v14, 2  ;;  %v9392_v14 = vld [vmem:[%s10947_s2 + $0x10] sm:$0xf] }
  0x55   : > { %7313 = vmatprep.mubr.msk.f32.mxu0 %vm644_vm2, %v8798_v4  ;;  %7763 = vmatprep.mubr.msk.f32.mxu1 %vm644_vm2, %v8798_v4 }
  0x58   : > { %7314 = vmatmul.mubr.msk.f32.vlgmr.msra.gmra.mrb[0].mxu0 %vm644_vm2, %v8801_v5  ;;  %7764 = vmatmul.mubr.msk.f32.vlgmr.msra.gmra.mrb[0].mxu1 %vm644_vm2, %v8801_v5 }
  0x59   : > { %7362 = vmatpush3.msk.msra.mxu0 %vm709_vm0, %v8850_v26  ;;  %7812 = vmatpush3.msk.msra.mxu1 %vm709_vm0, %v8855_v27  ;;  %v535_v26 = vrot.slane %v8798_v4, 2  ;;  %v536_v27 = vrot.slane %v8801_v5, 2  ;;  %v540_v4 = vrot.slane %v8810_v10, 2  ;;  %v541_v5 = vrot.slane %v8813_v11, 2 }
  0x5a   : > { %7316 = vmatprep.mubr.msk.f32.mxu0 %vm644_vm2, %v8810_v10  ;;  %7766 = vmatprep.mubr.msk.f32.mxu1 %vm644_vm2, %v8810_v10 }
  0x5b   : > { %7411 = vmatprep.subr.msk.mxu0 %vm709_vm0, %v9232_v38  ;;  %7861 = vmatprep.subr.msk.mxu1 %vm709_vm0, %v9237_v13  ;;  %v537_v32 = vsel %vm534_vm3, %v535_v26, %v536_v27  ;;  %v539_v6 = vsel %vm534_vm3, %v536_v27, %v538_v0  ;;  %v545_v26 = vrot.slane %v8821_v15, 2  ;;  %v9380_v54 = vsel %vm534_vm3, %v540_v4, %v541_v5 }
  0x5c   : > { %7317 = vmatmul.mubr.msk.f32.gmra.mrb[2].mxu0 %vm644_vm2, %v8813_v11  ;;  %7767 = vmatmul.mubr.msk.f32.gmra.mrb[2].mxu1 %vm644_vm2, %v8813_v11  ;;  %v9399_v27 = vsel %vm534_vm3, %v541_v5, %v543_v52  ;;  %v548_v0 = vrot.slane %v8831_v21, 2  ;;  %v550_v4 = vrot.slane %v8840_v24, 2  ;;  %v553_v52 = vrot.slane %v8873_v33, 2 }
  0x5d   : > { %7319 = vmatprep.mubr.msk.f32.mxu0 %vm644_vm2, %v8821_v15  ;;  %7769 = vmatprep.mubr.msk.f32.mxu1 %vm644_vm2, %v8821_v15  ;;  %v555_v5 = vrot.slane %v8876_v34, 2 }
  0x5e   : > { %v9424_v21 = vsel %vm534_vm3, %v546_v23, %v548_v0  ;;  %v560_v0 = vrot.slane %v8906_v42, 2 }
  0x60   : > { %7320 = vmatmul.mubr.msk.f32.gmra.mrb[4].mxu0 %vm644_vm2, %v8824_v16  ;;  %7770 = vmatmul.mubr.msk.f32.gmra.mrb[4].mxu1 %vm644_vm2, %v8824_v16 }
  0x61   : > { %7322 = vmatprep.mubr.msk.f32.mxu0 %vm644_vm2, %v8840_v24  ;;  %7772 = vmatprep.mubr.msk.f32.mxu1 %vm644_vm2, %v8840_v24 }
  0x64   : > { %7323 = vmatmul.mubr.msk.f32.gmra.mrb[6].mxu0 %vm644_vm2, %v8843_v25  ;;  %7773 = vmatmul.mubr.msk.f32.gmra.mrb[6].mxu1 %vm644_vm2, %v8843_v25 }
  0x65   : > { %7325 = vmatprep.mubr.msk.f32.mxu0 %vm644_vm2, %v8876_v34  ;;  %7775 = vmatprep.mubr.msk.f32.mxu1 %vm644_vm2, %v8876_v34 }
  0x68   : > { %7326 = vmatmul.mubr.msk.f32.gmra.mrb[8].mxu0 %vm644_vm2, %v8879_v35  ;;  %7776 = vmatmul.mubr.msk.f32.gmra.mrb[8].mxu1 %vm644_vm2, %v8879_v35 }
  0x69   : > { %7328 = vmatprep.mubr.msk.f32.mxu0 %vm644_vm2, %v8906_v42  ;;  %7778 = vmatprep.mubr.msk.f32.mxu1 %vm644_vm2, %v8906_v42 }
  0x6c   : > { %7329 = vmatmul.mubr.msk.f32.gmra.mrb[10].mxu0 %vm644_vm2, %v8909_v43  ;;  %7779 = vmatmul.mubr.msk.f32.gmra.mrb[10].mxu1 %vm644_vm2, %v8909_v43 }
  0x6d   : > { %7331 = vmatprep.mubr.msk.f32.mxu0 %vm644_vm2, %v8932_v50  ;;  %7781 = vmatprep.mubr.msk.f32.mxu1 %vm644_vm2, %v8932_v50 }
  0x70   : > { %7332 = vmatmul.mubr.msk.f32.gmra.mrb[12].mxu0 %vm644_vm2, %v8935_v51  ;;  %7782 = vmatmul.mubr.msk.f32.gmra.mrb[12].mxu1 %vm644_vm2, %v8935_v51 }
  0x71   : > { %7334 = vmatprep.mubr.msk.f32.mxu0 %vm644_vm2, %v8958_v58  ;;  %7784 = vmatprep.mubr.msk.f32.mxu1 %vm644_vm2, %v8958_v58 }
  0x74   : > { %7335 = vmatmul.mubr.msk.f32.gmra.mrb[14].mxu0 %vm644_vm2, %v8961_v59  ;;  %7785 = vmatmul.mubr.msk.f32.gmra.mrb[14].mxu1 %vm644_vm2, %v8961_v59 }
  0x75   : > { %7337 = vmatprep.mubr.msk.f32.mxu0 %vm644_vm2, %v8984_v2  ;;  %7787 = vmatprep.mubr.msk.f32.mxu1 %vm644_vm2, %v8984_v2 }
  0x78   : > { %7338 = vmatmul.mubr.msk.f32.gmra.mrb[16].mxu0 %vm644_vm2, %v8987_v3  ;;  %7788 = vmatmul.mubr.msk.f32.gmra.mrb[16].mxu1 %vm644_vm2, %v8987_v3 }
  0x79   : > { %7340 = vmatprep.mubr.msk.f32.mxu0 %vm644_vm2, %v9010_v18  ;;  %7790 = vmatprep.mubr.msk.f32.mxu1 %vm644_vm2, %v9010_v18 }
  0x7c   : > { %7341 = vmatmul.mubr.msk.f32.gmra.mrb[18].mxu0 %vm644_vm2, %v9013_v19  ;;  %7791 = vmatmul.mubr.msk.f32.gmra.mrb[18].mxu1 %vm644_vm2, %v9013_v19 }
  0x7d   : > { %7343 = vmatprep.mubr.msk.f32.mxu0 %vm644_vm2, %v9036_v39  ;;  %7793 = vmatprep.mubr.msk.f32.mxu1 %vm644_vm2, %v9036_v39 }
  0x80   : > { %7344 = vmatmul.mubr.msk.f32.gmra.mrb[20].mxu0 %vm644_vm2, %v9039_v40  ;;  %7794 = vmatmul.mubr.msk.f32.gmra.mrb[20].mxu1 %vm644_vm2, %v9039_v40 }
  0x81   : > { %7346 = vmatprep.mubr.msk.f32.mxu0 %vm644_vm2, %v9062_v61  ;;  %7796 = vmatprep.mubr.msk.f32.mxu1 %vm644_vm2, %v9062_v61 }
  0x84   : > { %7347 = vmatmul.mubr.msk.f32.gmra.mrb[22].mxu0 %vm644_vm2, %v9065_v63  ;;  %7797 = vmatmul.mubr.msk.f32.gmra.mrb[22].mxu1 %vm644_vm2, %v9065_v63 }
  0x85   : > { %7349 = vmatprep.mubr.msk.f32.mxu0 %vm644_vm2, %v9088_v45  ;;  %7799 = vmatprep.mubr.msk.f32.mxu1 %vm644_vm2, %v9088_v45 }
  0x88   : > { %7350 = vmatmul.mubr.msk.f32.gmra.mrb[24].mxu0 %vm644_vm2, %v9091_v48  ;;  %7800 = vmatmul.mubr.msk.f32.gmra.mrb[24].mxu1 %vm644_vm2, %v9091_v48 }
  0x89   : > { %7352 = vmatprep.mubr.msk.f32.mxu0 %vm644_vm2, %v9114_v9  ;;  %7802 = vmatprep.mubr.msk.f32.mxu1 %vm644_vm2, %v9114_v9 }
  0x8c   : > { %7353 = vmatmul.mubr.msk.f32.gmra.mrb[26].mxu0 %vm644_vm2, %v9117_v12  ;;  %7803 = vmatmul.mubr.msk.f32.gmra.mrb[26].mxu1 %vm644_vm2, %v9117_v12 }
  0x8d   : > { %7355 = vmatprep.mubr.msk.f32.mxu0 %vm644_vm2, %v9140_v60  ;;  %7805 = vmatprep.mubr.msk.f32.mxu1 %vm644_vm2, %v9140_v60 }
  0x90   : > { %7356 = vmatmul.mubr.msk.f32.gmra.mrb[28].mxu0 %vm644_vm2, %v9143_v53  ;;  %7806 = vmatmul.mubr.msk.f32.gmra.mrb[28].mxu1 %vm644_vm2, %v9143_v53 }
  0x91   : > { %7358 = vmatprep.mubr.msk.f32.mxu0 %vm644_vm2, %v9166_v46  ;;  %7808 = vmatprep.mubr.msk.f32.mxu1 %vm644_vm2, %v9166_v46 }
  0x94   : > { %7359 = vmatmul.mubr.msk.f32.gmra.mrb[30].mxu0 %vm644_vm2, %v9169_v44  ;;  %7809 = vmatmul.mubr.msk.f32.gmra.mrb[30].mxu1 %vm644_vm2, %v9169_v44 }
  0x95   : > { %7363 = vmatprep.mubr.msk.f32.mxu0 %vm644_vm2, %v537_v32  ;;  %7813 = vmatprep.mubr.msk.f32.mxu1 %vm644_vm2, %v537_v32  ;;  %v9407_v32 = vsel %vm534_vm3, %v545_v26, %v546_v23  ;;  %v558_v23 = vrot.slane %v8903_v41, 2 }
  0x98   : > { %7364 = vmatmul.mubr.msk.f32.vlgmr.msra.gmra.mrb[0].mxu0 %vm644_vm2, %v539_v6  ;;  %7814 = vmatmul.mubr.msk.f32.vlgmr.msra.gmra.mrb[0].mxu1 %vm644_vm2, %v539_v6  ;;  %v556_v6 = vrot.slane %v8879_v35, 2 }
  0x99   : > { %7412 = vmatpush3.msk.msra.mxu0 %vm709_vm0, %v9232_v38  ;;  %7862 = vmatpush3.msk.msra.mxu1 %vm709_vm0, %v9237_v13  ;;  %v551_v38 = vrot.slane %v8843_v25, 2 }
  0x9a   : > { %7366 = vmatprep.mubr.msk.f32.mxu0 %vm644_vm2, %v9380_v54  ;;  %7816 = vmatprep.mubr.msk.f32.mxu1 %vm644_vm2, %v9380_v54  ;;  %v9445_v26 = vsel %vm534_vm3, %v555_v5, %v556_v6  ;;  %v9458_v41 = vsel %vm534_vm3, %v556_v6, %v558_v23  ;;  %v565_v5 = vrot.slane %v8932_v50, 2  ;;  %v568_v6 = vrot.slane %v8955_v57, 2 }
  0x9b   : > { %7461 = vmatprep.subr.msk.mxu0 %vm709_vm0, %v9387_v8  ;;  %7911 = vmatprep.subr.msk.mxu1 %vm709_vm0, %v9392_v14  ;;  %v9428_v13 = vsel %vm534_vm3, %v550_v4, %v551_v38  ;;  %v9441_v33 = vsel %vm534_vm3, %v551_v38, %v553_v52  ;;  %11057 = vst [vmem:[#allocation27_spill] sm:$0xff] %v9445_v26  ;;  %v561_v4 = vrot.slane %v8909_v43, 2  ;;  %v563_v38 = vrot.slane %v8929_v49, 2 }
  0x9c   : > { %7367 = vmatmul.mubr.msk.f32.gmra.mrb[2].mxu0 %vm644_vm2, %v9399_v27  ;;  %7817 = vmatmul.mubr.msk.f32.gmra.mrb[2].mxu1 %vm644_vm2, %v9399_v27  ;;  %11056 = vst [vmem:[#allocation26_spill] sm:$0xff] %v9428_v13 }
  0x9d   : > { %7369 = vmatprep.mubr.msk.f32.mxu0 %vm644_vm2, %v9407_v32  ;;  %7819 = vmatprep.mubr.msk.f32.mxu1 %vm644_vm2, %v9407_v32  ;;  %v9462_v52 = vsel %vm534_vm3, %v560_v0, %v561_v4  ;;  %v9475_v49 = vsel %vm534_vm3, %v561_v4, %v563_v38  ;;  %v570_v0 = vrot.slane %v8958_v58, 2  ;;  %v573_v4 = vrot.slane %v8981_v1, 2 }
  0x9e   : > { %11058 = vst [vmem:[#allocation28_spill] sm:$0xff] %v9462_v52 }
  0xa0   : > { %7370 = vmatmul.mubr.msk.f32.gmra.mrb[4].mxu0 %vm644_vm2, %v9424_v21  ;;  %7820 = vmatmul.mubr.msk.f32.gmra.mrb[4].mxu1 %vm644_vm2, %v9424_v21 }
  0xa1   : > { %7372 = vmatprep.mubr.msk.f32.mxu0 %vm644_vm2, %v9428_v13  ;;  %7822 = vmatprep.mubr.msk.f32.mxu1 %vm644_vm2, %v9428_v13  ;;  %v566_v13 = vrot.slane %v8935_v51, 2 }
  0xa3   : > { %v9479_v23 = vsel %vm534_vm3, %v565_v5, %v566_v13  ;;  %v9492_v57 = vsel %vm534_vm3, %v566_v13, %v568_v6  ;;  %v575_v5 = vrot.slane %v8984_v2, 2  ;;  %v578_v13 = vrot.slane %v9007_v17, 2 }
  0xa4   : > { %7373 = vmatmul.mubr.msk.f32.gmra.mrb[6].mxu0 %vm644_vm2, %v9441_v33  ;;  %7823 = vmatmul.mubr.msk.f32.gmra.mrb[6].mxu1 %vm644_vm2, %v9441_v33  ;;  %11059 = vst [vmem:[#allocation29_spill] sm:$0xff] %v9479_v23 }
  0xa5   : > { %7375 = vmatprep.mubr.msk.f32.mxu0 %vm644_vm2, %v9445_v26  ;;  %7825 = vmatprep.mubr.msk.f32.mxu1 %vm644_vm2, %v9445_v26  ;;  %v571_v26 = vrot.slane %v8961_v59, 2 }
  0xa7   : > { %v9496_v38 = vsel %vm534_vm3, %v570_v0, %v571_v26  ;;  %v9509_v1 = vsel %vm534_vm3, %v571_v26, %v573_v4  ;;  %v580_v0 = vrot.slane %v9010_v18, 2  ;;  %v583_v26 = vrot.slane %v9033_v37, 2 }
  0xa8   : > { %7376 = vmatmul.mubr.msk.f32.gmra.mrb[8].mxu0 %vm644_vm2, %v9458_v41  ;;  %7826 = vmatmul.mubr.msk.f32.gmra.mrb[8].mxu1 %vm644_vm2, %v9458_v41  ;;  %11060 = vst [vmem:[#allocation30_spill] sm:$0xff] %v9496_v38 }
  0xa9   : > { %7378 = vmatprep.mubr.msk.f32.mxu0 %vm644_vm2, %v9462_v52  ;;  %7828 = vmatprep.mubr.msk.f32.mxu1 %vm644_vm2, %v9462_v52  ;;  %v576_v52 = vrot.slane %v8987_v3, 2 }
  0xab   : > { %v9513_v6 = vsel %vm534_vm3, %v575_v5, %v576_v52  ;;  %v9526_v17 = vsel %vm534_vm3, %v576_v52, %v578_v13  ;;  %v585_v5 = vrot.slane %v9036_v39, 2  ;;  %v588_v52 = vrot.slane %v9059_v56, 2 }
  0xac   : > { %7379 = vmatmul.mubr.msk.f32.gmra.mrb[10].mxu0 %vm644_vm2, %v9475_v49  ;;  %7829 = vmatmul.mubr.msk.f32.gmra.mrb[10].mxu1 %vm644_vm2, %v9475_v49  ;;  %11061 = vst [vmem:[#allocation31_spill] sm:$0xff] %v9513_v6 }
  0xad   : > { %7381 = vmatprep.mubr.msk.f32.mxu0 %vm644_vm2, %v9479_v23  ;;  %7831 = vmatprep.mubr.msk.f32.mxu1 %vm644_vm2, %v9479_v23  ;;  %v581_v23 = vrot.slane %v9013_v19, 2 }
  0xaf   : > { %v9530_v4 = vsel %vm534_vm3, %v580_v0, %v581_v23  ;;  %v9543_v37 = vsel %vm534_vm3, %v581_v23, %v583_v26  ;;  %v590_v0 = vrot.slane %v9062_v61, 2  ;;  %v593_v23 = vrot.slane %v9085_v31, 2 }
  0xb0   : > { %7382 = vmatmul.mubr.msk.f32.gmra.mrb[12].mxu0 %vm644_vm2, %v9492_v57  ;;  %7832 = vmatmul.mubr.msk.f32.gmra.mrb[12].mxu1 %vm644_vm2, %v9492_v57  ;;  %11062 = vst [vmem:[#allocation32_spill] sm:$0xff] %v9530_v4 }
  0xb1   : > { %7384 = vmatprep.mubr.msk.f32.mxu0 %vm644_vm2, %v9496_v38  ;;  %7834 = vmatprep.mubr.msk.f32.mxu1 %vm644_vm2, %v9496_v38  ;;  %v586_v38 = vrot.slane %v9039_v40, 2 }
  0xb3   : > { %v9547_v13 = vsel %vm534_vm3, %v585_v5, %v586_v38  ;;  %v9560_v56 = vsel %vm534_vm3, %v586_v38, %v588_v52  ;;  %v595_v5 = vrot.slane %v9088_v45, 2  ;;  %v598_v38 = vrot.slane %v9111_v20, 2 }
  0xb4   : > { %7385 = vmatmul.mubr.msk.f32.gmra.mrb[14].mxu0 %vm644_vm2, %v9509_v1  ;;  %7835 = vmatmul.mubr.msk.f32.gmra.mrb[14].mxu1 %vm644_vm2, %v9509_v1  ;;  %11063 = vst [vmem:[#allocation33_spill] sm:$0xff] %v9547_v13 }
  0xb5   : > { %7387 = vmatprep.mubr.msk.f32.mxu0 %vm644_vm2, %v9513_v6  ;;  %7837 = vmatprep.mubr.msk.f32.mxu1 %vm644_vm2, %v9513_v6  ;;  %v591_v6 = vrot.slane %v9065_v63, 2 }
  0xb7   : > { %v9564_v26 = vsel %vm534_vm3, %v590_v0, %v591_v6  ;;  %v9577_v31 = vsel %vm534_vm3, %v591_v6, %v593_v23  ;;  %v600_v0 = vrot.slane %v9114_v9, 2  ;;  %v603_v6 = vrot.slane %v9137_v62, 2 }
  0xb8   : > { %7388 = vmatmul.mubr.msk.f32.gmra.mrb[16].mxu0 %vm644_vm2, %v9526_v17  ;;  %7838 = vmatmul.mubr.msk.f32.gmra.mrb[16].mxu1 %vm644_vm2, %v9526_v17  ;;  %11064 = vst [vmem:[#allocation34_spill] sm:$0xff] %v9564_v26 }
  0xb9   : > { %7390 = vmatprep.mubr.msk.f32.mxu0 %vm644_vm2, %v9530_v4  ;;  %7840 = vmatprep.mubr.msk.f32.mxu1 %vm644_vm2, %v9530_v4  ;;  %v596_v4 = vrot.slane %v9091_v48, 2 }
  0xbb   : > { %v9581_v52 = vsel %vm534_vm3, %v595_v5, %v596_v4  ;;  %v9594_v20 = vsel %vm534_vm3, %v596_v4, %v598_v38  ;;  %v605_v5 = vrot.slane %v9140_v60, 2  ;;  %v608_v4 = vrot.slane %v9163_v55, 2 }
  0xbc   : > { %7391 = vmatmul.mubr.msk.f32.gmra.mrb[18].mxu0 %vm644_vm2, %v9543_v37  ;;  %7841 = vmatmul.mubr.msk.f32.gmra.mrb[18].mxu1 %vm644_vm2, %v9543_v37  ;;  %11065 = vst [vmem:[#allocation35_spill] sm:$0xff] %v9581_v52  ;;  %11066 = vst [vmem:[#allocation36_spill] sm:$0xff] %v9594_v20 }
  0xbd   : > { %7393 = vmatprep.mubr.msk.f32.mxu0 %vm644_vm2, %v9547_v13  ;;  %7843 = vmatprep.mubr.msk.f32.mxu1 %vm644_vm2, %v9547_v13  ;;  %v601_v13 = vrot.slane %v9117_v12, 2 }
  0xbf   : > { %v9598_v23 = vsel %vm534_vm3, %v600_v0, %v601_v13  ;;  %v9611_v62 = vsel %vm534_vm3, %v601_v13, %v603_v6  ;;  %v610_v0 = vrot.slane %v9166_v46, 2  ;;  %v613_v13 = vrot.slane %v9189_v36, 2  ;;  %v9660_v36 = vld [vmem:[%s10946_s1 + $0x14] sm:$0xf] }
  0xc0   : > { %7394 = vmatmul.mubr.msk.f32.gmra.mrb[20].mxu0 %vm644_vm2, %v9560_v56  ;;  %7844 = vmatmul.mubr.msk.f32.gmra.mrb[20].mxu1 %vm644_vm2, %v9560_v56  ;;  %11067 = vst [vmem:[#allocation37_spill] sm:$0xff] %v9611_v62 }
  0xc1   : > { %7396 = vmatprep.mubr.msk.f32.mxu0 %vm644_vm2, %v9564_v26  ;;  %7846 = vmatprep.mubr.msk.f32.mxu1 %vm644_vm2, %v9564_v26  ;;  %v606_v26 = vrot.slane %v9143_v53, 2 }
  0xc3   : > { %v9615_v38 = vsel %vm534_vm3, %v605_v5, %v606_v26  ;;  %v9628_v55 = vsel %vm534_vm3, %v606_v26, %v608_v4  ;;  %v9970_v5 = vld [vmem:[%s10946_s1 + $0x1c] sm:$0xf] }
  0xc4   : > { %7397 = vmatmul.mubr.msk.f32.gmra.mrb[22].mxu0 %vm644_vm2, %v9577_v31  ;;  %7847 = vmatmul.mubr.msk.f32.gmra.mrb[22].mxu1 %vm644_vm2, %v9577_v31  ;;  %11068 = vst [vmem:[#allocation38_spill] sm:$0xff] %v9615_v38  ;;  %v9975_v4 = vld [vmem:[%s10947_s2 + $0x1c] sm:$0xf] }
  0xc5   : > { %7399 = vmatprep.mubr.msk.f32.mxu0 %vm644_vm2, %v9581_v52  ;;  %7849 = vmatprep.mubr.msk.f32.mxu1 %vm644_vm2, %v9581_v52  ;;  %v611_v52 = vrot.slane %v9169_v44, 2 }
  0xc7   : > { %v9632_v6 = vsel %vm534_vm3, %v610_v0, %v611_v52  ;;  %v9643_v26 = vsel %vm534_vm3, %v611_v52, %v613_v13  ;;  %v9665_v52 = vld [vmem:[%s10947_s2 + $0x14] sm:$0xf]  ;;  %v11097_v13 = vld [vmem:[#allocation29_spill] sm:$0xff] }
  0xc8   : > { %7400 = vmatmul.mubr.msk.f32.gmra.mrb[24].mxu0 %vm644_vm2, %v9594_v20  ;;  %7850 = vmatmul.mubr.msk.f32.gmra.mrb[24].mxu1 %vm644_vm2, %v9594_v20  ;;  %11069 = vst [vmem:[#allocation39_spill] sm:$0xff] %v9632_v6  ;;  %v11096_v0 = vld [vmem:[#allocation28_spill] sm:$0xff] }
  0xc9   : > { %7402 = vmatprep.mubr.msk.f32.mxu0 %vm644_vm2, %v9598_v23  ;;  %7852 = vmatprep.mubr.msk.f32.mxu1 %vm644_vm2, %v9598_v23 }
  0xcc   : > { %7403 = vmatmul.mubr.msk.f32.gmra.mrb[26].mxu0 %vm644_vm2, %v9611_v62  ;;  %7853 = vmatmul.mubr.msk.f32.gmra.mrb[26].mxu1 %vm644_vm2, %v9611_v62 }
  0xcd   : > { %7405 = vmatprep.mubr.msk.f32.mxu0 %vm644_vm2, %v9615_v38  ;;  %7855 = vmatprep.mubr.msk.f32.mxu1 %vm644_vm2, %v9615_v38 }
  0xd0   : > { %7406 = vmatmul.mubr.msk.f32.gmra.mrb[28].mxu0 %vm644_vm2, %v9628_v55  ;;  %7856 = vmatmul.mubr.msk.f32.gmra.mrb[28].mxu1 %vm644_vm2, %v9628_v55 }
  0xd1   : > { %7408 = vmatprep.mubr.msk.f32.mxu0 %vm644_vm2, %v9632_v6  ;;  %7858 = vmatprep.mubr.msk.f32.mxu1 %vm644_vm2, %v9632_v6 }
  0xd4   : > { %7409 = vmatmul.mubr.msk.f32.gmra.mrb[30].mxu0 %vm644_vm2, %v9643_v26  ;;  %7859 = vmatmul.mubr.msk.f32.gmra.mrb[30].mxu1 %vm644_vm2, %v9643_v26 }
  0xd5   : > { %7413 = vmatprep.mubr.msk.f32.mxu0 %vm644_vm2, %v8810_v10  ;;  %7863 = vmatprep.mubr.msk.f32.mxu1 %vm644_vm2, %v8810_v10  ;;  %v9784_v10 = vld [vmem:[%s8795_s18 + $0x180] sm:$0xff] }
  0xd8   : > { %7414 = vmatmul.mubr.msk.f32.vlgmr.msra.gmra.mrb[0].mxu0 %vm644_vm2, %v8813_v11  ;;  %7864 = vmatmul.mubr.msk.f32.vlgmr.msra.gmra.mrb[0].mxu1 %vm644_vm2, %v8813_v11  ;;  %v9795_v11 = vld [vmem:[%s8795_s18 + $0x188] sm:$0xff] }
  0xd9   : > { %7462 = vmatpush3.msk.msra.mxu0 %vm709_vm0, %v9387_v8  ;;  %7912 = vmatpush3.msk.msra.mxu1 %vm709_vm0, %v9392_v14  ;;  %v11093_v8 = vld [vmem:[#allocation25_spill] sm:$0xff] }
  0xda   : > { %7416 = vmatprep.mubr.msk.f32.mxu0 %vm644_vm2, %v8821_v15  ;;  %7866 = vmatprep.mubr.msk.f32.mxu1 %vm644_vm2, %v8821_v15  ;;  %v9812_v15 = vld [vmem:[%s10946_s1 + $0x18] sm:$0xf] }
  0xdb   : > { %7511 = vmatprep.subr.msk.mxu0 %vm709_vm0, %v9660_v36  ;;  %7961 = vmatprep.subr.msk.mxu1 %vm709_vm0, %v9665_v52 }
  0xdc   : > { %7417 = vmatmul.mubr.msk.f32.gmra.mrb[2].mxu0 %vm644_vm2, %v8824_v16  ;;  %7867 = vmatmul.mubr.msk.f32.gmra.mrb[2].mxu1 %vm644_vm2, %v8824_v16  ;;  %v9817_v16 = vld [vmem:[%s10947_s2 + $0x18] sm:$0xf] }
  0xdd   : > { %7419 = vmatprep.mubr.msk.f32.mxu0 %vm644_vm2, %v8840_v24  ;;  %7869 = vmatprep.mubr.msk.f32.mxu1 %vm644_vm2, %v8840_v24  ;;  %v11071_v24 = vld [vmem:[#allocation3_spill] sm:$0xff] }
  0xe0   : > { %7420 = vmatmul.mubr.msk.f32.gmra.mrb[4].mxu0 %vm644_vm2, %v8843_v25  ;;  %7870 = vmatmul.mubr.msk.f32.gmra.mrb[4].mxu1 %vm644_vm2, %v8843_v25  ;;  %v11072_v25 = vld [vmem:[#allocation4_spill] sm:$0xff] }
  0xe1   : > { %7422 = vmatprep.mubr.msk.f32.mxu0 %vm644_vm2, %v8876_v34  ;;  %7872 = vmatprep.mubr.msk.f32.mxu1 %vm644_vm2, %v8876_v34  ;;  %v11074_v34 = vld [vmem:[#allocation6_spill] sm:$0xff] }
  0xe4   : > { %7423 = vmatmul.mubr.msk.f32.gmra.mrb[6].mxu0 %vm644_vm2, %v8879_v35  ;;  %7873 = vmatmul.mubr.msk.f32.gmra.mrb[6].mxu1 %vm644_vm2, %v8879_v35  ;;  %v11075_v35 = vld [vmem:[#allocation7_spill] sm:$0xff] }
  0xe5   : > { %7425 = vmatprep.mubr.msk.f32.mxu0 %vm644_vm2, %v8906_v42  ;;  %7875 = vmatprep.mubr.msk.f32.mxu1 %vm644_vm2, %v8906_v42  ;;  %v11076_v42 = vld [vmem:[#allocation8_spill] sm:$0xff] }
  0xe8   : > { %7426 = vmatmul.mubr.msk.f32.gmra.mrb[8].mxu0 %vm644_vm2, %v8909_v43  ;;  %7876 = vmatmul.mubr.msk.f32.gmra.mrb[8].mxu1 %vm644_vm2, %v8909_v43  ;;  %v11077_v43 = vld [vmem:[#allocation9_spill] sm:$0xff] }
  0xe9   : > { %7428 = vmatprep.mubr.msk.f32.mxu0 %vm644_vm2, %v8932_v50  ;;  %7878 = vmatprep.mubr.msk.f32.mxu1 %vm644_vm2, %v8932_v50  ;;  %v11080_v50 = vld [vmem:[#allocation12_spill] sm:$0xff] }
  0xec   : > { %7429 = vmatmul.mubr.msk.f32.gmra.mrb[10].mxu0 %vm644_vm2, %v8935_v51  ;;  %7879 = vmatmul.mubr.msk.f32.gmra.mrb[10].mxu1 %vm644_vm2, %v8935_v51  ;;  %v11081_v51 = vld [vmem:[#allocation13_spill] sm:$0xff] }
  0xed   : > { %7431 = vmatprep.mubr.msk.f32.mxu0 %vm644_vm2, %v8958_v58  ;;  %7881 = vmatprep.mubr.msk.f32.mxu1 %vm644_vm2, %v8958_v58  ;;  %v11082_v58 = vld [vmem:[#allocation14_spill] sm:$0xff] }
  0xf0   : > { %7432 = vmatmul.mubr.msk.f32.gmra.mrb[12].mxu0 %vm644_vm2, %v8961_v59  ;;  %7882 = vmatmul.mubr.msk.f32.gmra.mrb[12].mxu1 %vm644_vm2, %v8961_v59  ;;  %v11083_v59 = vld [vmem:[#allocation15_spill] sm:$0xff] }
  0xf1   : > { %7434 = vmatprep.mubr.msk.f32.mxu0 %vm644_vm2, %v8984_v2  ;;  %7884 = vmatprep.mubr.msk.f32.mxu1 %vm644_vm2, %v8984_v2  ;;  %v11085_v2 = vld [vmem:[#allocation17_spill] sm:$0xff] }
  0xf4   : > { %7435 = vmatmul.mubr.msk.f32.gmra.mrb[14].mxu0 %vm644_vm2, %v8987_v3  ;;  %7885 = vmatmul.mubr.msk.f32.gmra.mrb[14].mxu1 %vm644_vm2, %v8987_v3  ;;  %v11086_v3 = vld [vmem:[#allocation18_spill] sm:$0xff] }
  0xf5   : > { %7437 = vmatprep.mubr.msk.f32.mxu0 %vm644_vm2, %v9010_v18  ;;  %7887 = vmatprep.mubr.msk.f32.mxu1 %vm644_vm2, %v9010_v18  ;;  %v11088_v18 = vld [vmem:[#allocation20_spill] sm:$0xff] }
  0xf8   : > { %7438 = vmatmul.mubr.msk.f32.gmra.mrb[16].mxu0 %vm644_vm2, %v9013_v19  ;;  %7888 = vmatmul.mubr.msk.f32.gmra.mrb[16].mxu1 %vm644_vm2, %v9013_v19  ;;  %v11089_v19 = vld [vmem:[#allocation21_spill] sm:$0xff] }
  0xf9   : > { %7440 = vmatprep.mubr.msk.f32.mxu0 %vm644_vm2, %v9036_v39  ;;  %7890 = vmatprep.mubr.msk.f32.mxu1 %vm644_vm2, %v9036_v39  ;;  %v11090_v39 = vld [vmem:[#allocation22_spill] sm:$0xff] }
  0xfc   : > { %7441 = vmatmul.mubr.msk.f32.gmra.mrb[18].mxu0 %vm644_vm2, %v9039_v40  ;;  %7891 = vmatmul.mubr.msk.f32.gmra.mrb[18].mxu1 %vm644_vm2, %v9039_v40  ;;  %v618_v40 = vrot.slane %v9784_v10, 1 }
  0xfd   : > { %7443 = vmatprep.mubr.msk.f32.mxu0 %vm644_vm2, %v9062_v61  ;;  %7893 = vmatprep.mubr.msk.f32.mxu1 %vm644_vm2, %v9062_v61  ;;  %v11091_v61 = vld [vmem:[#allocation23_spill] sm:$0xff] }
 0x100   : > { %7444 = vmatmul.mubr.msk.f32.gmra.mrb[20].mxu0 %vm644_vm2, %v9065_v63  ;;  %7894 = vmatmul.mubr.msk.f32.gmra.mrb[20].mxu1 %vm644_vm2, %v9065_v63  ;;  %v11092_v63 = vld [vmem:[#allocation24_spill] sm:$0xff] }
 0x101   : > { %7446 = vmatprep.mubr.msk.f32.mxu0 %vm644_vm2, %v9088_v45  ;;  %7896 = vmatprep.mubr.msk.f32.mxu1 %vm644_vm2, %v9088_v45  ;;  %v619_v45 = vrot.slane %v9795_v11, 1 }
 0x104   : > { %7447 = vmatmul.mubr.msk.f32.gmra.mrb[22].mxu0 %vm644_vm2, %v9091_v48  ;;  %7897 = vmatmul.mubr.msk.f32.gmra.mrb[22].mxu1 %vm644_vm2, %v9091_v48  ;;  %v9930_v48 = vld [vmem:[%s8795_s18 + $0x190] sm:$0x3] }
 0x105   : > { %7449 = vmatprep.mubr.msk.f32.mxu0 %vm644_vm2, %v9114_v9  ;;  %7899 = vmatprep.mubr.msk.f32.mxu1 %vm644_vm2, %v9114_v9  ;;  %v11087_v9 = vld [vmem:[#allocation19_spill] sm:$0xff] }
 0x108   : > { %7450 = vmatmul.mubr.msk.f32.gmra.mrb[24].mxu0 %vm644_vm2, %v9117_v12  ;;  %7900 = vmatmul.mubr.msk.f32.gmra.mrb[24].mxu1 %vm644_vm2, %v9117_v12  ;;  %v621_v12 = vrot.slane %v9930_v48, 1 }
 0x109   : > { %7452 = vmatprep.mubr.msk.f32.mxu0 %vm644_vm2, %v9140_v60  ;;  %7902 = vmatprep.mubr.msk.f32.mxu1 %vm644_vm2, %v9140_v60  ;;  %v11084_v60 = vld [vmem:[#allocation16_spill] sm:$0xff] }
 0x10a   : > { %v9953_v14 = vsel %vm453_vm1, %v619_v45, %v621_v12  ;;  %v623_v12 = vrot.slane %v9784_v10, 2 }
 0x10c   : > { %7453 = vmatmul.mubr.msk.f32.gmra.mrb[26].mxu0 %vm644_vm2, %v9143_v53  ;;  %7903 = vmatmul.mubr.msk.f32.gmra.mrb[26].mxu1 %vm644_vm2, %v9143_v53  ;;  %v9942_v53 = vsel %vm453_vm1, %v618_v40, %v619_v45  ;;  %v11102_v40 = vld [vmem:[#allocation34_spill] sm:$0xff]  ;;  %v11103_v45 = vld [vmem:[#allocation35_spill] sm:$0xff] }
 0x10d   : > { %7455 = vmatprep.mubr.msk.f32.mxu0 %vm644_vm2, %v9166_v46  ;;  %7905 = vmatprep.mubr.msk.f32.mxu1 %vm644_vm2, %v9166_v46  ;;  %v11079_v46 = vld [vmem:[#allocation11_spill] sm:$0xff] }
 0x110   : > { %7456 = vmatmul.mubr.msk.f32.gmra.mrb[28].mxu0 %vm644_vm2, %v9169_v44  ;;  %7906 = vmatmul.mubr.msk.f32.gmra.mrb[28].mxu1 %vm644_vm2, %v9169_v44  ;;  %v11078_v44 = vld [vmem:[#allocation10_spill] sm:$0xff] }
 0x111   : > { %7458 = vmatprep.mubr.msk.f32.mxu0 %vm644_vm2, %v9784_v10  ;;  %7908 = vmatprep.mubr.msk.f32.mxu1 %vm644_vm2, %v9784_v10 }
 0x114   : > { %7459 = vmatmul.mubr.msk.f32.gmra.mrb[30].mxu0 %vm644_vm2, %v9795_v11  ;;  %7909 = vmatmul.mubr.msk.f32.gmra.mrb[30].mxu1 %vm644_vm2, %v9795_v11 }
 0x115   : > { %7463 = vmatprep.mubr.msk.f32.mxu0 %vm644_vm2, %v8836_v22  ;;  %7913 = vmatprep.mubr.msk.f32.mxu1 %vm644_vm2, %v8836_v22  ;;  %v11070_v22 = vld [vmem:[#allocation2_spill] sm:$0xff] }
 0x118   : > { %7464 = vmatmul.mubr.msk.f32.vlgmr.msra.gmra.mrb[0].mxu0 %vm644_vm2, %v8860_v28  ;;  %7914 = vmatmul.mubr.msk.f32.vlgmr.msra.gmra.mrb[0].mxu1 %vm644_vm2, %v8860_v28  ;;  %v11073_v28 = vld [vmem:[#allocation5_spill] sm:$0xff] }
 0x119   : > { %7512 = vmatpush3.msk.msra.mxu0 %vm709_vm0, %v9660_v36  ;;  %7962 = vmatpush3.msk.msra.mxu1 %vm709_vm0, %v9665_v52  ;;  %v11098_v36 = vld [vmem:[#allocation30_spill] sm:$0xff]  ;;  %v11099_v52 = vld [vmem:[#allocation31_spill] sm:$0xff] }
 0x11a   : > { %7466 = vmatprep.mubr.msk.f32.mxu0 %vm644_vm2, %v8868_v30  ;;  %7916 = vmatprep.mubr.msk.f32.mxu1 %vm644_vm2, %v8868_v30 }
 0x11b   : > { %7561 = vmatprep.subr.msk.mxu0 %vm709_vm0, %v9812_v15  ;;  %8011 = vmatprep.subr.msk.mxu1 %vm709_vm0, %v9817_v16 }
 0x11c   : > { %7467 = vmatmul.mubr.msk.f32.gmra.mrb[2].mxu0 %vm644_vm2, %v11070_v22  ;;  %7917 = vmatmul.mubr.msk.f32.gmra.mrb[2].mxu1 %vm644_vm2, %v11070_v22 }
 0x11d   : > { %7469 = vmatprep.mubr.msk.f32.mxu0 %vm644_vm2, %v11071_v24  ;;  %7919 = vmatprep.mubr.msk.f32.mxu1 %vm644_vm2, %v11071_v24 }
 0x120   : > { %7470 = vmatmul.mubr.msk.f32.gmra.mrb[4].mxu0 %vm644_vm2, %v11072_v25  ;;  %7920 = vmatmul.mubr.msk.f32.gmra.mrb[4].mxu1 %vm644_vm2, %v11072_v25 }
 0x121   : > { %7472 = vmatprep.mubr.msk.f32.mxu0 %vm644_vm2, %v11073_v28  ;;  %7922 = vmatprep.mubr.msk.f32.mxu1 %vm644_vm2, %v11073_v28 }
 0x124   : > { %7473 = vmatmul.mubr.msk.f32.gmra.mrb[6].mxu0 %vm644_vm2, %v11074_v34  ;;  %7923 = vmatmul.mubr.msk.f32.gmra.mrb[6].mxu1 %vm644_vm2, %v11074_v34 }
 0x125   : > { %7475 = vmatprep.mubr.msk.f32.mxu0 %vm644_vm2, %v11075_v35  ;;  %7925 = vmatprep.mubr.msk.f32.mxu1 %vm644_vm2, %v11075_v35 }
 0x128   : > { %7476 = vmatmul.mubr.msk.f32.gmra.mrb[8].mxu0 %vm644_vm2, %v11076_v42  ;;  %7926 = vmatmul.mubr.msk.f32.gmra.mrb[8].mxu1 %vm644_vm2, %v11076_v42 }
 0x129   : > { %7478 = vmatprep.mubr.msk.f32.mxu0 %vm644_vm2, %v11077_v43  ;;  %7928 = vmatprep.mubr.msk.f32.mxu1 %vm644_vm2, %v11077_v43 }
 0x12c   : > { %7479 = vmatmul.mubr.msk.f32.gmra.mrb[10].mxu0 %vm644_vm2, %v11078_v44  ;;  %7929 = vmatmul.mubr.msk.f32.gmra.mrb[10].mxu1 %vm644_vm2, %v11078_v44 }
 0x12d   : > { %7481 = vmatprep.mubr.msk.f32.mxu0 %vm644_vm2, %v11079_v46  ;;  %7931 = vmatprep.mubr.msk.f32.mxu1 %vm644_vm2, %v11079_v46 }
 0x130   : > { %7482 = vmatmul.mubr.msk.f32.gmra.mrb[12].mxu0 %vm644_vm2, %v11080_v50  ;;  %7932 = vmatmul.mubr.msk.f32.gmra.mrb[12].mxu1 %vm644_vm2, %v11080_v50 }
 0x131   : > { %7484 = vmatprep.mubr.msk.f32.mxu0 %vm644_vm2, %v11081_v51  ;;  %7934 = vmatprep.mubr.msk.f32.mxu1 %vm644_vm2, %v11081_v51 }
 0x134   : > { %7485 = vmatmul.mubr.msk.f32.gmra.mrb[14].mxu0 %vm644_vm2, %v11082_v58  ;;  %7935 = vmatmul.mubr.msk.f32.gmra.mrb[14].mxu1 %vm644_vm2, %v11082_v58 }
 0x135   : > { %7487 = vmatprep.mubr.msk.f32.mxu0 %vm644_vm2, %v11083_v59  ;;  %7937 = vmatprep.mubr.msk.f32.mxu1 %vm644_vm2, %v11083_v59 }
 0x138   : > { %7488 = vmatmul.mubr.msk.f32.gmra.mrb[16].mxu0 %vm644_vm2, %v11084_v60  ;;  %7938 = vmatmul.mubr.msk.f32.gmra.mrb[16].mxu1 %vm644_vm2, %v11084_v60 }
 0x139   : > { %7490 = vmatprep.mubr.msk.f32.mxu0 %vm644_vm2, %v11085_v2  ;;  %7940 = vmatprep.mubr.msk.f32.mxu1 %vm644_vm2, %v11085_v2 }
 0x13c   : > { %7491 = vmatmul.mubr.msk.f32.gmra.mrb[18].mxu0 %vm644_vm2, %v11086_v3  ;;  %7941 = vmatmul.mubr.msk.f32.gmra.mrb[18].mxu1 %vm644_vm2, %v11086_v3 }
 0x13d   : > { %7493 = vmatprep.mubr.msk.f32.mxu0 %vm644_vm2, %v11087_v9  ;;  %7943 = vmatprep.mubr.msk.f32.mxu1 %vm644_vm2, %v11087_v9 }
 0x140   : > { %7494 = vmatmul.mubr.msk.f32.gmra.mrb[20].mxu0 %vm644_vm2, %v11088_v18  ;;  %7944 = vmatmul.mubr.msk.f32.gmra.mrb[20].mxu1 %vm644_vm2, %v11088_v18 }
 0x141   : > { %7496 = vmatprep.mubr.msk.f32.mxu0 %vm644_vm2, %v11089_v19  ;;  %7946 = vmatprep.mubr.msk.f32.mxu1 %vm644_vm2, %v11089_v19 }
 0x144   : > { %7497 = vmatmul.mubr.msk.f32.gmra.mrb[22].mxu0 %vm644_vm2, %v9154_v29  ;;  %7947 = vmatmul.mubr.msk.f32.gmra.mrb[22].mxu1 %vm644_vm2, %v9154_v29 }
 0x145   : > { %7499 = vmatprep.mubr.msk.f32.mxu0 %vm644_vm2, %v9158_v47  ;;  %7949 = vmatprep.mubr.msk.f32.mxu1 %vm644_vm2, %v9158_v47 }
 0x148   : > { %7500 = vmatmul.mubr.msk.f32.gmra.mrb[24].mxu0 %vm644_vm2, %v9180_v7  ;;  %7950 = vmatmul.mubr.msk.f32.gmra.mrb[24].mxu1 %vm644_vm2, %v9180_v7 }
 0x149   : > { %7502 = vmatprep.mubr.msk.f32.mxu0 %vm644_vm2, %v11090_v39  ;;  %7952 = vmatprep.mubr.msk.f32.mxu1 %vm644_vm2, %v11090_v39 }
 0x14c   : > { %7503 = vmatmul.mubr.msk.f32.gmra.mrb[26].mxu0 %vm644_vm2, %v11091_v61  ;;  %7953 = vmatmul.mubr.msk.f32.gmra.mrb[26].mxu1 %vm644_vm2, %v11091_v61 }
 0x14d   : > { %7505 = vmatprep.mubr.msk.f32.mxu0 %vm644_vm2, %v11092_v63  ;;  %7955 = vmatprep.mubr.msk.f32.mxu1 %vm644_vm2, %v11092_v63 }
 0x150   : > { %7506 = vmatmul.mubr.msk.f32.gmra.mrb[28].mxu0 %vm644_vm2, %v11093_v8  ;;  %7956 = vmatmul.mubr.msk.f32.gmra.mrb[28].mxu1 %vm644_vm2, %v11093_v8 }
 0x151   : > { %7508 = vmatprep.mubr.msk.f32.mxu0 %vm644_vm2, %v9942_v53  ;;  %7958 = vmatprep.mubr.msk.f32.mxu1 %vm644_vm2, %v9942_v53 }
 0x154   : > { %7509 = vmatmul.mubr.msk.f32.gmra.mrb[30].mxu0 %vm644_vm2, %v9953_v14  ;;  %7959 = vmatmul.mubr.msk.f32.gmra.mrb[30].mxu1 %vm644_vm2, %v9953_v14 }
 0x155   : > { %7513 = vmatprep.mubr.msk.f32.mxu0 %vm644_vm2, %v9380_v54  ;;  %7963 = vmatprep.mubr.msk.f32.mxu1 %vm644_vm2, %v9380_v54  ;;  %v11094_v54 = vld [vmem:[#allocation26_spill] sm:$0xff] }
 0x158   : > { %7514 = vmatmul.mubr.msk.f32.vlgmr.msra.gmra.mrb[0].mxu0 %vm644_vm2, %v9399_v27  ;;  %7964 = vmatmul.mubr.msk.f32.vlgmr.msra.gmra.mrb[0].mxu1 %vm644_vm2, %v9399_v27  ;;  %v11095_v27 = vld [vmem:[#allocation27_spill] sm:$0xff] }
 0x159   : > { %7562 = vmatpush3.msk.msra.mxu0 %vm709_vm0, %v9812_v15  ;;  %8012 = vmatpush3.msk.msra.mxu1 %vm709_vm0, %v9817_v16  ;;  %v11100_v15 = vld [vmem:[#allocation32_spill] sm:$0xff]  ;;  %v11101_v16 = vld [vmem:[#allocation33_spill] sm:$0xff] }
 0x15a   : > { %7516 = vmatprep.mubr.msk.f32.mxu0 %vm644_vm2, %v9407_v32  ;;  %7966 = vmatprep.mubr.msk.f32.mxu1 %vm644_vm2, %v9407_v32 }
 0x15b   : > { %7611 = vmatprep.subr.msk.mxu0 %vm709_vm0, %v9970_v5  ;;  %8061 = vmatprep.subr.msk.mxu1 %vm709_vm0, %v9975_v4 }
 0x15c   : > { %7517 = vmatmul.mubr.msk.f32.gmra.mrb[2].mxu0 %vm644_vm2, %v9424_v21  ;;  %7967 = vmatmul.mubr.msk.f32.gmra.mrb[2].mxu1 %vm644_vm2, %v9424_v21 }
 0x15d   : > { %7519 = vmatprep.mubr.msk.f32.mxu0 %vm644_vm2, %v11094_v54  ;;  %7969 = vmatprep.mubr.msk.f32.mxu1 %vm644_vm2, %v11094_v54 }
 0x160   : > { %7520 = vmatmul.mubr.msk.f32.gmra.mrb[4].mxu0 %vm644_vm2, %v9441_v33  ;;  %7970 = vmatmul.mubr.msk.f32.gmra.mrb[4].mxu1 %vm644_vm2, %v9441_v33 }
 0x161   : > { %7522 = vmatprep.mubr.msk.f32.mxu0 %vm644_vm2, %v11095_v27  ;;  %7972 = vmatprep.mubr.msk.f32.mxu1 %vm644_vm2, %v11095_v27 }
 0x164   : > { %7523 = vmatmul.mubr.msk.f32.gmra.mrb[6].mxu0 %vm644_vm2, %v9458_v41  ;;  %7973 = vmatmul.mubr.msk.f32.gmra.mrb[6].mxu1 %vm644_vm2, %v9458_v41 }
 0x165   : > { %7525 = vmatprep.mubr.msk.f32.mxu0 %vm644_vm2, %v11096_v0  ;;  %7975 = vmatprep.mubr.msk.f32.mxu1 %vm644_vm2, %v11096_v0 }
 0x168   : > { %7526 = vmatmul.mubr.msk.f32.gmra.mrb[8].mxu0 %vm644_vm2, %v9475_v49  ;;  %7976 = vmatmul.mubr.msk.f32.gmra.mrb[8].mxu1 %vm644_vm2, %v9475_v49 }
 0x169   : > { %7528 = vmatprep.mubr.msk.f32.mxu0 %vm644_vm2, %v11097_v13  ;;  %7978 = vmatprep.mubr.msk.f32.mxu1 %vm644_vm2, %v11097_v13 }
 0x16c   : > { %7529 = vmatmul.mubr.msk.f32.gmra.mrb[10].mxu0 %vm644_vm2, %v9492_v57  ;;  %7979 = vmatmul.mubr.msk.f32.gmra.mrb[10].mxu1 %vm644_vm2, %v9492_v57 }
 0x16d   : > { %7531 = vmatprep.mubr.msk.f32.mxu0 %vm644_vm2, %v11098_v36  ;;  %7981 = vmatprep.mubr.msk.f32.mxu1 %vm644_vm2, %v11098_v36 }
 0x170   : > { %7532 = vmatmul.mubr.msk.f32.gmra.mrb[12].mxu0 %vm644_vm2, %v9509_v1  ;;  %7982 = vmatmul.mubr.msk.f32.gmra.mrb[12].mxu1 %vm644_vm2, %v9509_v1 }
 0x171   : > { %7534 = vmatprep.mubr.msk.f32.mxu0 %vm644_vm2, %v11099_v52  ;;  %7984 = vmatprep.mubr.msk.f32.mxu1 %vm644_vm2, %v11099_v52 }
 0x174   : > { %7535 = vmatmul.mubr.msk.f32.gmra.mrb[14].mxu0 %vm644_vm2, %v9526_v17  ;;  %7985 = vmatmul.mubr.msk.f32.gmra.mrb[14].mxu1 %vm644_vm2, %v9526_v17 }
 0x175   : > { %7537 = vmatprep.mubr.msk.f32.mxu0 %vm644_vm2, %v11100_v15  ;;  %7987 = vmatprep.mubr.msk.f32.mxu1 %vm644_vm2, %v11100_v15 }
 0x178   : > { %7538 = vmatmul.mubr.msk.f32.gmra.mrb[16].mxu0 %vm644_vm2, %v9543_v37  ;;  %7988 = vmatmul.mubr.msk.f32.gmra.mrb[16].mxu1 %vm644_vm2, %v9543_v37 }
 0x179   : > { %7540 = vmatprep.mubr.msk.f32.mxu0 %vm644_vm2, %v11101_v16  ;;  %7990 = vmatprep.mubr.msk.f32.mxu1 %vm644_vm2, %v11101_v16 }
 0x17c   : > { %7541 = vmatmul.mubr.msk.f32.gmra.mrb[18].mxu0 %vm644_vm2, %v9560_v56  ;;  %7991 = vmatmul.mubr.msk.f32.gmra.mrb[18].mxu1 %vm644_vm2, %v9560_v56 }
 0x17d   : > { %7543 = vmatprep.mubr.msk.f32.mxu0 %vm644_vm2, %v11102_v40  ;;  %7993 = vmatprep.mubr.msk.f32.mxu1 %vm644_vm2, %v11102_v40 }
 0x180   : > { %7544 = vmatmul.mubr.msk.f32.gmra.mrb[20].mxu0 %vm644_vm2, %v9577_v31  ;;  %7994 = vmatmul.mubr.msk.f32.gmra.mrb[20].mxu1 %vm644_vm2, %v9577_v31 }
 0x181   : > { %7546 = vmatprep.mubr.msk.f32.mxu0 %vm644_vm2, %v11103_v45  ;;  %7996 = vmatprep.mubr.msk.f32.mxu1 %vm644_vm2, %v11103_v45 }
 0x184   : > { %7547 = vmatmul.mubr.msk.f32.gmra.mrb[22].mxu0 %vm644_vm2, %v9594_v20  ;;  %7997 = vmatmul.mubr.msk.f32.gmra.mrb[22].mxu1 %vm644_vm2, %v9594_v20  ;;  %v624_v20 = vrot.slane %v9795_v11, 2 }
 0x185   : > { %7549 = vmatprep.mubr.msk.f32.mxu0 %vm644_vm2, %v9598_v23  ;;  %7999 = vmatprep.mubr.msk.f32.mxu1 %vm644_vm2, %v9598_v23 }
 0x188   : > { %7550 = vmatmul.mubr.msk.f32.gmra.mrb[24].mxu0 %vm644_vm2, %v9611_v62  ;;  %8000 = vmatmul.mubr.msk.f32.gmra.mrb[24].mxu1 %vm644_vm2, %v9611_v62  ;;  %v10097_v62 = vsel %vm534_vm3, %v623_v12, %v624_v20  ;;  %v8683_v12 = vld [vmem:[%s8795_s18 + $0x38] sm:$0xff] }
 0x189   : > { %7552 = vmatprep.mubr.msk.f32.mxu0 %vm644_vm2, %v9615_v38  ;;  %8002 = vmatprep.mubr.msk.f32.mxu1 %vm644_vm2, %v9615_v38  ;;  %v626_v38 = vrot.slane %v9930_v48, 2  ;;  %v8682_v48 = vld [vmem:[%s8795_s18 + $0x30] sm:$0xff] }
 0x18c   : > { %7553 = vmatmul.mubr.msk.f32.gmra.mrb[26].mxu0 %vm644_vm2, %v9628_v55  ;;  %8003 = vmatmul.mubr.msk.f32.gmra.mrb[26].mxu1 %vm644_vm2, %v9628_v55 }
 0x18d   : > { %7555 = vmatprep.mubr.msk.f32.mxu0 %vm644_vm2, %v9632_v6  ;;  %8005 = vmatprep.mubr.msk.f32.mxu1 %vm644_vm2, %v9632_v6  ;;  %v10108_v6 = vsel %vm534_vm3, %v624_v20, %v626_v38  ;;  %v10123_v20 = vld [vmem:[%s10946_s1 + $0x20] sm:$0xf] }
 0x18e   : > { %11104 = vst [vmem:[#allocation2_spill] sm:$0xff] %v10108_v6  ;;  %v10128_v38 = vld [vmem:[%s10947_s2 + $0x20] sm:$0xf] }
 0x190   : > { %7556 = vmatmul.mubr.msk.f32.gmra.mrb[28].mxu0 %vm644_vm2, %v9643_v26  ;;  %8006 = vmatmul.mubr.msk.f32.gmra.mrb[28].mxu1 %vm644_vm2, %v9643_v26 }
 0x191   : > { %7558 = vmatprep.mubr.msk.f32.mxu0 %vm644_vm2, %v10097_v62  ;;  %8008 = vmatprep.mubr.msk.f32.mxu1 %vm644_vm2, %v10097_v62 }
 0x194   : > { %7559 = vmatmul.mubr.msk.f32.gmra.mrb[30].mxu0 %vm644_vm2, %v10108_v6  ;;  %8009 = vmatmul.mubr.msk.f32.gmra.mrb[30].mxu1 %vm644_vm2, %v10108_v6  ;;  %v8705_v6 = vld [vmem:[%s8795_s18 + $0x140] sm:$0xff] }
 0x195   : > { %7563 = vmatprep.mubr.msk.f32.mxu0 %vm644_vm2, %v8682_v48  ;;  %8013 = vmatprep.mubr.msk.f32.mxu1 %vm644_vm2, %v8682_v48  ;;  %v8684_v48 = vld [vmem:[%s8795_s18 + $0x48] sm:$0xff] }
 0x198   : > { %7564 = vmatmul.mubr.msk.f32.vlgmr.msra.gmra.mrb[0].mxu0 %vm644_vm2, %v8683_v12  ;;  %8014 = vmatmul.mubr.msk.f32.vlgmr.msra.gmra.mrb[0].mxu1 %vm644_vm2, %v8683_v12  ;;  %v8685_v12 = vld [vmem:[%s8795_s18 + $0x50] sm:$0xff] }
 0x199   : > { %7612 = vmatpush3.msk.msra.mxu0 %vm709_vm0, %v9970_v5  ;;  %8062 = vmatpush3.msk.msra.mxu1 %vm709_vm0, %v9975_v4  ;;  %v8686_v5 = vld [vmem:[%s8795_s18 + $0x60] sm:$0xff]  ;;  %v8687_v4 = vld [vmem:[%s8795_s18 + $0x68] sm:$0xff] }
 0x19a   : > { %7566 = vmatprep.mubr.msk.f32.mxu0 %vm644_vm2, %v8684_v48  ;;  %8016 = vmatprep.mubr.msk.f32.mxu1 %vm644_vm2, %v8684_v48  ;;  %v8688_v48 = vld [vmem:[%s8795_s18 + $0x78] sm:$0xff] }
 0x19b   : > { %7661 = vmatprep.subr.msk.mxu0 %vm709_vm0, %v10123_v20  ;;  %8111 = vmatprep.subr.msk.mxu1 %vm709_vm0, %v10128_v38 }
 0x19c   : > { %7567 = vmatmul.mubr.msk.f32.gmra.mrb[2].mxu0 %vm644_vm2, %v8685_v12  ;;  %8017 = vmatmul.mubr.msk.f32.gmra.mrb[2].mxu1 %vm644_vm2, %v8685_v12  ;;  %v8689_v12 = vld [vmem:[%s8795_s18 + $0x80] sm:$0xff] }
 0x19d   : > { %7569 = vmatprep.mubr.msk.f32.mxu0 %vm644_vm2, %v8686_v5  ;;  %8019 = vmatprep.mubr.msk.f32.mxu1 %vm644_vm2, %v8686_v5  ;;  %v8690_v5 = vld [vmem:[%s8795_s18 + $0x90] sm:$0xff] }
 0x1a0   : > { %7570 = vmatmul.mubr.msk.f32.gmra.mrb[4].mxu0 %vm644_vm2, %v8687_v4  ;;  %8020 = vmatmul.mubr.msk.f32.gmra.mrb[4].mxu1 %vm644_vm2, %v8687_v4  ;;  %v8691_v4 = vld [vmem:[%s8795_s18 + $0x98] sm:$0xff] }
 0x1a1   : > { %7572 = vmatprep.mubr.msk.f32.mxu0 %vm644_vm2, %v8688_v48  ;;  %8022 = vmatprep.mubr.msk.f32.mxu1 %vm644_vm2, %v8688_v48  ;;  %v8692_v48 = vld [vmem:[%s8795_s18 + $0xa8] sm:$0xff] }
 0x1a4   : > { %7573 = vmatmul.mubr.msk.f32.gmra.mrb[6].mxu0 %vm644_vm2, %v8689_v12  ;;  %8023 = vmatmul.mubr.msk.f32.gmra.mrb[6].mxu1 %vm644_vm2, %v8689_v12  ;;  %v8693_v12 = vld [vmem:[%s8795_s18 + $0xb0] sm:$0xff] }
 0x1a5   : > { %7575 = vmatprep.mubr.msk.f32.mxu0 %vm644_vm2, %v8690_v5  ;;  %8025 = vmatprep.mubr.msk.f32.mxu1 %vm644_vm2, %v8690_v5  ;;  %v8694_v5 = vld [vmem:[%s8795_s18 + $0xc0] sm:$0xff] }
 0x1a8   : > { %7576 = vmatmul.mubr.msk.f32.gmra.mrb[8].mxu0 %vm644_vm2, %v8691_v4  ;;  %8026 = vmatmul.mubr.msk.f32.gmra.mrb[8].mxu1 %vm644_vm2, %v8691_v4  ;;  %v8695_v4 = vld [vmem:[%s8795_s18 + $0xc8] sm:$0xff] }
 0x1a9   : > { %7578 = vmatprep.mubr.msk.f32.mxu0 %vm644_vm2, %v8692_v48  ;;  %8028 = vmatprep.mubr.msk.f32.mxu1 %vm644_vm2, %v8692_v48  ;;  %v8696_v48 = vld [vmem:[%s8795_s18 + $0xd8] sm:$0xff] }
 0x1ac   : > { %7579 = vmatmul.mubr.msk.f32.gmra.mrb[10].mxu0 %vm644_vm2, %v8693_v12  ;;  %8029 = vmatmul.mubr.msk.f32.gmra.mrb[10].mxu1 %vm644_vm2, %v8693_v12  ;;  %v8697_v12 = vld [vmem:[%s8795_s18 + $0xe0] sm:$0xff] }
 0x1ad   : > { %7581 = vmatprep.mubr.msk.f32.mxu0 %vm644_vm2, %v8694_v5  ;;  %8031 = vmatprep.mubr.msk.f32.mxu1 %vm644_vm2, %v8694_v5  ;;  %v8698_v5 = vld [vmem:[%s8795_s18 + $0xf0] sm:$0xff] }
 0x1b0   : > { %7582 = vmatmul.mubr.msk.f32.gmra.mrb[12].mxu0 %vm644_vm2, %v8695_v4  ;;  %8032 = vmatmul.mubr.msk.f32.gmra.mrb[12].mxu1 %vm644_vm2, %v8695_v4  ;;  %v8699_v4 = vld [vmem:[%s8795_s18 + $0xf8] sm:$0xff] }
 0x1b1   : > { %7584 = vmatprep.mubr.msk.f32.mxu0 %vm644_vm2, %v8696_v48  ;;  %8034 = vmatprep.mubr.msk.f32.mxu1 %vm644_vm2, %v8696_v48  ;;  %v8700_v48 = vld [vmem:[%s8795_s18 + $0x108] sm:$0xff] }
 0x1b4   : > { %7585 = vmatmul.mubr.msk.f32.gmra.mrb[14].mxu0 %vm644_vm2, %v8697_v12  ;;  %8035 = vmatmul.mubr.msk.f32.gmra.mrb[14].mxu1 %vm644_vm2, %v8697_v12  ;;  %v8701_v12 = vld [vmem:[%s8795_s18 + $0x110] sm:$0xff] }
 0x1b5   : > { %7587 = vmatprep.mubr.msk.f32.mxu0 %vm644_vm2, %v8698_v5  ;;  %8037 = vmatprep.mubr.msk.f32.mxu1 %vm644_vm2, %v8698_v5  ;;  %v8702_v5 = vld [vmem:[%s8795_s18 + $0x120] sm:$0xff] }
 0x1b8   : > { %7588 = vmatmul.mubr.msk.f32.gmra.mrb[16].mxu0 %vm644_vm2, %v8699_v4  ;;  %8038 = vmatmul.mubr.msk.f32.gmra.mrb[16].mxu1 %vm644_vm2, %v8699_v4  ;;  %v8703_v4 = vld [vmem:[%s8795_s18 + $0x128] sm:$0xff] }
 0x1b9   : > { %7590 = vmatprep.mubr.msk.f32.mxu0 %vm644_vm2, %v8700_v48  ;;  %8040 = vmatprep.mubr.msk.f32.mxu1 %vm644_vm2, %v8700_v48  ;;  %v8704_v48 = vld [vmem:[%s8795_s18 + $0x138] sm:$0xff] }
 0x1bc   : > { %7591 = vmatmul.mubr.msk.f32.gmra.mrb[18].mxu0 %vm644_vm2, %v8701_v12  ;;  %8041 = vmatmul.mubr.msk.f32.gmra.mrb[18].mxu1 %vm644_vm2, %v8701_v12  ;;  %v8706_v12 = vld [vmem:[%s8795_s18 + $0x150] sm:$0xff] }
 0x1bd   : > { %7593 = vmatprep.mubr.msk.f32.mxu0 %vm644_vm2, %v8702_v5  ;;  %8043 = vmatprep.mubr.msk.f32.mxu1 %vm644_vm2, %v8702_v5  ;;  %v8707_v5 = vld [vmem:[%s8795_s18 + $0x158] sm:$0xff] }
 0x1c0   : > { %7594 = vmatmul.mubr.msk.f32.gmra.mrb[20].mxu0 %vm644_vm2, %v8703_v4  ;;  %8044 = vmatmul.mubr.msk.f32.gmra.mrb[20].mxu1 %vm644_vm2, %v8703_v4  ;;  %v8708_v4 = vld [vmem:[%s8795_s18 + $0x168] sm:$0xff] }
 0x1c1   : > { %7596 = vmatprep.mubr.msk.f32.mxu0 %vm644_vm2, %v8704_v48  ;;  %8046 = vmatprep.mubr.msk.f32.mxu1 %vm644_vm2, %v8704_v48  ;;  %v8709_v48 = vld [vmem:[%s8795_s18 + $0x170] sm:$0xff] }
 0x1c4   : > { %7597 = vmatmul.mubr.msk.f32.gmra.mrb[22].mxu0 %vm644_vm2, %v8705_v6  ;;  %8047 = vmatmul.mubr.msk.f32.gmra.mrb[22].mxu1 %vm644_vm2, %v8705_v6  ;;  %v10221_v6 = vld [vmem:[%s8795_s18 + $0x198] sm:$0xff] }
 0x1c5   : > { %7599 = vmatprep.mubr.msk.f32.mxu0 %vm644_vm2, %v8706_v12  ;;  %8049 = vmatprep.mubr.msk.f32.mxu1 %vm644_vm2, %v8706_v12  ;;  %v10232_v12 = vld [vmem:[%s8795_s18 + $0x1a0] sm:$0xff] }
 0x1c8   : > { %7600 = vmatmul.mubr.msk.f32.gmra.mrb[24].mxu0 %vm644_vm2, %v8707_v5  ;;  %8050 = vmatmul.mubr.msk.f32.gmra.mrb[24].mxu1 %vm644_vm2, %v8707_v5 }
 0x1c9   : > { %7602 = vmatprep.mubr.msk.f32.mxu0 %vm644_vm2, %v8708_v4  ;;  %8052 = vmatprep.mubr.msk.f32.mxu1 %vm644_vm2, %v8708_v4 }
 0x1cc   : > { %7603 = vmatmul.mubr.msk.f32.gmra.mrb[26].mxu0 %vm644_vm2, %v8709_v48  ;;  %8053 = vmatmul.mubr.msk.f32.gmra.mrb[26].mxu1 %vm644_vm2, %v8709_v48 }
 0x1cd   : > { %7605 = vmatprep.mubr.msk.f32.mxu0 %vm644_vm2, %v9784_v10  ;;  %8055 = vmatprep.mubr.msk.f32.mxu1 %vm644_vm2, %v9784_v10 }
 0x1d0   : > { %7606 = vmatmul.mubr.msk.f32.gmra.mrb[28].mxu0 %vm644_vm2, %v9795_v11  ;;  %8056 = vmatmul.mubr.msk.f32.gmra.mrb[28].mxu1 %vm644_vm2, %v9795_v11 }
 0x1d1   : > { %7608 = vmatprep.mubr.msk.f32.mxu0 %vm644_vm2, %v10221_v6  ;;  %8058 = vmatprep.mubr.msk.f32.mxu1 %vm644_vm2, %v10221_v6 }
 0x1d4   : > { %7609 = vmatmul.mubr.msk.f32.gmra.mrb[30].mxu0 %vm644_vm2, %v10232_v12  ;;  %8059 = vmatmul.mubr.msk.f32.gmra.mrb[30].mxu1 %vm644_vm2, %v10232_v12 }
 0x1d5   : > { %7613 = vmatprep.mubr.msk.f32.mxu0 %vm644_vm2, %v8868_v30  ;;  %8063 = vmatprep.mubr.msk.f32.mxu1 %vm644_vm2, %v8868_v30  ;;  %v631_v30 = vrot.slane %v10221_v6, 1 }
 0x1d8   : > { %7614 = vmatmul.mubr.msk.f32.vlgmr.msra.gmra.mrb[0].mxu0 %vm644_vm2, %v11070_v22  ;;  %8064 = vmatmul.mubr.msk.f32.vlgmr.msra.gmra.mrb[0].mxu1 %vm644_vm2, %v11070_v22 }
 0x1d9   : > { %7662 = vmatpush3.msk.msra.mxu0 %vm709_vm0, %v10123_v20  ;;  %8112 = vmatpush3.msk.msra.mxu1 %vm709_vm0, %v10128_v38 }
 0x1da   : > { %7616 = vmatprep.mubr.msk.f32.mxu0 %vm644_vm2, %v11071_v24  ;;  %8066 = vmatprep.mubr.msk.f32.mxu1 %vm644_vm2, %v11071_v24 }
 0x1dc   : > { %7617 = vmatmul.mubr.msk.f32.gmra.mrb[2].mxu0 %vm644_vm2, %v11072_v25  ;;  %8067 = vmatmul.mubr.msk.f32.gmra.mrb[2].mxu1 %vm644_vm2, %v11072_v25 }
 0x1dd   : > { %7619 = vmatprep.mubr.msk.f32.mxu0 %vm644_vm2, %v11073_v28  ;;  %8069 = vmatprep.mubr.msk.f32.mxu1 %vm644_vm2, %v11073_v28 }
 0x1e0   : > { %7620 = vmatmul.mubr.msk.f32.gmra.mrb[4].mxu0 %vm644_vm2, %v11074_v34  ;;  %8070 = vmatmul.mubr.msk.f32.gmra.mrb[4].mxu1 %vm644_vm2, %v11074_v34 }
 0x1e1   : > { %7622 = vmatprep.mubr.msk.f32.mxu0 %vm644_vm2, %v11075_v35  ;;  %8072 = vmatprep.mubr.msk.f32.mxu1 %vm644_vm2, %v11075_v35 }
 0x1e4   : > { %7623 = vmatmul.mubr.msk.f32.gmra.mrb[6].mxu0 %vm644_vm2, %v11076_v42  ;;  %8073 = vmatmul.mubr.msk.f32.gmra.mrb[6].mxu1 %vm644_vm2, %v11076_v42 }
 0x1e5   : > { %7625 = vmatprep.mubr.msk.f32.mxu0 %vm644_vm2, %v11077_v43  ;;  %8075 = vmatprep.mubr.msk.f32.mxu1 %vm644_vm2, %v11077_v43 }
 0x1e8   : > { %7626 = vmatmul.mubr.msk.f32.gmra.mrb[8].mxu0 %vm644_vm2, %v11078_v44  ;;  %8076 = vmatmul.mubr.msk.f32.gmra.mrb[8].mxu1 %vm644_vm2, %v11078_v44 }
 0x1e9   : > { %7628 = vmatprep.mubr.msk.f32.mxu0 %vm644_vm2, %v11079_v46  ;;  %8078 = vmatprep.mubr.msk.f32.mxu1 %vm644_vm2, %v11079_v46 }
 0x1ec   : > { %7629 = vmatmul.mubr.msk.f32.gmra.mrb[10].mxu0 %vm644_vm2, %v11080_v50  ;;  %8079 = vmatmul.mubr.msk.f32.gmra.mrb[10].mxu1 %vm644_vm2, %v11080_v50 }
 0x1ed   : > { %7631 = vmatprep.mubr.msk.f32.mxu0 %vm644_vm2, %v11081_v51  ;;  %8081 = vmatprep.mubr.msk.f32.mxu1 %vm644_vm2, %v11081_v51 }
 0x1f0   : > { %7632 = vmatmul.mubr.msk.f32.gmra.mrb[12].mxu0 %vm644_vm2, %v11082_v58  ;;  %8082 = vmatmul.mubr.msk.f32.gmra.mrb[12].mxu1 %vm644_vm2, %v11082_v58 }
 0x1f1   : > { %7634 = vmatprep.mubr.msk.f32.mxu0 %vm644_vm2, %v11083_v59  ;;  %8084 = vmatprep.mubr.msk.f32.mxu1 %vm644_vm2, %v11083_v59 }
 0x1f4   : > { %7635 = vmatmul.mubr.msk.f32.gmra.mrb[14].mxu0 %vm644_vm2, %v11084_v60  ;;  %8085 = vmatmul.mubr.msk.f32.gmra.mrb[14].mxu1 %vm644_vm2, %v11084_v60 }
 0x1f5   : > { %7637 = vmatprep.mubr.msk.f32.mxu0 %vm644_vm2, %v11085_v2  ;;  %8087 = vmatprep.mubr.msk.f32.mxu1 %vm644_vm2, %v11085_v2 }
 0x1f8   : > { %7638 = vmatmul.mubr.msk.f32.gmra.mrb[16].mxu0 %vm644_vm2, %v11086_v3  ;;  %8088 = vmatmul.mubr.msk.f32.gmra.mrb[16].mxu1 %vm644_vm2, %v11086_v3 }
 0x1f9   : > { %7640 = vmatprep.mubr.msk.f32.mxu0 %vm644_vm2, %v11087_v9  ;;  %8090 = vmatprep.mubr.msk.f32.mxu1 %vm644_vm2, %v11087_v9 }
 0x1fc   : > { %7641 = vmatmul.mubr.msk.f32.gmra.mrb[18].mxu0 %vm644_vm2, %v11088_v18  ;;  %8091 = vmatmul.mubr.msk.f32.gmra.mrb[18].mxu1 %vm644_vm2, %v11088_v18 }
 0x1fd   : > { %7643 = vmatprep.mubr.msk.f32.mxu0 %vm644_vm2, %v11089_v19  ;;  %8093 = vmatprep.mubr.msk.f32.mxu1 %vm644_vm2, %v11089_v19 }
 0x200   : > { %7644 = vmatmul.mubr.msk.f32.gmra.mrb[20].mxu0 %vm644_vm2, %v9154_v29  ;;  %8094 = vmatmul.mubr.msk.f32.gmra.mrb[20].mxu1 %vm644_vm2, %v9154_v29  ;;  %v632_v29 = vrot.slane %v10232_v12, 1 }
 0x201   : > { %7646 = vmatprep.mubr.msk.f32.mxu0 %vm644_vm2, %v9158_v47  ;;  %8096 = vmatprep.mubr.msk.f32.mxu1 %vm644_vm2, %v9158_v47  ;;  %v10353_v47 = vld [vmem:[%s8795_s18 + $0x1a8] sm:$0x3]  ;;  %s6665_s18 = sshll.u32 %s11111_s28, 8 }
 0x202   : > { %v633_v10 = vsel %vm453_vm1, %v631_v30, %v632_v29  ;;  %s10507_s10 = scalar_lea.vmem %s10948_s3, %s6665_s18  ;;  %s10512_s13 = scalar_lea.vmem %s10951_s6, %s6665_s18 }
 0x204   : > { %7647 = vmatmul.mubr.msk.f32.gmra.mrb[22].mxu0 %vm644_vm2, %v9180_v7  ;;  %8097 = vmatmul.mubr.msk.f32.gmra.mrb[22].mxu1 %vm644_vm2, %v9180_v7  ;;  %v634_v7 = vrot.slane %v10353_v47, 1 }
 0x205   : > { %7649 = vmatprep.mubr.msk.f32.mxu0 %vm644_vm2, %v11090_v39  ;;  %8099 = vmatprep.mubr.msk.f32.mxu1 %vm644_vm2, %v11090_v39 }
 0x206   : > { %v635_v11 = vsel %vm453_vm1, %v632_v29, %v634_v7 }
 0x208   : > { %7650 = vmatmul.mubr.msk.f32.gmra.mrb[24].mxu0 %vm644_vm2, %v11091_v61  ;;  %8100 = vmatmul.mubr.msk.f32.gmra.mrb[24].mxu1 %vm644_vm2, %v11091_v61 }
 0x209   : > { %7652 = vmatprep.mubr.msk.f32.mxu0 %vm644_vm2, %v11092_v63  ;;  %8102 = vmatprep.mubr.msk.f32.mxu1 %vm644_vm2, %v11092_v63 }
 0x20c   : > { %7653 = vmatmul.mubr.msk.f32.gmra.mrb[26].mxu0 %vm644_vm2, %v11093_v8  ;;  %8103 = vmatmul.mubr.msk.f32.gmra.mrb[26].mxu1 %vm644_vm2, %v11093_v8 }
 0x20d   : > { %7655 = vmatprep.mubr.msk.f32.mxu0 %vm644_vm2, %v9942_v53  ;;  %8105 = vmatprep.mubr.msk.f32.mxu1 %vm644_vm2, %v9942_v53 }
 0x210   : > { %7656 = vmatmul.mubr.msk.f32.gmra.mrb[28].mxu0 %vm644_vm2, %v9953_v14  ;;  %8106 = vmatmul.mubr.msk.f32.gmra.mrb[28].mxu1 %vm644_vm2, %v9953_v14 }
 0x211   : > { %7658 = vmatprep.mubr.msk.f32.mxu0 %vm644_vm2, %v633_v10  ;;  %8108 = vmatprep.mubr.msk.f32.mxu1 %vm644_vm2, %v633_v10 }
 0x214   : > { %7659 = vmatmul.mubr.msk.f32.gmra.mrb[30].mxu0 %vm644_vm2, %v635_v11  ;;  %8109 = vmatmul.mubr.msk.f32.gmra.mrb[30].mxu1 %vm644_vm2, %v635_v11 }
 0x215   : > { %7663 = vmatprep.mubr.msk.f32.mxu0 %vm644_vm2, %v9407_v32  ;;  %8113 = vmatprep.mubr.msk.f32.mxu1 %vm644_vm2, %v9407_v32  ;;  %v11105_v32 = vld [vmem:[#allocation36_spill] sm:$0xff] }
 0x218   : > { %7664 = vmatmul.mubr.msk.f32.vlgmr.msra.gmra.mrb[0].mxu0 %vm644_vm2, %v9424_v21  ;;  %8114 = vmatmul.mubr.msk.f32.vlgmr.msra.gmra.mrb[0].mxu1 %vm644_vm2, %v9424_v21  ;;  %v11106_v21 = vld [vmem:[#allocation37_spill] sm:$0xff] }
 0x219   : > { %7666 = vmatprep.mubr.msk.f32.mxu0 %vm644_vm2, %v11094_v54  ;;  %8116 = vmatprep.mubr.msk.f32.mxu1 %vm644_vm2, %v11094_v54 }
 0x21c   : > { %7667 = vmatmul.mubr.msk.f32.gmra.mrb[2].mxu0 %vm644_vm2, %v9441_v33  ;;  %8117 = vmatmul.mubr.msk.f32.gmra.mrb[2].mxu1 %vm644_vm2, %v9441_v33  ;;  %v11107_v33 = vld [vmem:[#allocation38_spill] sm:$0xff] }
 0x21d   : > { %7669 = vmatprep.mubr.msk.f32.mxu0 %vm644_vm2, %v11095_v27  ;;  %8119 = vmatprep.mubr.msk.f32.mxu1 %vm644_vm2, %v11095_v27 }
 0x220   : > { %7670 = vmatmul.mubr.msk.f32.gmra.mrb[4].mxu0 %vm644_vm2, %v9458_v41  ;;  %8120 = vmatmul.mubr.msk.f32.gmra.mrb[4].mxu1 %vm644_vm2, %v9458_v41  ;;  %v11108_v41 = vld [vmem:[#allocation39_spill] sm:$0xff] }
 0x221   : > { %7672 = vmatprep.mubr.msk.f32.mxu0 %vm644_vm2, %v11096_v0  ;;  %8122 = vmatprep.mubr.msk.f32.mxu1 %vm644_vm2, %v11096_v0 }
 0x224   : > { %7673 = vmatmul.mubr.msk.f32.gmra.mrb[6].mxu0 %vm644_vm2, %v9475_v49  ;;  %8123 = vmatmul.mubr.msk.f32.gmra.mrb[6].mxu1 %vm644_vm2, %v9475_v49  ;;  %v636_v49 = vrot.slane %v10221_v6, 2 }
 0x225   : > { %7675 = vmatprep.mubr.msk.f32.mxu0 %vm644_vm2, %v11097_v13  ;;  %8125 = vmatprep.mubr.msk.f32.mxu1 %vm644_vm2, %v11097_v13 }
 0x228   : > { %7676 = vmatmul.mubr.msk.f32.gmra.mrb[8].mxu0 %vm644_vm2, %v9492_v57  ;;  %8126 = vmatmul.mubr.msk.f32.gmra.mrb[8].mxu1 %vm644_vm2, %v9492_v57  ;;  %v637_v57 = vrot.slane %v10232_v12, 2 }
 0x229   : > { %7678 = vmatprep.mubr.msk.f32.mxu0 %vm644_vm2, %v11098_v36  ;;  %8128 = vmatprep.mubr.msk.f32.mxu1 %vm644_vm2, %v11098_v36 }
 0x22c   : > { %7679 = vmatmul.mubr.msk.f32.gmra.mrb[10].mxu0 %vm644_vm2, %v9509_v1  ;;  %8129 = vmatmul.mubr.msk.f32.gmra.mrb[10].mxu1 %vm644_vm2, %v9509_v1  ;;  %v639_v1 = vrot.slane %v10353_v47, 2 }
 0x22d   : > { %7681 = vmatprep.mubr.msk.f32.mxu0 %vm644_vm2, %v11099_v52  ;;  %8131 = vmatprep.mubr.msk.f32.mxu1 %vm644_vm2, %v11099_v52 }
 0x230   : > { %7682 = vmatmul.mubr.msk.f32.gmra.mrb[12].mxu0 %vm644_vm2, %v9526_v17  ;;  %8132 = vmatmul.mubr.msk.f32.gmra.mrb[12].mxu1 %vm644_vm2, %v9526_v17  ;;  %v638_v17 = vsel %vm534_vm3, %v636_v49, %v637_v57 }
 0x231   : > { %7684 = vmatprep.mubr.msk.f32.mxu0 %vm644_vm2, %v11100_v15  ;;  %8134 = vmatprep.mubr.msk.f32.mxu1 %vm644_vm2, %v11100_v15 }
 0x234   : > { %7685 = vmatmul.mubr.msk.f32.gmra.mrb[14].mxu0 %vm644_vm2, %v9543_v37  ;;  %8135 = vmatmul.mubr.msk.f32.gmra.mrb[14].mxu1 %vm644_vm2, %v9543_v37  ;;  %v11109_v37 = vld [vmem:[#allocation2_spill] sm:$0xff] }
 0x235   : > { %7687 = vmatprep.mubr.msk.f32.mxu0 %vm644_vm2, %v11101_v16  ;;  %8137 = vmatprep.mubr.msk.f32.mxu1 %vm644_vm2, %v11101_v16 }
 0x238   : > { %7688 = vmatmul.mubr.msk.f32.gmra.mrb[16].mxu0 %vm644_vm2, %v9560_v56  ;;  %8138 = vmatmul.mubr.msk.f32.gmra.mrb[16].mxu1 %vm644_vm2, %v9560_v56  ;;  %v640_v56 = vsel %vm534_vm3, %v637_v57, %v639_v1 }
 0x239   : > { %7690 = vmatprep.mubr.msk.f32.mxu0 %vm644_vm2, %v11102_v40  ;;  %8140 = vmatprep.mubr.msk.f32.mxu1 %vm644_vm2, %v11102_v40 }
 0x23c   : > { %7691 = vmatmul.mubr.msk.f32.gmra.mrb[18].mxu0 %vm644_vm2, %v9577_v31  ;;  %8141 = vmatmul.mubr.msk.f32.gmra.mrb[18].mxu1 %vm644_vm2, %v9577_v31 }
 0x23d   : > { %7693 = vmatprep.mubr.msk.f32.mxu0 %vm644_vm2, %v11103_v45  ;;  %8143 = vmatprep.mubr.msk.f32.mxu1 %vm644_vm2, %v11103_v45 }
 0x240   : > { %7694 = vmatmul.mubr.msk.f32.gmra.mrb[20].mxu0 %vm644_vm2, %v11105_v32  ;;  %8144 = vmatmul.mubr.msk.f32.gmra.mrb[20].mxu1 %vm644_vm2, %v11105_v32 }
 0x241   : > { %7696 = vmatprep.mubr.msk.f32.mxu0 %vm644_vm2, %v9598_v23  ;;  %8146 = vmatprep.mubr.msk.f32.mxu1 %vm644_vm2, %v9598_v23 }
 0x244   : > { %7697 = vmatmul.mubr.msk.f32.gmra.mrb[22].mxu0 %vm644_vm2, %v11106_v21  ;;  %8147 = vmatmul.mubr.msk.f32.gmra.mrb[22].mxu1 %vm644_vm2, %v11106_v21 }
 0x245   : > { %7699 = vmatprep.mubr.msk.f32.mxu0 %vm644_vm2, %v11107_v33  ;;  %8149 = vmatprep.mubr.msk.f32.mxu1 %vm644_vm2, %v11107_v33 }
 0x248   : > { %7700 = vmatmul.mubr.msk.f32.gmra.mrb[24].mxu0 %vm644_vm2, %v9628_v55  ;;  %8150 = vmatmul.mubr.msk.f32.gmra.mrb[24].mxu1 %vm644_vm2, %v9628_v55 }
 0x249   : > { %7702 = vmatprep.mubr.msk.f32.mxu0 %vm644_vm2, %v11108_v41  ;;  %8152 = vmatprep.mubr.msk.f32.mxu1 %vm644_vm2, %v11108_v41 }
 0x24c   : > { %7703 = vmatmul.mubr.msk.f32.gmra.mrb[26].mxu0 %vm644_vm2, %v9643_v26  ;;  %8153 = vmatmul.mubr.msk.f32.gmra.mrb[26].mxu1 %vm644_vm2, %v9643_v26 }
 0x24d   : > { %7705 = vmatprep.mubr.msk.f32.mxu0 %vm644_vm2, %v10097_v62  ;;  %8155 = vmatprep.mubr.msk.f32.mxu1 %vm644_vm2, %v10097_v62 }
 0x250   : > { %7706 = vmatmul.mubr.msk.f32.gmra.mrb[28].mxu0 %vm644_vm2, %v11109_v37  ;;  %8156 = vmatmul.mubr.msk.f32.gmra.mrb[28].mxu1 %vm644_vm2, %v11109_v37 }
 0x251   : > { %7708 = vmatprep.mubr.msk.f32.mxu0 %vm644_vm2, %v638_v17  ;;  %8158 = vmatprep.mubr.msk.f32.mxu1 %vm644_vm2, %v638_v17 }
 0x254   : > { %7709 = vmatmul.mubr.msk.f32.gmra.mrb[30].mxu0 %vm644_vm2, %v640_v56  ;;  %8159 = vmatmul.mubr.msk.f32.gmra.mrb[30].mxu1 %vm644_vm2, %v640_v56 }
 0x2eb   : > { %v7665_v31 = vpop.f32.mrb[0].mxu0  ;;  %v8115_v23 = vpop.f32.mrb[0].mxu1 }
 0x2ec   : > { %3154 = vst.msk [vmem:[%s10507_s10 + $0x8] sm:$0xff] %vm3152_vm4, %v7665_v31  ;;  %v3186_v62 = vsel %vm3152_vm4, %v7665_v31, 0.0  ;;  %v3257_v55 = vmul.f32 %v7665_v31, %v7665_v31  ;;  %5652 = vst.msk [vmem:[%s10512_s13 + $0x8] sm:$0xff] %vm3152_vm4, %v8115_v23  ;;  %v5684_v26 = vsel %vm3152_vm4, %v8115_v23, 0.0  ;;  %v5754_v22 = vmul.f32 %v8115_v23, %v8115_v23  ;;  %v2961_v24 = vpop.f32.mrb[1].mxu0  ;;  %v5460_v25 = vpop.f32.mrb[1].mxu1 }
 0x2ed   : > { %3153 = vst.msk [vmem:[%s10507_s10] sm:$0xff] %vm3152_vm4, %v2961_v24  ;;  %v3185_v28 = vsel %vm3152_vm4, %v2961_v24, 0.0  ;;  %v3256_v34 = vmul.f32 %v2961_v24, %v2961_v24  ;;  %5651 = vst.msk [vmem:[%s10512_s13] sm:$0xff] %vm3152_vm4, %v5460_v25  ;;  %v5683_v35 = vsel %vm3152_vm4, %v5460_v25, 0.0  ;;  %v5753_v42 = vmul.f32 %v5460_v25, %v5460_v25 }
 0x2ee   : > { %v3289_v43 = vsel %vm3152_vm4, %v3257_v55, 0.0  ;;  %v5786_v44 = vsel %vm3152_vm4, %v5754_v22, 0.0  ;;  %v3187_v46 = vadd.f32 %v3186_v62, %v3185_v28  ;;  %v5685_v50 = vadd.f32 %v5684_v26, %v5683_v35 }
 0x2ef   : > { %v3288_v51 = vsel %vm3152_vm4, %v3256_v34, 0.0  ;;  %v5785_v58 = vsel %vm3152_vm4, %v5753_v42, 0.0  ;;  %v7668_v59 = vpop.f32.mrb[2].mxu0  ;;  %v8118_v60 = vpop.f32.mrb[2].mxu1 }
 0x2f0   : > { %v3290_v2 = vadd.f32 %v3289_v43, %v3288_v51  ;;  %v5787_v3 = vadd.f32 %v5786_v44, %v5785_v58  ;;  %3156 = vst.msk [vmem:[%s10507_s10 + $0x18] sm:$0xff] %vm3152_vm4, %v7668_v59  ;;  %5654 = vst.msk [vmem:[%s10512_s13 + $0x18] sm:$0xff] %vm3152_vm4, %v8118_v60  ;;  %v2971_v9 = vpop.f32.mrb[3].mxu0  ;;  %v5470_v18 = vpop.f32.mrb[3].mxu1  ;;  %v3259_v19 = vmul.f32 %v7668_v59, %v7668_v59  ;;  %v3190_v36 = vsel %vm3152_vm4, %v7668_v59, 0.0 }
 0x2f1   : > { %3155 = vst.msk [vmem:[%s10507_s10 + $0x10] sm:$0xff] %vm3152_vm4, %v2971_v9  ;;  %v3188_v39 = vsel %vm3152_vm4, %v2971_v9, 0.0  ;;  %v3258_v61 = vmul.f32 %v2971_v9, %v2971_v9  ;;  %5653 = vst.msk [vmem:[%s10512_s13 + $0x10] sm:$0xff] %vm3152_vm4, %v5470_v18  ;;  %v5756_v63 = vmul.f32 %v8118_v60, %v8118_v60  ;;  %v5686_v8 = vsel %vm3152_vm4, %v5470_v18, 0.0 }
 0x2f2   : > { %v3189_v53 = vadd.f32 %v3188_v39, %v3187_v46  ;;  %v5755_v14 = vmul.f32 %v5470_v18, %v5470_v18  ;;  %v5687_v27 = vadd.f32 %v5686_v8, %v5685_v50  ;;  %v5688_v52 = vsel %vm3152_vm4, %v8118_v60, 0.0 }
 0x2f3   : > { %v3291_v54 = vsel %vm3152_vm4, %v3258_v61, 0.0  ;;  %v7671_v0 = vpop.f32.mrb[4].mxu0  ;;  %v8121_v13 = vpop.f32.mrb[4].mxu1  ;;  %v3293_v20 = vsel %vm3152_vm4, %v3259_v19, 0.0  ;;  %v5790_v48 = vsel %vm3152_vm4, %v5756_v63, 0.0 }
 0x2f4   : > { %v3292_v15 = vadd.f32 %v3291_v54, %v3290_v2  ;;  %v5788_v16 = vsel %vm3152_vm4, %v5755_v14, 0.0  ;;  %3158 = vst.msk [vmem:[%s10507_s10 + $0x28] sm:$0xff] %vm3152_vm4, %v7671_v0  ;;  %5656 = vst.msk [vmem:[%s10512_s13 + $0x28] sm:$0xff] %vm3152_vm4, %v8121_v13  ;;  %v2981_v40 = vpop.f32.mrb[5].mxu0  ;;  %v5480_v45 = vpop.f32.mrb[5].mxu1  ;;  %v3261_v5 = vmul.f32 %v7671_v0, %v7671_v0  ;;  %v3191_v4 = vadd.f32 %v3190_v36, %v3189_v53 }
 0x2f5   : > { %v5789_v38 = vadd.f32 %v5788_v16, %v5787_v3  ;;  %3157 = vst.msk [vmem:[%s10507_s10 + $0x20] sm:$0xff] %vm3152_vm4, %v2981_v40  ;;  %5655 = vst.msk [vmem:[%s10512_s13 + $0x20] sm:$0xff] %vm3152_vm4, %v5480_v45  ;;  %v3192_v6 = vsel %vm3152_vm4, %v2981_v40, 0.0  ;;  %v3260_v12 = vmul.f32 %v2981_v40, %v2981_v40  ;;  %v5758_v29 = vmul.f32 %v8121_v13, %v8121_v13 }
 0x2f6   : > { %v3294_v30 = vadd.f32 %v3293_v20, %v3292_v15  ;;  %v3193_v47 = vadd.f32 %v3192_v6, %v3191_v4  ;;  %v5689_v7 = vadd.f32 %v5688_v52, %v5687_v27  ;;  %v5690_v10 = vsel %vm3152_vm4, %v5480_v45, 0.0 }
 0x2f7   : > { %v7674_v11 = vpop.f32.mrb[6].mxu0  ;;  %v8124_v32 = vpop.f32.mrb[6].mxu1  ;;  %v3194_v21 = vsel %vm3152_vm4, %v7671_v0, 0.0  ;;  %v3295_v33 = vsel %vm3152_vm4, %v3260_v12, 0.0  ;;  %v5757_v41 = vmul.f32 %v5480_v45, %v5480_v45  ;;  %v5791_v49 = vadd.f32 %v5790_v48, %v5789_v38 }
 0x2f8   : > { %3160 = vst.msk [vmem:[%s10507_s10 + $0x38] sm:$0xff] %vm3152_vm4, %v7674_v11  ;;  %5658 = vst.msk [vmem:[%s10512_s13 + $0x38] sm:$0xff] %vm3152_vm4, %v8124_v32  ;;  %v2991_v57 = vpop.f32.mrb[7].mxu0  ;;  %v5490_v1 = vpop.f32.mrb[7].mxu1  ;;  %v3297_v17 = vsel %vm3152_vm4, %v3261_v5, 0.0  ;;  %v5692_v37 = vsel %vm3152_vm4, %v8121_v13, 0.0  ;;  %v3296_v56 = vadd.f32 %v3295_v33, %v3294_v30  ;;  %v5691_v31 = vadd.f32 %v5690_v10, %v5689_v7 }
 0x2f9   : > { %3159 = vst.msk [vmem:[%s10507_s10 + $0x30] sm:$0xff] %vm3152_vm4, %v2991_v57  ;;  %5657 = vst.msk [vmem:[%s10512_s13 + $0x30] sm:$0xff] %vm3152_vm4, %v5490_v1  ;;  %v5792_v23 = vsel %vm3152_vm4, %v5757_v41, 0.0  ;;  %v3263_v62 = vmul.f32 %v7674_v11, %v7674_v11  ;;  %v3195_v55 = vadd.f32 %v3194_v21, %v3193_v47  ;;  %v3196_v26 = vsel %vm3152_vm4, %v2991_v57, 0.0 }
 0x2fa   : > { %v5794_v22 = vsel %vm3152_vm4, %v5758_v29, 0.0  ;;  %v5793_v24 = vadd.f32 %v5792_v23, %v5791_v49  ;;  %v3262_v25 = vmul.f32 %v2991_v57, %v2991_v57  ;;  %v3298_v28 = vadd.f32 %v3297_v17, %v3296_v56 }
 0x2fb   : > { %v7677_v34 = vpop.f32.mrb[8].mxu0  ;;  %v8127_v35 = vpop.f32.mrb[8].mxu1  ;;  %v5760_v42 = vmul.f32 %v8124_v32, %v8124_v32  ;;  %v3197_v43 = vadd.f32 %v3196_v26, %v3195_v55  ;;  %v5693_v44 = vadd.f32 %v5692_v37, %v5691_v31  ;;  %v5694_v46 = vsel %vm3152_vm4, %v5490_v1, 0.0 }
 0x2fc   : > { %3162 = vst.msk [vmem:[%s10507_s10 + $0x48] sm:$0xff] %vm3152_vm4, %v7677_v34  ;;  %5660 = vst.msk [vmem:[%s10512_s13 + $0x48] sm:$0xff] %vm3152_vm4, %v8127_v35  ;;  %v3001_v50 = vpop.f32.mrb[9].mxu0  ;;  %v5500_v51 = vpop.f32.mrb[9].mxu1  ;;  %v3198_v58 = vsel %vm3152_vm4, %v7674_v11, 0.0  ;;  %v3299_v59 = vsel %vm3152_vm4, %v3262_v25, 0.0  ;;  %v5759_v60 = vmul.f32 %v5490_v1, %v5490_v1  ;;  %v5795_v2 = vadd.f32 %v5794_v22, %v5793_v24 }
 0x2fd   : > { %3161 = vst.msk [vmem:[%s10507_s10 + $0x40] sm:$0xff] %vm3152_vm4, %v3001_v50  ;;  %5659 = vst.msk [vmem:[%s10512_s13 + $0x40] sm:$0xff] %vm3152_vm4, %v5500_v51  ;;  %v3301_v3 = vsel %vm3152_vm4, %v3263_v62, 0.0  ;;  %v5696_v9 = vsel %vm3152_vm4, %v8124_v32, 0.0  ;;  %v3300_v18 = vadd.f32 %v3299_v59, %v3298_v28  ;;  %v5695_v19 = vadd.f32 %v5694_v46, %v5693_v44 }
 0x2fe   : > { %v5796_v39 = vsel %vm3152_vm4, %v5759_v60, 0.0  ;;  %v3265_v61 = vmul.f32 %v7677_v34, %v7677_v34  ;;  %v3199_v63 = vadd.f32 %v3198_v58, %v3197_v43  ;;  %v3200_v53 = vsel %vm3152_vm4, %v3001_v50, 0.0 }
 0x2ff   : > { %v7680_v8 = vpop.f32.mrb[10].mxu0  ;;  %v8130_v14 = vpop.f32.mrb[10].mxu1  ;;  %v5798_v54 = vsel %vm3152_vm4, %v5760_v42, 0.0  ;;  %v5797_v27 = vadd.f32 %v5796_v39, %v5795_v2  ;;  %v3264_v0 = vmul.f32 %v3001_v50, %v3001_v50  ;;  %v3302_v13 = vadd.f32 %v3301_v3, %v3300_v18 }
 0x300   : > { %3164 = vst.msk [vmem:[%s10507_s10 + $0x58] sm:$0xff] %vm3152_vm4, %v7680_v8  ;;  %5662 = vst.msk [vmem:[%s10512_s13 + $0x58] sm:$0xff] %vm3152_vm4, %v8130_v14  ;;  %v3011_v36 = vpop.f32.mrb[11].mxu0  ;;  %v5510_v52 = vpop.f32.mrb[11].mxu1  ;;  %v5762_v15 = vmul.f32 %v8127_v35, %v8127_v35  ;;  %v3201_v16 = vadd.f32 %v3200_v53, %v3199_v63  ;;  %v5697_v40 = vadd.f32 %v5696_v9, %v5695_v19  ;;  %v5698_v45 = vsel %vm3152_vm4, %v5500_v51, 0.0 }
 0x301   : > { %3163 = vst.msk [vmem:[%s10507_s10 + $0x50] sm:$0xff] %vm3152_vm4, %v3011_v36  ;;  %5661 = vst.msk [vmem:[%s10512_s13 + $0x50] sm:$0xff] %vm3152_vm4, %v5510_v52  ;;  %v3202_v20 = vsel %vm3152_vm4, %v7677_v34, 0.0  ;;  %v3303_v38 = vsel %vm3152_vm4, %v3264_v0, 0.0  ;;  %v5761_v5 = vmul.f32 %v5500_v51, %v5500_v51  ;;  %v5799_v4 = vadd.f32 %v5798_v54, %v5797_v27 }
 0x302   : > { %v3305_v48 = vsel %vm3152_vm4, %v3265_v61, 0.0  ;;  %v5700_v6 = vsel %vm3152_vm4, %v8127_v35, 0.0  ;;  %v3304_v12 = vadd.f32 %v3303_v38, %v3302_v13  ;;  %v5699_v30 = vadd.f32 %v5698_v45, %v5697_v40 }
 0x303   : > { %v7683_v29 = vpop.f32.mrb[12].mxu0  ;;  %v8133_v47 = vpop.f32.mrb[12].mxu1  ;;  %v5800_v7 = vsel %vm3152_vm4, %v5761_v5, 0.0  ;;  %v3267_v10 = vmul.f32 %v7680_v8, %v7680_v8  ;;  %v3203_v11 = vadd.f32 %v3202_v20, %v3201_v16  ;;  %v3204_v32 = vsel %vm3152_vm4, %v3011_v36, 0.0 }
 0x304   : > { %3166 = vst.msk [vmem:[%s10507_s10 + $0x68] sm:$0xff] %vm3152_vm4, %v7683_v29  ;;  %5664 = vst.msk [vmem:[%s10512_s13 + $0x68] sm:$0xff] %vm3152_vm4, %v8133_v47  ;;  %v3021_v21 = vpop.f32.mrb[13].mxu0  ;;  %v5520_v33 = vpop.f32.mrb[13].mxu1  ;;  %v5802_v41 = vsel %vm3152_vm4, %v5762_v15, 0.0  ;;  %v5801_v49 = vadd.f32 %v5800_v7, %v5799_v4  ;;  %v3266_v57 = vmul.f32 %v3011_v36, %v3011_v36  ;;  %v3306_v1 = vadd.f32 %v3305_v48, %v3304_v12 }
 0x305   : > { %3165 = vst.msk [vmem:[%s10507_s10 + $0x60] sm:$0xff] %vm3152_vm4, %v3021_v21  ;;  %5663 = vst.msk [vmem:[%s10512_s13 + $0x60] sm:$0xff] %vm3152_vm4, %v5520_v33  ;;  %v5764_v17 = vmul.f32 %v8130_v14, %v8130_v14  ;;  %v3205_v37 = vadd.f32 %v3204_v32, %v3203_v11  ;;  %v5701_v56 = vadd.f32 %v5700_v6, %v5699_v30  ;;  %v5702_v31 = vsel %vm3152_vm4, %v5510_v52, 0.0 }
 0x306   : > { %v3206_v23 = vsel %vm3152_vm4, %v7680_v8, 0.0  ;;  %v3307_v62 = vsel %vm3152_vm4, %v3266_v57, 0.0  ;;  %v5763_v55 = vmul.f32 %v5510_v52, %v5510_v52  ;;  %v5803_v26 = vadd.f32 %v5802_v41, %v5801_v49 }
 0x307   : > { %v7686_v22 = vpop.f32.mrb[14].mxu0  ;;  %v10614_v24 = vpop.f32.mrb[14].mxu1  ;;  %v3309_v25 = vsel %vm3152_vm4, %v3267_v10, 0.0  ;;  %v5704_v28 = vsel %vm3152_vm4, %v8130_v14, 0.0  ;;  %v3308_v34 = vadd.f32 %v3307_v62, %v3306_v1  ;;  %v5703_v35 = vadd.f32 %v5702_v31, %v5701_v56 }
 0x308   : > { %3168 = vst.msk [vmem:[%s10507_s10 + $0x78] sm:$0xff] %vm3152_vm4, %v7686_v22  ;;  %5666 = vst.msk [vmem:[%s10512_s13 + $0x78] sm:$0xff] %vm3152_vm4, %v10614_v24  ;;  %v3031_v42 = vpop.f32.mrb[15].mxu0  ;;  %v5530_v43 = vpop.f32.mrb[15].mxu1  ;;  %v5804_v44 = vsel %vm3152_vm4, %v5763_v55, 0.0  ;;  %v3269_v46 = vmul.f32 %v7683_v29, %v7683_v29  ;;  %v3207_v50 = vadd.f32 %v3206_v23, %v3205_v37  ;;  %v3208_v51 = vsel %vm3152_vm4, %v3021_v21, 0.0 }
 0x309   : > { %3167 = vst.msk [vmem:[%s10507_s10 + $0x70] sm:$0xff] %vm3152_vm4, %v3031_v42  ;;  %5665 = vst.msk [vmem:[%s10512_s13 + $0x70] sm:$0xff] %vm3152_vm4, %v5530_v43  ;;  %v5806_v58 = vsel %vm3152_vm4, %v5764_v17, 0.0  ;;  %v5805_v59 = vadd.f32 %v5804_v44, %v5803_v26  ;;  %v3268_v60 = vmul.f32 %v3021_v21, %v3021_v21  ;;  %v3310_v2 = vadd.f32 %v3309_v25, %v3308_v34 }
 0x30a   : > { %v5766_v3 = vmul.f32 %v8133_v47, %v8133_v47  ;;  %v3209_v9 = vadd.f32 %v3208_v51, %v3207_v50  ;;  %v5705_v18 = vadd.f32 %v5704_v28, %v5703_v35  ;;  %v5706_v19 = vsel %vm3152_vm4, %v5520_v33, 0.0 }
 0x30b   : > { %v10631_v39 = vpop.f32.mrb[16].mxu0  ;;  %v10633_v61 = vpop.f32.mrb[16].mxu1  ;;  %v3210_v63 = vsel %vm3152_vm4, %v7683_v29, 0.0  ;;  %v3311_v53 = vsel %vm3152_vm4, %v3268_v60, 0.0  ;;  %v5765_v8 = vmul.f32 %v5520_v33, %v5520_v33  ;;  %v5807_v14 = vadd.f32 %v5806_v58, %v5805_v59 }
 0x30c   : > { %3170 = vst.msk [vmem:[%s10507_s10 + $0x88] sm:$0xff] %vm3152_vm4, %v10631_v39  ;;  %5668 = vst.msk [vmem:[%s10512_s13 + $0x88] sm:$0xff] %vm3152_vm4, %v10633_v61  ;;  %v3041_v54 = vpop.f32.mrb[17].mxu0  ;;  %v5540_v27 = vpop.f32.mrb[17].mxu1  ;;  %v3313_v0 = vsel %vm3152_vm4, %v3269_v46, 0.0  ;;  %v5708_v13 = vsel %vm3152_vm4, %v8133_v47, 0.0  ;;  %v3312_v36 = vadd.f32 %v3311_v53, %v3310_v2  ;;  %v5707_v52 = vadd.f32 %v5706_v19, %v5705_v18 }
 0x30d   : > { %3169 = vst.msk [vmem:[%s10507_s10 + $0x80] sm:$0xff] %vm3152_vm4, %v3041_v54  ;;  %5667 = vst.msk [vmem:[%s10512_s13 + $0x80] sm:$0xff] %vm3152_vm4, %v5540_v27  ;;  %v5808_v15 = vsel %vm3152_vm4, %v5765_v8, 0.0  ;;  %v3271_v16 = vmul.f32 %v7686_v22, %v7686_v22  ;;  %v3211_v40 = vadd.f32 %v3210_v63, %v3209_v9  ;;  %v3212_v45 = vsel %vm3152_vm4, %v3031_v42, 0.0 }
 0x30e   : > { %v5810_v20 = vsel %vm3152_vm4, %v5766_v3, 0.0  ;;  %v5809_v38 = vadd.f32 %v5808_v15, %v5807_v14  ;;  %v3270_v5 = vmul.f32 %v3031_v42, %v3031_v42  ;;  %v3314_v4 = vadd.f32 %v3313_v0, %v3312_v36 }
 0x30f   : > { %v10652_v48 = vpop.f32.mrb[18].mxu0  ;;  %v10654_v6 = vpop.f32.mrb[18].mxu1  ;;  %v5768_v12 = vmul.f32 %v10614_v24, %v10614_v24  ;;  %v3213_v30 = vadd.f32 %v3212_v45, %v3211_v40  ;;  %v5709_v29 = vadd.f32 %v5708_v13, %v5707_v52  ;;  %v5710_v47 = vsel %vm3152_vm4, %v5530_v43, 0.0 }
 0x310   : > { %3172 = vst.msk [vmem:[%s10507_s10 + $0x98] sm:$0xff] %vm3152_vm4, %v10652_v48  ;;  %5670 = vst.msk [vmem:[%s10512_s13 + $0x98] sm:$0xff] %vm3152_vm4, %v10654_v6  ;;  %v3051_v7 = vpop.f32.mrb[19].mxu0  ;;  %v5550_v10 = vpop.f32.mrb[19].mxu1  ;;  %v3214_v11 = vsel %vm3152_vm4, %v7686_v22, 0.0  ;;  %v3315_v32 = vsel %vm3152_vm4, %v3270_v5, 0.0  ;;  %v5767_v21 = vmul.f32 %v5530_v43, %v5530_v43  ;;  %v5811_v33 = vadd.f32 %v5810_v20, %v5809_v38 }
 0x311   : > { %3171 = vst.msk [vmem:[%s10507_s10 + $0x90] sm:$0xff] %vm3152_vm4, %v3051_v7  ;;  %5669 = vst.msk [vmem:[%s10512_s13 + $0x90] sm:$0xff] %vm3152_vm4, %v5550_v10  ;;  %v3317_v41 = vsel %vm3152_vm4, %v3271_v16, 0.0  ;;  %v5712_v49 = vsel %vm3152_vm4, %v10614_v24, 0.0  ;;  %v3316_v57 = vadd.f32 %v3315_v32, %v3314_v4  ;;  %v5711_v1 = vadd.f32 %v5710_v47, %v5709_v29 }
 0x312   : > { %v5812_v17 = vsel %vm3152_vm4, %v5767_v21, 0.0  ;;  %v3273_v37 = vmul.f32 %v10631_v39, %v10631_v39  ;;  %v3215_v56 = vadd.f32 %v3214_v11, %v3213_v30  ;;  %v3216_v31 = vsel %vm3152_vm4, %v3041_v54, 0.0 }
 0x313   : > { %v10678_v23 = vpop.f32.mrb[20].mxu0  ;;  %v10680_v62 = vpop.f32.mrb[20].mxu1  ;;  %v5814_v55 = vsel %vm3152_vm4, %v5768_v12, 0.0  ;;  %v5813_v26 = vadd.f32 %v5812_v17, %v5811_v33  ;;  %v3272_v22 = vmul.f32 %v3041_v54, %v3041_v54  ;;  %v3318_v24 = vadd.f32 %v3317_v41, %v3316_v57 }
 0x314   : > { %3174 = vst.msk [vmem:[%s10507_s10 + $0xa8] sm:$0xff] %vm3152_vm4, %v10678_v23  ;;  %5672 = vst.msk [vmem:[%s10512_s13 + $0xa8] sm:$0xff] %vm3152_vm4, %v10680_v62  ;;  %v3061_v25 = vpop.f32.mrb[21].mxu0  ;;  %v10689_v28 = vpop.f32.mrb[21].mxu1  ;;  %v5770_v34 = vmul.f32 %v10633_v61, %v10633_v61  ;;  %v3217_v35 = vadd.f32 %v3216_v31, %v3215_v56  ;;  %v5713_v42 = vadd.f32 %v5712_v49, %v5711_v1  ;;  %v5714_v43 = vsel %vm3152_vm4, %v5540_v27, 0.0 }
 0x315   : > { %3173 = vst.msk [vmem:[%s10507_s10 + $0xa0] sm:$0xff] %vm3152_vm4, %v3061_v25  ;;  %5671 = vst.msk [vmem:[%s10512_s13 + $0xa0] sm:$0xff] %vm3152_vm4, %v10689_v28  ;;  %v3218_v44 = vsel %vm3152_vm4, %v10631_v39, 0.0  ;;  %v3319_v46 = vsel %vm3152_vm4, %v3272_v22, 0.0  ;;  %v5769_v50 = vmul.f32 %v5540_v27, %v5540_v27  ;;  %v5815_v51 = vadd.f32 %v5814_v55, %v5813_v26 }
 0x316   : > { %v3321_v58 = vsel %vm3152_vm4, %v3273_v37, 0.0  ;;  %v5716_v59 = vsel %vm3152_vm4, %v10633_v61, 0.0  ;;  %v3320_v60 = vadd.f32 %v3319_v46, %v3318_v24  ;;  %v5715_v2 = vadd.f32 %v5714_v43, %v5713_v42 }
 0x317   : > { %v10705_v3 = vpop.f32.mrb[22].mxu0  ;;  %v10707_v9 = vpop.f32.mrb[22].mxu1  ;;  %v5816_v18 = vsel %vm3152_vm4, %v5769_v50, 0.0  ;;  %v3275_v19 = vmul.f32 %v10652_v48, %v10652_v48  ;;  %v3219_v39 = vadd.f32 %v3218_v44, %v3217_v35  ;;  %v3220_v63 = vsel %vm3152_vm4, %v3051_v7, 0.0 }
 0x318   : > { %3176 = vst.msk [vmem:[%s10507_s10 + $0xb8] sm:$0xff] %vm3152_vm4, %v10705_v3  ;;  %5674 = vst.msk [vmem:[%s10512_s13 + $0xb8] sm:$0xff] %vm3152_vm4, %v10707_v9  ;;  %v3071_v61 = vpop.f32.mrb[23].mxu0  ;;  %v10719_v53 = vpop.f32.mrb[23].mxu1  ;;  %v5818_v8 = vsel %vm3152_vm4, %v5770_v34, 0.0  ;;  %v5817_v14 = vadd.f32 %v5816_v18, %v5815_v51  ;;  %v3274_v54 = vmul.f32 %v3051_v7, %v3051_v7  ;;  %v3322_v27 = vadd.f32 %v3321_v58, %v3320_v60 }
 0x319   : > { %3175 = vst.msk [vmem:[%s10507_s10 + $0xb0] sm:$0xff] %vm3152_vm4, %v3071_v61  ;;  %5673 = vst.msk [vmem:[%s10512_s13 + $0xb0] sm:$0xff] %vm3152_vm4, %v10719_v53  ;;  %v5772_v0 = vmul.f32 %v10654_v6, %v10654_v6  ;;  %v3221_v13 = vadd.f32 %v3220_v63, %v3219_v39  ;;  %v5717_v36 = vadd.f32 %v5716_v59, %v5715_v2  ;;  %v5718_v52 = vsel %vm3152_vm4, %v5550_v10, 0.0 }
 0x31a   : > { %v3222_v15 = vsel %vm3152_vm4, %v10652_v48, 0.0  ;;  %v3323_v16 = vsel %vm3152_vm4, %v3274_v54, 0.0  ;;  %v5771_v40 = vmul.f32 %v5550_v10, %v5550_v10  ;;  %v5819_v45 = vadd.f32 %v5818_v8, %v5817_v14 }
 0x31b   : > { %v10733_v20 = vpop.f32.mrb[24].mxu0  ;;  %v10735_v38 = vpop.f32.mrb[24].mxu1  ;;  %v3325_v5 = vsel %vm3152_vm4, %v3275_v19, 0.0  ;;  %v5720_v4 = vsel %vm3152_vm4, %v10654_v6, 0.0  ;;  %v3324_v12 = vadd.f32 %v3323_v16, %v3322_v27  ;;  %v5719_v30 = vadd.f32 %v5718_v52, %v5717_v36 }
 0x31c   : > { %3178 = vst.msk [vmem:[%s10507_s10 + $0xc8] sm:$0xff] %vm3152_vm4, %v10733_v20  ;;  %5676 = vst.msk [vmem:[%s10512_s13 + $0xc8] sm:$0xff] %vm3152_vm4, %v10735_v38  ;;  %v10746_v48 = vpop.f32.mrb[25].mxu0  ;;  %v10748_v29 = vpop.f32.mrb[25].mxu1  ;;  %v5820_v47 = vsel %vm3152_vm4, %v5771_v40, 0.0  ;;  %v3277_v7 = vmul.f32 %v10678_v23, %v10678_v23  ;;  %v3223_v10 = vadd.f32 %v3222_v15, %v3221_v13  ;;  %v3224_v6 = vsel %vm3152_vm4, %v3061_v25, 0.0 }
 0x31d   : > { %3177 = vst.msk [vmem:[%s10507_s10 + $0xc0] sm:$0xff] %vm3152_vm4, %v10746_v48  ;;  %5675 = vst.msk [vmem:[%s10512_s13 + $0xc0] sm:$0xff] %vm3152_vm4, %v10748_v29  ;;  %v5822_v11 = vsel %vm3152_vm4, %v5772_v0, 0.0  ;;  %v5821_v32 = vadd.f32 %v5820_v47, %v5819_v45  ;;  %v3276_v21 = vmul.f32 %v3061_v25, %v3061_v25  ;;  %v3326_v33 = vadd.f32 %v3325_v5, %v3324_v12 }
 0x31e   : > { %v5774_v41 = vmul.f32 %v10680_v62, %v10680_v62  ;;  %v3225_v49 = vadd.f32 %v3224_v6, %v3223_v10  ;;  %v5721_v57 = vadd.f32 %v5720_v4, %v5719_v30  ;;  %v5722_v1 = vsel %vm3152_vm4, %v10689_v28, 0.0 }
 0x31f   : > { %v10765_v17 = vpop.f32.mrb[26].mxu0  ;;  %v10767_v37 = vpop.f32.mrb[26].mxu1  ;;  %v3226_v56 = vsel %vm3152_vm4, %v10678_v23, 0.0  ;;  %v3327_v31 = vsel %vm3152_vm4, %v3276_v21, 0.0  ;;  %v5773_v55 = vmul.f32 %v10689_v28, %v10689_v28  ;;  %v5823_v26 = vadd.f32 %v5822_v11, %v5821_v32 }
 0x320   : > { %3180 = vst.msk [vmem:[%s10507_s10 + $0xd8] sm:$0xff] %vm3152_vm4, %v10765_v17  ;;  %5678 = vst.msk [vmem:[%s10512_s13 + $0xd8] sm:$0xff] %vm3152_vm4, %v10767_v37  ;;  %v10780_v22 = vpop.f32.mrb[27].mxu0  ;;  %v10782_v24 = vpop.f32.mrb[27].mxu1  ;;  %v3329_v25 = vsel %vm3152_vm4, %v3277_v7, 0.0  ;;  %v5724_v23 = vsel %vm3152_vm4, %v10680_v62, 0.0  ;;  %v3328_v34 = vadd.f32 %v3327_v31, %v3326_v33  ;;  %v5723_v35 = vadd.f32 %v5722_v1, %v5721_v57 }
 0x321   : > { %3179 = vst.msk [vmem:[%s10507_s10 + $0xd0] sm:$0xff] %vm3152_vm4, %v10780_v22  ;;  %5677 = vst.msk [vmem:[%s10512_s13 + $0xd0] sm:$0xff] %vm3152_vm4, %v10782_v24  ;;  %v5824_v28 = vsel %vm3152_vm4, %v5773_v55, 0.0  ;;  %v3279_v42 = vmul.f32 %v10705_v3, %v10705_v3  ;;  %v3227_v43 = vadd.f32 %v3226_v56, %v3225_v49  ;;  %v3228_v44 = vsel %vm3152_vm4, %v3071_v61, 0.0 }
 0x322   : > { %v5826_v62 = vsel %vm3152_vm4, %v5774_v41, 0.0  ;;  %v5825_v46 = vadd.f32 %v5824_v28, %v5823_v26  ;;  %v3278_v50 = vmul.f32 %v3071_v61, %v3071_v61  ;;  %v3330_v51 = vadd.f32 %v3329_v25, %v3328_v34 }
 0x323   : > { %v10798_v58 = vpop.f32.mrb[28].mxu0  ;;  %v10800_v59 = vpop.f32.mrb[28].mxu1  ;;  %v5776_v60 = vmul.f32 %v10707_v9, %v10707_v9  ;;  %v3229_v2 = vadd.f32 %v3228_v44, %v3227_v43  ;;  %v5725_v18 = vadd.f32 %v5724_v23, %v5723_v35  ;;  %v5726_v19 = vsel %vm3152_vm4, %v10719_v53, 0.0 }
 0x324   : > { %3182 = vst.msk [vmem:[%s10507_s10 + $0xe8] sm:$0xff] %vm3152_vm4, %v10798_v58  ;;  %5680 = vst.msk [vmem:[%s10512_s13 + $0xe8] sm:$0xff] %vm3152_vm4, %v10800_v59  ;;  %v10812_v39 = vpop.f32.mrb[29].mxu0  ;;  %v10814_v63 = vpop.f32.mrb[29].mxu1  ;;  %v3230_v61 = vsel %vm3152_vm4, %v10705_v3, 0.0  ;;  %v3331_v8 = vsel %vm3152_vm4, %v3278_v50, 0.0  ;;  %v5775_v14 = vmul.f32 %v10719_v53, %v10719_v53  ;;  %v5827_v54 = vadd.f32 %v5826_v62, %v5825_v46 }
 0x325   : > { %3181 = vst.msk [vmem:[%s10507_s10 + $0xe0] sm:$0xff] %vm3152_vm4, %v10812_v39  ;;  %5679 = vst.msk [vmem:[%s10512_s13 + $0xe0] sm:$0xff] %vm3152_vm4, %v10814_v63  ;;  %v3333_v27 = vsel %vm3152_vm4, %v3279_v42, 0.0  ;;  %v5728_v0 = vsel %vm3152_vm4, %v10707_v9, 0.0  ;;  %v3332_v3 = vadd.f32 %v3331_v8, %v3330_v51  ;;  %v5727_v13 = vadd.f32 %v5726_v19, %v5725_v18 }
 0x326   : > { %v5828_v36 = vsel %vm3152_vm4, %v5775_v14, 0.0  ;;  %v3281_v53 = vmul.f32 %v10733_v20, %v10733_v20  ;;  %v3231_v52 = vadd.f32 %v3230_v61, %v3229_v2  ;;  %v3232_v15 = vsel %vm3152_vm4, %v10746_v48, 0.0 }
 0x327   : > { %v10835_v16 = vpop.f32.mrb[30].mxu0  ;;  %v10837_v40 = vpop.f32.mrb[30].mxu1  ;;  %v5830_v45 = vsel %vm3152_vm4, %v5776_v60, 0.0  ;;  %v5829_v9 = vadd.f32 %v5828_v36, %v5827_v54  ;;  %v3280_v5 = vmul.f32 %v10746_v48, %v10746_v48  ;;  %v3334_v4 = vadd.f32 %v3333_v27, %v3332_v3 }
 0x328   : > { %3184 = vst.msk [vmem:[%s10507_s10 + $0xf8] sm:$0xff] %vm3152_vm4, %v10835_v16  ;;  %5682 = vst.msk [vmem:[%s10512_s13 + $0xf8] sm:$0xff] %vm3152_vm4, %v10837_v40  ;;  %v3111_v12 = vpop.f32.mrb[31].mxu0  ;;  %v10848_v30 = vpop.f32.mrb[31].mxu1  ;;  %v5778_v47 = vmul.f32 %v10735_v38, %v10735_v38  ;;  %v3233_v7 = vadd.f32 %v3232_v15, %v3231_v52  ;;  %v5729_v10 = vadd.f32 %v5728_v0, %v5727_v13  ;;  %v5730_v6 = vsel %vm3152_vm4, %v10748_v29, 0.0 }
 0x329   : > { %3183 = vst.msk [vmem:[%s10507_s10 + $0xf0] sm:$0xff] %vm3152_vm4, %v3111_v12  ;;  %5681 = vst.msk [vmem:[%s10512_s13 + $0xf0] sm:$0xff] %vm3152_vm4, %v10848_v30  ;;  %v3234_v48 = vsel %vm3152_vm4, %v10733_v20, 0.0  ;;  %v3335_v11 = vsel %vm3152_vm4, %v3280_v5, 0.0  ;;  %v5777_v32 = vmul.f32 %v10748_v29, %v10748_v29  ;;  %v5831_v21 = vadd.f32 %v5830_v45, %v5829_v9 }
 0x32a   : > { %v3337_v33 = vsel %vm3152_vm4, %v3281_v53, 0.0  ;;  %v5732_v41 = vsel %vm3152_vm4, %v10735_v38, 0.0  ;;  %v3336_v49 = vadd.f32 %v3335_v11, %v3334_v4  ;;  %v5731_v57 = vadd.f32 %v5730_v6, %v5729_v10 }
 0x32b   : > { %v5832_v1 = vsel %vm3152_vm4, %v5777_v32, 0.0  ;;  %v3283_v56 = vmul.f32 %v10765_v17, %v10765_v17  ;;  %v3235_v31 = vadd.f32 %v3234_v48, %v3233_v7  ;;  %v3236_v20 = vsel %vm3152_vm4, %v10780_v22, 0.0 }
 0x32c   : > { %v5834_v55 = vsel %vm3152_vm4, %v5778_v47, 0.0  ;;  %v5833_v29 = vadd.f32 %v5832_v1, %v5831_v21  ;;  %v3282_v26 = vmul.f32 %v10780_v22, %v10780_v22  ;;  %v3338_v25 = vadd.f32 %v3337_v33, %v3336_v49 }
 0x32d   : > { %v3238_v38 = vsel %vm3152_vm4, %v10765_v17, 0.0  ;;  %v3237_v23 = vadd.f32 %v3236_v20, %v3235_v31  ;;  %v5733_v34 = vadd.f32 %v5732_v41, %v5731_v57  ;;  %v5734_v35 = vsel %vm3152_vm4, %v10782_v24, 0.0 }
 0x32e   : > { %v5780_v28 = vmul.f32 %v10767_v37, %v10767_v37  ;;  %v3339_v42 = vsel %vm3152_vm4, %v3282_v26, 0.0  ;;  %v5779_v43 = vmul.f32 %v10782_v24, %v10782_v24  ;;  %v5835_v44 = vadd.f32 %v5834_v55, %v5833_v29 }
 0x32f   : > { %v3341_v22 = vsel %vm3152_vm4, %v3283_v56, 0.0  ;;  %v5736_v62 = vsel %vm3152_vm4, %v10767_v37, 0.0  ;;  %v3340_v17 = vadd.f32 %v3339_v42, %v3338_v25  ;;  %v5735_v46 = vadd.f32 %v5734_v35, %v5733_v34 }
 0x330   : > { %v5836_v50 = vsel %vm3152_vm4, %v5779_v43, 0.0  ;;  %v3285_v51 = vmul.f32 %v10798_v58, %v10798_v58  ;;  %v3239_v60 = vadd.f32 %v3238_v38, %v3237_v23  ;;  %v3240_v2 = vsel %vm3152_vm4, %v10812_v39, 0.0 }
 0x331   : > { %v5837_v18 = vadd.f32 %v5836_v50, %v5835_v44  ;;  %v5782_v24 = vmul.f32 %v10800_v59, %v10800_v59  ;;  %v3284_v19 = vmul.f32 %v10812_v39, %v10812_v39  ;;  %v3342_v61 = vadd.f32 %v3341_v22, %v3340_v17 }
 0x332   : > { %v5838_v37 = vsel %vm3152_vm4, %v5780_v28, 0.0  ;;  %v3241_v8 = vadd.f32 %v3240_v2, %v3239_v60  ;;  %v5737_v14 = vadd.f32 %v5736_v62, %v5735_v46  ;;  %v5738_v54 = vsel %vm3152_vm4, %v10814_v63, 0.0 }
 0x333   : > { %v3242_v27 = vsel %vm3152_vm4, %v10798_v58, 0.0  ;;  %v3343_v0 = vsel %vm3152_vm4, %v3284_v19, 0.0  ;;  %v5781_v3 = vmul.f32 %v10814_v63, %v10814_v63  ;;  %v5839_v13 = vadd.f32 %v5838_v37, %v5837_v18 }
 0x334   : > { %v3345_v36 = vsel %vm3152_vm4, %v3285_v51, 0.0  ;;  %v5740_v39 = vsel %vm3152_vm4, %v10800_v59, 0.0  ;;  %v3344_v53 = vadd.f32 %v3343_v0, %v3342_v61  ;;  %v5739_v52 = vadd.f32 %v5738_v54, %v5737_v14 }
 0x335   : > { %v5842_v15 = vsel %vm3152_vm4, %v5782_v24, 0.0  ;;  %v5840_v45 = vsel %vm3152_vm4, %v5781_v3, 0.0  ;;  %v3243_v9 = vadd.f32 %v3242_v27, %v3241_v8  ;;  %v3244_v58 = vsel %vm3152_vm4, %v3111_v12, 0.0 }
 0x336   : > { %v5841_v5 = vadd.f32 %v5840_v45, %v5839_v13  ;;  %v3287_v4 = vmul.f32 %v10835_v16, %v10835_v16  ;;  %v3286_v63 = vmul.f32 %v3111_v12, %v3111_v12  ;;  %v3346_v47 = vadd.f32 %v3345_v36, %v3344_v53 }
 0x337   : > { %v3246_v7 = vsel %vm3152_vm4, %v10835_v16, 0.0  ;;  %v3245_v10 = vadd.f32 %v3244_v58, %v3243_v9  ;;  %v5741_v59 = vadd.f32 %v5740_v39, %v5739_v52  ;;  %v5742_v6 = vsel %vm3152_vm4, %v10848_v30, 0.0 }
 0x338   : > { %v5784_v48 = vmul.f32 %v10837_v40, %v10837_v40  ;;  %v3347_v11 = vsel %vm3152_vm4, %v3286_v63, 0.0  ;;  %v5783_v32 = vmul.f32 %v10848_v30, %v10848_v30  ;;  %v5843_v21 = vadd.f32 %v5842_v15, %v5841_v5 }
 0x339   : > { %v3247_v33 = vadd.f32 %v3246_v7, %v3245_v10  ;;  %v3348_v12 = vadd.f32 %v3347_v11, %v3346_v47  ;;  %v5743_v41 = vadd.f32 %v5742_v6, %v5741_v59  ;;  %v3349_v49 = vsel %vm3152_vm4, %v3287_v4, 0.0 }
 0x33a   : > { %v5744_v16 = vsel %vm3152_vm4, %v10837_v40, 0.0  ;;  %v5844_v57 = vsel %vm3152_vm4, %v5783_v32, 0.0  ;;  %v5846_v55 = vsel %vm3152_vm4, %v5784_v48, 0.0 }
 0x33b   : > { %v3248_v1 = vrot.slane %v3247_v33, 4  ;;  %v3350_v56 = vadd.f32 %v3349_v49, %v3348_v12  ;;  %v5745_v31 = vadd.f32 %v5744_v16, %v5743_v41  ;;  %v5845_v20 = vadd.f32 %v5844_v57, %v5843_v21 }
 0x33d   : > { %v3249_v29 = vadd.f32 %v3248_v1, %v3247_v33  ;;  %v3351_v30 = vrot.slane %v3350_v56, 4  ;;  %v5746_v26 = vrot.slane %v5745_v31, 4  ;;  %v5847_v25 = vadd.f32 %v5846_v55, %v5845_v20 }
 0x33f   : > { %v3250_v38 = vrot.slane %v3249_v29, 2  ;;  %v3352_v23 = vadd.f32 %v3351_v30, %v3350_v56  ;;  %v5747_v34 = vadd.f32 %v5746_v26, %v5745_v31  ;;  %v5848_v35 = vrot.slane %v5847_v25, 4 }
 0x341   : > { %v3251_v40 = vadd.f32 %v3250_v38, %v3249_v29  ;;  %v3353_v28 = vrot.slane %v3352_v23, 2  ;;  %v5748_v42 = vrot.slane %v5747_v34, 2  ;;  %v5849_v43 = vadd.f32 %v5848_v35, %v5847_v25 }
 0x343   : > { %v3252_v44 = vrot.slane %v3251_v40, 1  ;;  %v3354_v22 = vadd.f32 %v3353_v28, %v3352_v23  ;;  %v5749_v62 = vadd.f32 %v5748_v42, %v5747_v34  ;;  %v5850_v17 = vrot.slane %v5849_v43, 2 }
 0x345   : > { %v3253_v46 = vadd.f32 %v3252_v44, %v3251_v40  ;;  %v3355_v50 = vrot.slane %v3354_v22, 1  ;;  %v5750_v51 = vrot.slane %v5749_v62, 1  ;;  %v5851_v60 = vadd.f32 %v5850_v17, %v5849_v43 }
 0x347   : > { %3255 = vst.msk [vmem:[%s336_s16] sm:$0x1] %vm3254_vm5, %v3253_v46  ;;  %v3356_v2 = vadd.f32 %v3355_v50, %v3354_v22  ;;  %v5751_v18 = vadd.f32 %v5750_v51, %v5749_v62  ;;  %v5852_v24 = vrot.slane %v5851_v60, 1 }
 0x349   : > { %3357 = vst.msk [vmem:[%s339_s20] sm:$0x1] %vm3254_vm5, %v3356_v2  ;;  %5752 = vst.msk [vmem:[%s347_s23] sm:$0x1] %vm3254_vm5, %v5751_v18  ;;  %v5853_v19 = vadd.f32 %v5852_v24, %v5851_v60 }
 0x34b   : > { %5854 = vst.msk [vmem:[%s350_s26] sm:$0x1] %vm3254_vm5, %v5853_v19 }
 0x34c PF: > { %s19_s27 = sadd.s32 1, %s8716_s27  }
 0x34d   : > { %p16_p4 = scmp.ge.s32.totalorder %s19_s27, 4  }
 0x34f   :  { %18 = sbr.rel (!%p16_p4) target bundleno = 1 (0x1), region = 138 }

</bundles_post_ra>
